<compile_context>
chip_gen: v6e
topology: v6e:2x2x1
jax: 0.10.0
libtpu: 0.0.40
codegen_flags: <defaults>
</compile_context>

<pallas_src>
import jax
import jax.numpy as jnp
from jax.experimental import pallas as pl
from jax.experimental.pallas import tpu as pltpu


def _round_up(a: int, b: int) -> int:
    return (a + b - 1) // b * b


def _choose_tile_n(n: int, tile_n_max: int, min_steps: int = 4) -> int:
    """MXU-aligned tile (multiple of 256), capped at tile_n_max, shrunk so the
    grid has >= min_steps steps when N allows it (>= 2 steps for N > 256, so
    v7x's two TensorCores both get work)."""
    tile = max(256, _round_up(pl.cdiv(n, min_steps), 256))
    return min(tile_n_max, tile)


def attn_net_kernel(x_ref, w1_ref, b1_ref, w2_ref, b2_ref, a_ref):
    """One N-tile of Attn_Net.

    x_ref  : [tile_n, L] f32   streamed per grid step (cast to bf16 in-kernel)
    w1_ref : [L, D]      bf16  resident (constant index_map)
    b1_ref : [1, D]      f32
    w2_ref : [D, C]      f32   resident
    b2_ref : [1, C]      f32
    a_ref  : [tile_n, C] f32
    """
    # Cast on the VPU (free filler under the DMA-bound stream); both MXU
    # operands bf16 -> fast MXU path on v5e, f32 accumulation.
    x_bf = x_ref[...].astype(jnp.bfloat16)
    h = jnp.dot(x_bf, w1_ref[...], preferred_element_type=jnp.float32)
    # Bias + tanh in f32 (v5e has no bf16 VPU/EUP; tanh goes to the EUP).
    h = jnp.tanh(h + b1_ref[...])
    # Second projection: tiny (C=1), standard contraction -> no transposes,
    # f32 keeps full precision; cost is hidden under the x DMA.
    a = jnp.dot(h, w2_ref[...], preferred_element_type=jnp.float32)
    a_ref[...] = (a + b2_ref[...]).astype(a_ref.dtype)


def attn_net_forward(x, w1, b1, w2, b2, *, tile_n=2048):
    """Pallas forward for Attn_Net. Returns (A, x) like the PyTorch module.

    x : [N, L];  w1: [L, D], b1: [D];  w2: [D, C], b2: [C];  A: [N, C]
    """
    N, L = x.shape
    D = w1.shape[1]
    C = w2.shape[1]

    tile_n = _choose_tile_n(N, tile_n)
    grid = (pl.cdiv(N, tile_n),)

    # Only the (small, resident) weights are pre-cast; x streams in f32.
    w1_bf = w1.astype(jnp.bfloat16)
    b1_2d = b1.reshape(1, D).astype(jnp.float32)
    w2_2d = w2.reshape(D, C).astype(jnp.float32)
    b2_2d = b2.reshape(1, C).astype(jnp.float32)

    cost = pl.CostEstimate(
        flops=2 * N * L * D + 2 * N * D * C,
        transcendentals=N * D,
        bytes_accessed=(x.size * x.dtype.itemsize          # x stream (f32)
                        + w1_bf.size * 2                    # W1 (bf16)
                        + b1_2d.size * 4 + w2_2d.size * 4 + b2_2d.size * 4
                        + N * C * 4),                       # A output
    )

    a = pl.pallas_call(
        attn_net_kernel,
        out_shape=jax.ShapeDtypeStruct((N, C), jnp.float32),
        grid_spec=pltpu.PrefetchScalarGridSpec(
            num_scalar_prefetch=0,
            grid=grid,
            in_specs=[
                pl.BlockSpec((tile_n, L), lambda i: (i, 0)),  # x tile (streamed)
                pl.BlockSpec((L, D), lambda i: (0, 0)),       # W1 (resident)
                pl.BlockSpec((1, D), lambda i: (0, 0)),       # b1
                pl.BlockSpec((D, C), lambda i: (0, 0)),       # W2
                pl.BlockSpec((1, C), lambda i: (0, 0)),       # b2
            ],
            out_specs=pl.BlockSpec((tile_n, C), lambda i: (i, 0)),
        ),
        compiler_params=pltpu.CompilerParams(
            dimension_semantics=("parallel",),   # shards N-tiles across TCs
            vmem_limit_bytes=48 * 1024 * 1024,   # 2x8 MiB x bufs + temps, fits v7x
        ),
        cost_estimate=cost,
    )(x, w1_bf, b1_2d, w2_2d, b2_2d)

    return a, x


def reference_forward(x, w1, b1, w2, b2):
    return jnp.tanh(x @ w1 + b1) @ w2 + b2


if __name__ == "__main__":
    # Module defaults: L=1024, D=256, n_classes=1. N = number of patches;
    # deliberately NOT a multiple of the tile so the ragged-tail path and the
    # >=2-step grid (megacore) path are both exercised.
    N, L, D, C = 300, 1024, 256, 1

    key = jax.random.PRNGKey(0)
    kx, kw1, kb1, kw2, kb2 = jax.random.split(key, 5)

    x = jax.random.normal(kx, (N, L), dtype=jnp.float32)
    w1 = jax.random.normal(kw1, (L, D), dtype=jnp.float32) * (1.0 / jnp.sqrt(L))
    b1 = jax.random.normal(kb1, (D,), dtype=jnp.float32) * 0.01
    w2 = jax.random.normal(kw2, (D, C), dtype=jnp.float32) * (1.0 / jnp.sqrt(D))
    b2 = jax.random.normal(kb2, (C,), dtype=jnp.float32) * 0.01

    # TODO(synk): nn.Dropout(0.25) path not implemented (identity in eval mode).

    a_out, x_out = attn_net_forward(x, w1, b1, w2, b2)
    a_out = jax.block_until_ready(a_out)
    x_out = jax.block_until_ready(x_out)

    a_ref = reference_forward(x, w1, b1, w2, b2)

    assert a_out.shape == (N, C)
    assert x_out.shape == (N, L)
    # bf16 MXU operands on the dominant matmul -> mixed-precision tolerance.
    assert jnp.allclose(a_out, a_ref, atol=2e-2, rtol=2e-2), float(
        jnp.max(jnp.abs(a_out - a_ref)))
    assert jnp.array_equal(x_out, x)

    print("KERNEL_OK")
</pallas_src>

<mosaic_0001>
module attributes {stable_mosaic.version = 11 : i64} {
  func.func @attn_net_kernel(%arg0: i32, %arg1: memref<256x1024xf32, #tpu.memory_space<vmem>>, %arg2: memref<1024x256xbf16, #tpu.memory_space<vmem>>, %arg3: memref<1x256xf32, #tpu.memory_space<vmem>>, %arg4: memref<256x1xf32, #tpu.memory_space<vmem>>, %arg5: memref<1x1xf32, #tpu.memory_space<vmem>>, %arg6: memref<256x1xf32, #tpu.memory_space<vmem>>) attributes {dimension_semantics = [#tpu.dimension_semantics<parallel>], iteration_bounds = array<i64: 2>, scalar_prefetch = 0 : i64, scratch_operands = 0 : i64, tpu.core_type = #tpu.core_type<tc>, window_params = [{transform_indices = @transform_0, window_bounds = array<i64: 256, 1024>}, {pipeline_mode = #tpu.pipeline_mode<synchronous>, transform_indices = @transform_1, window_bounds = array<i64: 1024, 256>}, {pipeline_mode = #tpu.pipeline_mode<synchronous>, transform_indices = @transform_2, window_bounds = array<i64: 1, 256>}, {pipeline_mode = #tpu.pipeline_mode<synchronous>, transform_indices = @transform_3, window_bounds = array<i64: 256, 1>}, {pipeline_mode = #tpu.pipeline_mode<synchronous>, transform_indices = @transform_4, window_bounds = array<i64: 1, 1>}, {transform_indices = @transform_5, window_bounds = array<i64: 256, 1>}]} {
    %c0 = arith.constant 0 : index
    %c0_0 = arith.constant 0 : index
    %0 = vector.load %arg1[%c0, %c0_0] : memref<256x1024xf32, #tpu.memory_space<vmem>>, vector<256x1024xf32>
    %1 = arith.truncf %0 : vector<256x1024xf32> to vector<256x1024xbf16>
    %c0_1 = arith.constant 0 : index
    %c0_2 = arith.constant 0 : index
    %2 = vector.load %arg2[%c0_1, %c0_2] : memref<1024x256xbf16, #tpu.memory_space<vmem>>, vector<1024x256xbf16>
    %cst = arith.constant dense<0.000000e+00> : vector<256x256xf32>
    %3 = tpu.matmul %1, %2, %cst {dimension_numbers = #tpu.dot_dimension_numbers<[1], [0], [0], [1], [0, 0, 1, 1], [], []>} : vector<256x1024xbf16>, vector<1024x256xbf16>, vector<256x256xf32> -> vector<256x256xf32>
    %c0_3 = arith.constant 0 : index
    %c0_4 = arith.constant 0 : index
    %4 = vector.load %arg3[%c0_3, %c0_4] : memref<1x256xf32, #tpu.memory_space<vmem>>, vector<1x256xf32>
    %5 = vector.broadcast %4 : vector<1x256xf32> to vector<256x256xf32>
    %6 = arith.addf %3, %5 : vector<256x256xf32>
    %7 = math.tanh %6 : vector<256x256xf32>
    %c0_5 = arith.constant 0 : index
    %c0_6 = arith.constant 0 : index
    %8 = vector.load %arg4[%c0_5, %c0_6] : memref<256x1xf32, #tpu.memory_space<vmem>>, vector<256x1xf32>
    %cst_7 = arith.constant dense<0.000000e+00> : vector<256x1xf32>
    %9 = tpu.matmul %7, %8, %cst_7 {dimension_numbers = #tpu.dot_dimension_numbers<[1], [0], [0], [1], [0, 0, 1, 1], [], []>} : vector<256x256xf32>, vector<256x1xf32>, vector<256x1xf32> -> vector<256x1xf32>
    %c0_8 = arith.constant 0 : index
    %c0_9 = arith.constant 0 : index
    %10 = vector.load %arg5[%c0_8, %c0_9] : memref<1x1xf32, #tpu.memory_space<vmem>>, vector<1x1xf32>
    %11 = vector.broadcast %10 : vector<1x1xf32> to vector<256x1xf32>
    %12 = arith.addf %9, %11 : vector<256x1xf32>
    %c0_10 = arith.constant 0 : index
    %c0_11 = arith.constant 0 : index
    %13 = vector.load %arg6[%c0_10, %c0_11] : memref<256x1xf32, #tpu.memory_space<vmem>>, vector<256x1xf32>
    tpu.vector_store %arg6[%c0_10, %c0_11], %12 {strides = array<i32>} : memref<256x1xf32, #tpu.memory_space<vmem>>, vector<256x1xf32>,
    return
  }
  func.func @transform_0(%arg0: i32) -> (i32, i32) {
    %c0_i32 = arith.constant 0 : i32
    %c0_i32_0 = arith.constant 0 : i32
    return %arg0, %c0_i32 : i32, i32
  }
  func.func @transform_1(%arg0: i32) -> (i32, i32) {
    %c0_i32 = arith.constant 0 : i32
    %c0_i32_0 = arith.constant 0 : i32
    %c0_i32_1 = arith.constant 0 : i32
    return %c0_i32, %c0_i32_0 : i32, i32
  }
  func.func @transform_2(%arg0: i32) -> (i32, i32) {
    %c0_i32 = arith.constant 0 : i32
    %c0_i32_0 = arith.constant 0 : i32
    %c0_i32_1 = arith.constant 0 : i32
    return %c0_i32, %c0_i32_0 : i32, i32
  }
  func.func @transform_3(%arg0: i32) -> (i32, i32) {
    %c0_i32 = arith.constant 0 : i32
    %c0_i32_0 = arith.constant 0 : i32
    %c0_i32_1 = arith.constant 0 : i32
    return %c0_i32, %c0_i32_0 : i32, i32
  }
  func.func @transform_4(%arg0: i32) -> (i32, i32) {
    %c0_i32 = arith.constant 0 : i32
    %c0_i32_0 = arith.constant 0 : i32
    %c0_i32_1 = arith.constant 0 : i32
    return %c0_i32, %c0_i32_0 : i32, i32
  }
  func.func @transform_5(%arg0: i32) -> (i32, i32) {
    %c0_i32 = arith.constant 0 : i32
    %c0_i32_0 = arith.constant 0 : i32
    return %arg0, %c0_i32 : i32, i32
  }
}

</mosaic_0001>

<bundles_post_ra>
// kernel: tpu_custom_call.1
= control target key start
LH: loop header
LB: loop body
LE: loop exit
PB: predicated region body
PF: predicated region fallthrough
CT: control target
= control target key end

     0   :  { %s5210_s0 = inlined_call_operand.hbm [shape: f32[300,1024], index: 0, kind: input, shape index: {}]   ;;  %s5211_s1 = inlined_call_operand.hbm [shape: bf16[1024,256], index: 1, kind: input, shape index: {}]   ;;  %s5212_s2 = inlined_call_operand.hbm [shape: f32[1,256], index: 2, kind: input, shape index: {}]   ;;  %s5213_s3 = inlined_call_operand.vmem [shape: f32[256,1], index: 3, kind: input, shape index: {}]   ;;  %s5214_s4 = inlined_call_operand.<no memory space> [shape: f32[1,1], index: 4, kind: input, shape index: {}]   ;;  %s5215_s5 = inlined_call_operand.vmem [shape: f32[300,1], index: 5, kind: output, shape index: {}]  }
   0x1   :  { %v10_v0 = vstv %s5214_s4 }
   0x2   :  { %11 = vst [vmem:[#allocation2] sm:$0x1] %v10_v0 }
   0x3   :  { %12 = vsyncpa [#allocation4], 0 }
   0x4   :  { %14 = vsyncpa [#allocation4 + $0x1], 0 }
   0x5   :  { %15 = vsyncpa [#allocation6], 0  ;;  %s3823_s20 = smov 0   ;;  %s3825_s21 = smov 0  }
   0x6   :  { %s3827_s22 = smov 0   ;;  %s3829_s23 = smov 0  }
   0x7 LB: > { %s3842_s4 = sadd.s32 4294967295, %s3748_s23   ;;  %s3845_s24 = sadd.s32 1, %s3748_s23   ;;  %s3748_s23 = sphi %s3829_s23, %s5402_s23   ;;  %s3744_s22 = sphi %s3827_s22, %s5401_s22   ;;  %s3740_s21 = sphi %s3825_s21, %s5400_s21   ;;  %s3736_s20 = sphi %s3823_s20, %s5399_s20  }
   0x8   : > { %s25_s25 = ssub.s32 %s3748_s23, %s3845_s24  ;;  %s28_s26 = sadd.s32 1, %s3744_s22 }
   0x9   : > { %p26_p0 = scmp.eq.s32.totalorder %s25_s25, 0  ;;  %p35_p1 = scmp.ne.s32.totalorder %s3744_s22, %s3740_s21 }
   0xa   : > { %p36_p2 = scmp.eq.s32.totalorder %s3748_s23, 0  ;;  %p41_p3 = scmp.ne.s32.totalorder %s3740_s21, %s3736_s20 }
   0xb   : > { %s3855_s27 = scalar_select %p26_p0, %s3744_s22, %s28_s26  }
   0xc   : > { %p3857_p4 = por %p36_p2, %p35_p1  ;;  %p5216_p5 = scmp.eq.s32.totalorder %s3842_s4, 0 }
   0xd   : > { %p149_p6 = scmp.eq.s32.totalorder %s3842_s4, 1  ;;  %p2955_p7 = scmp.ge.s32.totalorder %s3748_s23, 1 }
   0xe   : > { %p3866_p8 = por %p5216_p5, %p41_p3  ;;  %p162_p9 = scmp.lt.s32.totalorder %s3748_s23, 3 }
   0xf   : > { %p3871_p10 = por %p149_p6, %p35_p1  ;;  %s3782_s7 = smov [#allocation5]  }
  0x10   : > { %s5221_s29 = scalar_select %p3866_p8, 1, 0 }
  0x11   : > { %s5222_s30 = scalar_select %p3871_p10, 1, 0 }
  0x12   : > { %p3875_p11 = pnand %p2955_p7, %p162_p9  ;;  %s174_s8 = sshll.u32 %s3782_s7, 4  ;;  %s175_s8 = int_to_ptr.vmem [resolvable:$true] %s174_s8 }
  0x13   : > { %s3783_s10 = smov [#allocation7]   ;;  %s3611_s12 = scalar_lea.vmem %s175_s8, 16384 }
  0x14   : > { %p3166_p12 = pneg %p3875_p11  ;;  %s188_s11 = sshll.u32 %s3783_s10, 4  ;;  %s189_s11 = int_to_ptr.vmem [resolvable:$true] %s188_s11 }
  0x15   : > { %p3612_p1 = scmp.ne.s32.totalorder %s175_s8, %s3611_s12  ;;  %p3619_p6 = scmp.lt.s32.totalorder %s175_s8, %s175_s8 }
  0x16   : > { %p3883_p13 = pnand %p3166_p12, %p5216_p5  ;;  %p3620_p7 = scmp.lt.s32.totalorder %s3611_s12, %s3611_s12 }
  0x18   : > { %p3602_p0 = pneg %p3883_p13  ;;  %p3621_p9 = por %p3620_p7, %p3619_p6 }
  0x1a   : > { %p3614_p2 = pnand %p3612_p1, %p3602_p0 }
  0x1c   : > { %p3615_p3 = pneg %p3614_p2 }
  0x1e   : > { %p3622_p12 = pnand %p3621_p9, %p3615_p3 }
  0x20   : > { %3625 = shalt.err (!%p3622_p12)
}
  0x21   : > { %s3784_s13 = smov 128   ;;  %s3785_s14 = smov 8  }
  0x22   : > { %3169 = dma.hbm_to_vmem [thread:$0]  (!%p3883_p13), %s5211_s1, 16384, %s175_s8, [#allocation6], %s3784_s13, %s3784_s13, %s3785_s14  }
  0x23   : > { %s3637_s17 = scalar_lea.vmem %s189_s11, 32  ;;  %p3645_p10 = scmp.lt.s32.totalorder %s189_s11, %s189_s11 }
  0x24   : > { %p3638_p5 = scmp.ne.s32.totalorder %s189_s11, %s3637_s17  ;;  %p3646_p8 = scmp.lt.s32.totalorder %s3637_s17, %s3637_s17 }
  0x26   : > { %p3640_p1 = pnand %p3638_p5, %p3602_p0  ;;  %p3647_p6 = por %p3646_p8, %p3645_p10 }
  0x28   : > { %p3641_p2 = pneg %p3640_p1 }
  0x2a   : > { %p3648_p3 = pnand %p3647_p6, %p3641_p2 }
  0x2c   : > { %3651 = shalt.err (!%p3648_p3)
}
  0x2d   : > { %3172 = dma.hbm_to_vmem [thread:$0]  (!%p3883_p13), %s5212_s2, 32, %s189_s11, [#allocation6]  }
  0x2e   : > { %p2958_p7 = scmp.ge.s32.totalorder %s3748_s23, 2 }
  0x30   : > { %201 = sbr.rel (%p2958_p7) target bundleno = 85 (0x55), region = 32 }
  0x35   : > { %204 = sbr.rel (!%p3857_p4) target bundleno = 85 (0x55), region = 36  ;;  %s205_s20 = sand.u32 (%p3857_p4), 1, %s3744_s22  }
  0x36   : > { %s2960_s25 = sshll.u32 (%p3857_p4), %s3748_s23, 5  ;;  %s2959_s26 = sshll.u32 (%p3857_p4), %s205_s20, 11 }
  0x37   : > { %s211_s7 = ssub.s32 (%p3857_p4), 38, %s2960_s25  ;;  %s3913_s10 = scalar_lea.sflag (%p3857_p4), [#allocation4], %s205_s20 }
  0x38   : > { %p212_p5 = scmp.lt.s32.totalorder (%p3857_p4), %s211_s7, 32  ;;  %s209_s11 = scalar_lea.vmem (%p3857_p4), [#allocation3], %s2959_s26 }
  0x3a   : > { %s5404_s7 = smov (!%p212_p5, %s211_s7), 32 }
  0x3b   : > { %s3910_s8 = sshll.u32 %s5404_s7, 10 }
  0x3c   : > { %s217_s9 = ssub.s32 32768, %s3910_s8 }
  0x3d   : > { %218 = vsyncadd %s3913_s10, %s217_s9  ;;  %p2963_p4 = scmp.ne.s32.totalorder %s3910_s8, 0  ;;  %s3121_s28 = sshll.u32 %s3748_s23, 15 }
  0x3e   : > { %s3921_s14 = scalar_lea.hbm %s5210_s0, %s3121_s28  ;;  %s224_s15 = sshll.u32 %s209_s11, 4  ;;  %s3923_s15 = int_to_ptr.vmem [resolvable:$true] %s224_s15 }
  0x3f   : > { %s3652_s16 = scalar_lea.hbm %s3921_s14, %s3910_s8  ;;  %s3656_s23 = scalar_lea.hbm %s5210_s0, 38912 }
  0x40   : > { %p3653_p8 = scmp.ne.s32.totalorder %s3921_s14, %s3652_s16  ;;  %p3657_p0 = scmp.lt.s32.totalorder %s3921_s14, %s5210_s0 }
  0x41   : > { %p3658_p9 = scmp.lt.s32.totalorder %s3656_s23, %s3652_s16 }
  0x42   : > { %p3654_p10 = pnand %p3653_p8, %p2963_p4 }
  0x43   : > { %p3659_p12 = por %p3658_p9, %p3657_p0 }
  0x44   : > { %p3655_p13 = pneg %p3654_p10 }
  0x46   : > { %p3660_p1 = pnand %p3659_p12, %p3655_p13 }
  0x48   : > { %3663 = shalt.err (!%p3660_p1)
}
  0x49   : > { %s3664_s25 = scalar_lea.vmem %s3923_s15, %s3910_s8  ;;  %s3786_s26 = smov [#allocation3]  }
  0x4a   : > { %p3665_p2 = scmp.ne.s32.totalorder %s3923_s15, %s3664_s25  ;;  %s3668_s7 = sshll.u32 %s3786_s26, 4  ;;  %s3669_s7 = int_to_ptr.vmem [resolvable:$false] %s3668_s7 }
  0x4b   : > { %s3670_s9 = scalar_lea.vmem %s3669_s7, 65536  ;;  %p3671_p7 = scmp.lt.s32.totalorder %s3923_s15, %s3669_s7 }
  0x4c   : > { %p3666_p6 = pnand %p3665_p2, %p2963_p4  ;;  %p3672_p5 = scmp.lt.s32.totalorder %s3670_s9, %s3664_s25 }
  0x4e   : > { %p3667_p3 = pneg %p3666_p6  ;;  %p3673_p8 = por %p3672_p5, %p3671_p7 }
  0x50   : > { %p3674_p10 = pnand %p3673_p8, %p3667_p3 }
  0x52   : > { %3677 = shalt.err (!%p3674_p10)
}
  0x53   : > { %s3787_s11 = smov 1024   ;;  %s3788_s28 = smov 64  }
  0x54   : > { %230 = dma.hbm_to_vmem [thread:$0]  (%p2963_p4), %s3921_s14, %s3910_s8, %s3923_s15, %s3913_s10, %s3787_s11, %s3787_s11, %s3788_s28  }
  0x55 PF: > { %236 = sbr.rel (%p3875_p11) target bundleno = 934 (0x3a6), region = 40 }
  0x5a   : > { %s3952_s12 = sand.u32 1, %s3740_s21   ;;  %p5225_p13 = scmp.ne.s32.totalorder %s5221_s29, 0 }
  0x5b   : > { %s2969_s13 = sshll.u32 %s3952_s12, 11  ;;  %s239_s16 = scalar_lea.sflag [#allocation4], %s3952_s12 }
  0x5c   : > { %s3956_s17 = scalar_lea.vmem [#allocation3], %s2969_s13 }
  0x5d   : > { %3727 = dma.done.wait (%p5225_p13), %s239_s16, 32768  }
  0x5e   : > { %3729 = vsyncadd (%p5225_p13), %s239_s16, 4294934528  ;;  %p5226_p4 = scmp.eq.s32.totalorder %s3842_s4, 0 }
  0x60   : > { %3731 = dma.done.wait (%p5226_p4), [#allocation6], 16416   ;;  %p5227_p11 = pmov %p5226_p4 }
  0x61   : > { %v3280_v1 = vld [vmem:[#allocation5 + $0x74] ss:$8 sps:$4 sm:$0xff]   ;;  %v3282_v2 = vld [vmem:[#allocation5 + $0x70] ss:$8 sps:$4 sm:$0xff]   ;;  %v3283_v3 = vld [vmem:[#allocation5 + $0x64] ss:$8 sps:$4 sm:$0xff]  }
  0x62   : > { %3733 = vsyncadd (%p5227_p11), [#allocation6], 4294950880  ;;  %3125 = vmatprep.subr.bf16.mxu1 %v3280_v1  ;;  %1451 = vmatprep.subr.bf16.mxu0 %v3280_v1  ;;  %v3285_v4 = vld [vmem:[#allocation5 + $0x60] ss:$8 sps:$4 sm:$0xff]   ;;  %v3286_v5 = vld [vmem:[#allocation5 + $0x54] ss:$8 sps:$4 sm:$0xff]  }
  0x63   : > { %3141 = vmatpush1.bf16.msra.mxu1 %v3282_v2  ;;  %1452 = vmatpush1.bf16.msra.mxu0 %v3282_v2  ;;  %v3288_v6 = vld [vmem:[#allocation5 + $0x50] ss:$8 sps:$4 sm:$0xff]   ;;  %v3289_v7 = vld [vmem:[#allocation5 + $0x44] ss:$8 sps:$4 sm:$0xff]   ;;  %v3291_v8 = vld [vmem:[#allocation5 + $0x40] ss:$8 sps:$4 sm:$0xff]  }
  0x64   : > { %3126 = vmatprep.subr.bf16.mxu1 %v3283_v3  ;;  %1453 = vmatprep.subr.bf16.mxu0 %v3283_v3  ;;  %v3292_v9 = vld [vmem:[#allocation5 + $0x34] ss:$8 sps:$4 sm:$0xff]   ;;  %v3294_v10 = vld [vmem:[#allocation5 + $0x30] ss:$8 sps:$4 sm:$0xff]   ;;  %v3295_v11 = vld [vmem:[#allocation5 + $0x24] ss:$8 sps:$4 sm:$0xff]  }
  0x65   : > { %v3297_v12 = vld [vmem:[#allocation5 + $0x20] ss:$8 sps:$4 sm:$0xff]   ;;  %v3298_v13 = vld [vmem:[#allocation5 + $0x14] ss:$8 sps:$4 sm:$0xff]   ;;  %v3300_v17 = vld [vmem:[#allocation5 + $0x10] ss:$8 sps:$4 sm:$0xff]  }
  0x66   : > { %v416_v14 = vld [vmem:[%s3956_s17 + $0x408] sm:$0xff]  ;;  %v3304_v23 = vld [vmem:[#allocation5 + $0xf4] ss:$8 sps:$4 sm:$0xff]   ;;  %v3306_v24 = vld [vmem:[#allocation5 + $0xf0] ss:$8 sps:$4 sm:$0xff]   ;;  %vm2551_vm0 = vcmask 7168  }
  0x67   : > { %3142 = vmatpush1.bf16.msra.mxu1 %v3285_v4  ;;  %1454 = vmatpush1.bf16.msra.mxu0 %v3285_v4  ;;  %v424_v15 = vld [vmem:[%s3956_s17 + $0x448] sm:$0xff]  ;;  %v3310_v27 = vld [vmem:[#allocation5 + $0xd4] ss:$8 sps:$4 sm:$0xff]   ;;  %v3312_v28 = vld [vmem:[#allocation5 + $0xd0] ss:$8 sps:$4 sm:$0xff]   ;;  %p5393_p0 = scmp.ne.s32.totalorder %s5222_s30, 0 }
  0x68   : > { %3127 = vmatprep.subr.bf16.mxu1 %v3286_v5  ;;  %1455 = vmatprep.subr.bf16.mxu0 %v3286_v5  ;;  %v608_v16 = vpack.c.bf16 %v424_v15, %v416_v14  ;;  %v3301_v18 = vld [vmem:[#allocation5 + $0x4] ss:$8 sps:$4 sm:$0xff]   ;;  %v3303_v22 = vld [vmem:[#allocation5] ss:$8 sps:$4 sm:$0xff]   ;;  %v3316_v31 = vld [vmem:[#allocation5 + $0xb4] ss:$8 sps:$4 sm:$0xff]  }
  0x69   : > { %v288_v19 = vld [vmem:[%s3956_s17 + $0x8] sm:$0xff]  ;;  %v3318_v32 = vld [vmem:[#allocation5 + $0xb0] ss:$8 sps:$4 sm:$0xff]   ;;  %v3322_v35 = vld [vmem:[#allocation5 + $0x94] ss:$8 sps:$4 sm:$0xff]   ;;  %s3122_s26 = sshll.u32 (%p5393_p0), %s3842_s4, 8 }
  0x6a   : > { %v296_v20 = vld [vmem:[%s3956_s17 + $0x48] sm:$0xff]  ;;  %1563 = vmatprep.mubr.bf16.mxu1 %v608_v16  ;;  %v3324_v36 = vld [vmem:[#allocation5 + $0x90] ss:$8 sps:$4 sm:$0xff]   ;;  %v415_v39 = vld [vmem:[%s3956_s17 + $0x400] sm:$0xff]  ;;  %s5075_s28 = scalar_lea.vmem (%p5393_p0), %s5215_s5, %s3122_s26  }
  0x6b   : > { %3143 = vmatpush1.bf16.msra.mxu1 %v3288_v6  ;;  %1456 = vmatpush1.bf16.msra.mxu0 %v3288_v6  ;;  %v544_v21 = vpack.c.bf16 %v296_v20, %v288_v19  ;;  %v3307_v25 = vld [vmem:[#allocation5 + $0xe4] ss:$8 sps:$4 sm:$0xff]   ;;  %v3309_v26 = vld [vmem:[#allocation5 + $0xe0] ss:$8 sps:$4 sm:$0xff]   ;;  %v3330_v41 = vld [vmem:[#allocation5 + $0x174] ss:$8 sps:$4 sm:$0xff]  }
  0x6c   : > { %3128 = vmatprep.subr.bf16.mxu1 %v3289_v7  ;;  %1457 = vmatprep.subr.bf16.mxu0 %v3289_v7  ;;  %v3313_v29 = vld [vmem:[#allocation5 + $0xc4] ss:$8 sps:$4 sm:$0xff]   ;;  %v3315_v30 = vld [vmem:[#allocation5 + $0xc0] ss:$8 sps:$4 sm:$0xff]   ;;  %v3333_v44 = vld [vmem:[#allocation5 + $0x274] ss:$8 sps:$4 sm:$0xff]  }
  0x6d   : > { %1483 = vmatprep.mubr.bf16.mxu0 %v544_v21  ;;  %v3319_v33 = vld [vmem:[#allocation5 + $0xa4] ss:$8 sps:$4 sm:$0xff]   ;;  %v3321_v34 = vld [vmem:[#allocation5 + $0xa0] ss:$8 sps:$4 sm:$0xff]   ;;  %v3328_v51 = vld [vmem:[#allocation5 + $0x170] ss:$8 sps:$4 sm:$0xff]  }
  0x6e   : > { %v3325_v37 = vld [vmem:[#allocation5 + $0x84] ss:$8 sps:$4 sm:$0xff]   ;;  %v3327_v38 = vld [vmem:[#allocation5 + $0x80] ss:$8 sps:$4 sm:$0xff]   ;;  %v3331_v52 = vld [vmem:[#allocation5 + $0x270] ss:$8 sps:$4 sm:$0xff]  }
  0x6f   : > { %3144 = vmatpush1.bf16.msra.mxu1 %v3291_v8  ;;  %1458 = vmatpush1.bf16.msra.mxu0 %v3291_v8  ;;  %v423_v40 = vld [vmem:[%s3956_s17 + $0x440] sm:$0xff]  ;;  %v432_v45 = vld [vmem:[%s3956_s17 + $0x488] sm:$0xff]  ;;  %v3342_v61 = vld [vmem:[#allocation5 + $0x154] ss:$8 sps:$4 sm:$0xff]  }
  0x70   : > { %3129 = vmatprep.subr.bf16.mxu1 %v3292_v9  ;;  %1459 = vmatprep.subr.bf16.mxu0 %v3292_v9  ;;  %v287_v42 = vld [vmem:[%s3956_s17] sm:$0xff]  ;;  %v440_v46 = vld [vmem:[%s3956_s17 + $0x4c8] sm:$0xff]  ;;  %v607_v47 = vpack.c.bf16 %v423_v40, %v415_v39  ;;  %v3345_v0 = vld [vmem:[#allocation5 + $0x254] ss:$8 sps:$4 sm:$0xff]  }
  0x71   : > { %v295_v43 = vld [vmem:[%s3956_s17 + $0x40] sm:$0xff]  ;;  %v304_v49 = vld [vmem:[%s3956_s17 + $0x88] sm:$0xff]  ;;  %v616_v57 = vpack.c.bf16 %v440_v46, %v432_v45  ;;  %v3340_v7 = vld [vmem:[#allocation5 + $0x150] ss:$8 sps:$4 sm:$0xff]  }
  0x72   : > { %v543_v48 = vpack.c.bf16 %v295_v43, %v287_v42  ;;  %v312_v50 = vld [vmem:[%s3956_s17 + $0xc8] sm:$0xff]  ;;  %v431_v58 = vld [vmem:[%s3956_s17 + $0x480] sm:$0xff]  ;;  %v3343_v8 = vld [vmem:[#allocation5 + $0x250] ss:$8 sps:$4 sm:$0xff]  }
  0x73   : > { %3145 = vmatpush1.bf16.msra.mxu1 %v3294_v10  ;;  %1460 = vmatpush1.bf16.msra.mxu0 %v3294_v10  ;;  %v3336_v53 = vld [vmem:[#allocation5 + $0x164] ss:$8 sps:$4 sm:$0xff]   ;;  %v3334_v55 = vld [vmem:[#allocation5 + $0x160] ss:$8 sps:$4 sm:$0xff]   ;;  %v552_v59 = vpack.c.bf16 %v312_v50, %v304_v49  ;;  %v3357_v20 = vld [vmem:[#allocation5 + $0x234] ss:$8 sps:$4 sm:$0xff]  }
  0x74   : > { %3130 = vmatprep.subr.bf16.mxu1 %v3295_v11  ;;  %1461 = vmatprep.subr.bf16.mxu0 %v3295_v11  ;;  %v3339_v54 = vld [vmem:[#allocation5 + $0x264] ss:$8 sps:$4 sm:$0xff]   ;;  %v3337_v56 = vld [vmem:[#allocation5 + $0x260] ss:$8 sps:$4 sm:$0xff]   ;;  %v3369_v40 = vld [vmem:[#allocation5 + $0x214] ss:$8 sps:$4 sm:$0xff]  }
  0x75   : > { %v439_v60 = vld [vmem:[%s3956_s17 + $0x4c0] sm:$0xff]  ;;  %v448_v1 = vld [vmem:[%s3956_s17 + $0x508] sm:$0xff] }
  0x76   : > { %v303_v62 = vld [vmem:[%s3956_s17 + $0x80] sm:$0xff]  ;;  %v456_v2 = vld [vmem:[%s3956_s17 + $0x548] sm:$0xff]  ;;  %v615_v3 = vpack.c.bf16 %v439_v60, %v431_v58  ;;  %v3381_v60 = vld [vmem:[#allocation5 + $0x2f4] ss:$8 sps:$4 sm:$0xff]  }
  0x77   : > { %3146 = vmatpush1.bf16.msra.mxu1 %v3297_v12  ;;  %1462 = vmatpush1.bf16.msra.mxu0 %v3297_v12  ;;  %v311_v63 = vld [vmem:[%s3956_s17 + $0xc0] sm:$0xff]  ;;  %v320_v5 = vld [vmem:[%s3956_s17 + $0x108] sm:$0xff] }
  0x78   : > { %3131 = vmatprep.subr.bf16.mxu1 %v3298_v13  ;;  %1463 = vmatprep.subr.bf16.mxu0 %v3298_v13  ;;  %v551_v4 = vpack.c.bf16 %v311_v63, %v303_v62  ;;  %v328_v6 = vld [vmem:[%s3956_s17 + $0x148] sm:$0xff]  ;;  %v624_v13 = vpack.c.bf16 %v456_v2, %v448_v1  ;;  %v447_v14 = vld [vmem:[%s3956_s17 + $0x500] sm:$0xff] }
  0x79   : > { %v3348_v9 = vld [vmem:[#allocation5 + $0x144] ss:$8 sps:$4 sm:$0xff]   ;;  %v3346_v11 = vld [vmem:[#allocation5 + $0x140] ss:$8 sps:$4 sm:$0xff]   ;;  %v560_v15 = vpack.c.bf16 %v328_v6, %v320_v5 }
  0x7a   : > { %v3351_v10 = vld [vmem:[#allocation5 + $0x244] ss:$8 sps:$4 sm:$0xff]   ;;  %v3349_v12 = vld [vmem:[#allocation5 + $0x240] ss:$8 sps:$4 sm:$0xff]  }
  0x7b   : > { %3147 = vmatpush1.bf16.msra.mxu1 %v3300_v17  ;;  %1464 = vmatpush1.bf16.msra.mxu0 %v3300_v17  ;;  %v455_v16 = vld [vmem:[%s3956_s17 + $0x540] sm:$0xff]  ;;  %v3354_v17 = vld [vmem:[#allocation5 + $0x134] ss:$8 sps:$4 sm:$0xff]   ;;  %v464_v21 = vld [vmem:[%s3956_s17 + $0x588] sm:$0xff] }
  0x7c   : > { %3132 = vmatprep.subr.bf16.mxu1 %v3301_v18  ;;  %1465 = vmatprep.subr.bf16.mxu0 %v3301_v18  ;;  %v319_v18 = vld [vmem:[%s3956_s17 + $0x100] sm:$0xff]  ;;  %v488_v42 = vld [vmem:[%s3956_s17 + $0x648] sm:$0xff] }
  0x7d   : > { %v327_v19 = vld [vmem:[%s3956_s17 + $0x140] sm:$0xff]  ;;  %v352_v45 = vld [vmem:[%s3956_s17 + $0x208] sm:$0xff] }
  0x7e   : > { %v343_v39 = vld [vmem:[%s3956_s17 + $0x1c0] sm:$0xff]  ;;  %v360_v46 = vld [vmem:[%s3956_s17 + $0x248] sm:$0xff] }
  0x7f   : > { %3148 = vmatpush1.bf16.msra.mxu1 %v3303_v22  ;;  %1466 = vmatpush1.bf16.msra.mxu0 %v3303_v22  ;;  %v472_v22 = vld [vmem:[%s3956_s17 + $0x5c8] sm:$0xff]  ;;  %v359_v58 = vld [vmem:[%s3956_s17 + $0x240] sm:$0xff] }
  0x80   : > { %3133 = vmatprep.subr.bf16.mxu1 %v3304_v23  ;;  %1467 = vmatprep.subr.bf16.mxu0 %v3304_v23  ;;  %v623_v23 = vpack.c.bf16 %v455_v16, %v447_v14  ;;  %v3372_v49 = vld [vmem:[#allocation5 + $0x104] ss:$8 sps:$4 sm:$0xff]   ;;  %v3393_v16 = vld [vmem:[#allocation5 + $0x2d4] ss:$8 sps:$4 sm:$0xff]  }
  0x81   : > { %v3375_v50 = vld [vmem:[#allocation5 + $0x204] ss:$8 sps:$4 sm:$0xff]  }
  0x82   : > { %v504_v62 = vld [vmem:[%s3956_s17 + $0x6c8] sm:$0xff]  ;;  %v375_v14 = vld [vmem:[%s3956_s17 + $0x2c0] sm:$0xff] }
  0x83   : > { %3149 = vmatpush2.bf16.msra.mxu1 %v3306_v24  ;;  %1468 = vmatpush2.bf16.msra.mxu0 %v3306_v24  ;;  %v559_v24 = vpack.c.bf16 %v327_v19, %v319_v18  ;;  %v368_v1 = vld [vmem:[%s3956_s17 + $0x288] sm:$0xff] }
  0x84   : > { %3134 = vmatprep.subr.bf16.mxu1 %v3307_v25  ;;  %1469 = vmatprep.subr.bf16.mxu0 %v3307_v25  ;;  %v336_v25 = vld [vmem:[%s3956_s17 + $0x188] sm:$0xff] }
  0x85   : > { %v376_v2 = vld [vmem:[%s3956_s17 + $0x2c8] sm:$0xff] }
  0x86   : > { %v3384_v5 = vld [vmem:[#allocation5 + $0x1e4] ss:$8 sps:$4 sm:$0xff]  }
  0x87   : > { %3150 = vmatpush2.bf16.msra.mxu1 %v3309_v26  ;;  %1470 = vmatpush2.bf16.msra.mxu0 %v3309_v26  ;;  %v344_v26 = vld [vmem:[%s3956_s17 + $0x1c8] sm:$0xff] }
  0x88   : > { %3135 = vmatprep.subr.bf16.mxu1 %v3310_v27  ;;  %1471 = vmatprep.subr.bf16.mxu0 %v3310_v27  ;;  %v3352_v27 = vld [vmem:[#allocation5 + $0x130] ss:$8 sps:$4 sm:$0xff]   ;;  %v3387_v6 = vld [vmem:[#allocation5 + $0x2e4] ss:$8 sps:$4 sm:$0xff]  }
  0x89   : > { %v520_v18 = vld [vmem:[%s3956_s17 + $0x748] sm:$0xff] }
  0x8b   : > { %3151 = vmatpush2.bf16.msra.mxu1 %v3312_v28  ;;  %1472 = vmatpush2.bf16.msra.mxu0 %v3312_v28  ;;  %v3355_v28 = vld [vmem:[#allocation5 + $0x230] ss:$8 sps:$4 sm:$0xff]  }
  0x8c   : > { %3136 = vmatprep.subr.bf16.mxu1 %v3313_v29  ;;  %1473 = vmatprep.subr.bf16.mxu0 %v3313_v29  ;;  %v3360_v29 = vld [vmem:[#allocation5 + $0x124] ss:$8 sps:$4 sm:$0xff]  }
  0x8f   : > { %3152 = vmatpush2.bf16.msra.mxu1 %v3315_v30  ;;  %1474 = vmatpush2.bf16.msra.mxu0 %v3315_v30  ;;  %v3363_v30 = vld [vmem:[#allocation5 + $0x224] ss:$8 sps:$4 sm:$0xff]  }
  0x90   : > { %3137 = vmatprep.subr.bf16.mxu1 %v3316_v31  ;;  %1475 = vmatprep.subr.bf16.mxu0 %v3316_v31  ;;  %v3358_v31 = vld [vmem:[#allocation5 + $0x120] ss:$8 sps:$4 sm:$0xff]  }
  0x93   : > { %3153 = vmatpush2.bf16.msra.mxu1 %v3318_v32  ;;  %1476 = vmatpush2.bf16.msra.mxu0 %v3318_v32  ;;  %v3361_v32 = vld [vmem:[#allocation5 + $0x220] ss:$8 sps:$4 sm:$0xff]  }
  0x94   : > { %3138 = vmatprep.subr.bf16.mxu1 %v3319_v33  ;;  %1477 = vmatprep.subr.bf16.mxu0 %v3319_v33  ;;  %v632_v33 = vpack.c.bf16 %v472_v22, %v464_v21  ;;  %v384_v21 = vld [vmem:[%s3956_s17 + $0x308] sm:$0xff] }
  0x95   : > { %v392_v22 = vld [vmem:[%s3956_s17 + $0x348] sm:$0xff] }
  0x97   : > { %3154 = vmatpush2.bf16.msra.mxu1 %v3321_v34  ;;  %1478 = vmatpush2.bf16.msra.mxu0 %v3321_v34  ;;  %v463_v34 = vld [vmem:[%s3956_s17 + $0x580] sm:$0xff] }
  0x98   : > { %3139 = vmatprep.subr.bf16.mxu1 %v3322_v35  ;;  %1479 = vmatprep.subr.bf16.mxu0 %v3322_v35  ;;  %v568_v35 = vpack.c.bf16 %v344_v26, %v336_v25  ;;  %v3396_v25 = vld [vmem:[#allocation5 + $0x1c4] ss:$8 sps:$4 sm:$0xff]  }
  0x99   : > { %v3399_v26 = vld [vmem:[#allocation5 + $0x2c4] ss:$8 sps:$4 sm:$0xff]  }
  0x9b   : > { %3155 = vmatpush2.bf16.msra.mxu1 %v3324_v36  ;;  %1480 = vmatpush2.bf16.msra.mxu0 %v3324_v36  ;;  %v471_v36 = vld [vmem:[%s3956_s17 + $0x5c0] sm:$0xff] }
  0x9c   : > { %3140 = vmatprep.subr.bf16.mxu1 %v3325_v37  ;;  %1481 = vmatprep.subr.bf16.mxu0 %v3325_v37  ;;  %v3366_v37 = vld [vmem:[#allocation5 + $0x114] ss:$8 sps:$4 sm:$0xff]   ;;  %v631_v43 = vpack.c.bf16 %v471_v36, %v463_v34  ;;  %v391_v34 = vld [vmem:[%s3956_s17 + $0x340] sm:$0xff] }
  0x9d   : > { %v3405_v36 = vld [vmem:[#allocation5 + $0x2b4] ss:$8 sps:$4 sm:$0xff]  }
  0x9f   : > { %3156 = vmatpush2.bf16.msra.mxu1 %v3327_v38  ;;  %1482 = vmatpush2.bf16.msra.mxu0 %v3327_v38  ;;  %v335_v38 = vld [vmem:[%s3956_s17 + $0x180] sm:$0xff] }
  0xa0   : > { %1644 = vmatprep.subr.bf16.mxu1 %v3330_v41  ;;  %1837 = vmatprep.subr.bf16.mxu0 %v3333_v44  ;;  %v480_v41 = vld [vmem:[%s3956_s17 + $0x608] sm:$0xff]  ;;  %v567_v44 = vpack.c.bf16 %v343_v39, %v335_v38 }
  0xa1   : > { %v536_v38 = vld [vmem:[%s3956_s17 + $0x7c8] sm:$0xff] }
  0xa2   : > { %1564 = vmatmul.mubr.bf16.vlgmr.msra.gmra.mxu1 %v607_v47  ;;  %1484 = vmatmul.mubr.bf16.vlgmr.msra.gmra.mxu0 %v543_v48  ;;  %v3364_v47 = vld [vmem:[#allocation5 + $0x110] ss:$8 sps:$4 sm:$0xff]  }
  0xa3   : > { %1645 = vmatpush1.bf16.msra.mxu1 %v3328_v51  ;;  %1838 = vmatpush1.bf16.msra.mxu0 %v3331_v52  ;;  %v3367_v48 = vld [vmem:[#allocation5 + $0x210] ss:$8 sps:$4 sm:$0xff]   ;;  %v3370_v51 = vld [vmem:[#allocation5 + $0x100] ss:$8 sps:$4 sm:$0xff]  }
  0xa4   : > { %1646 = vmatprep.subr.bf16.mxu1 %v3336_v53  ;;  %1839 = vmatprep.subr.bf16.mxu0 %v3339_v54  ;;  %v3373_v52 = vld [vmem:[#allocation5 + $0x200] ss:$8 sps:$4 sm:$0xff]   ;;  %v640_v53 = vpack.c.bf16 %v488_v42, %v480_v41  ;;  %v576_v54 = vpack.c.bf16 %v360_v46, %v352_v45  ;;  %v3408_v45 = vld [vmem:[#allocation5 + $0x1a4] ss:$8 sps:$4 sm:$0xff]  }
  0xa5   : > { %1573 = vmatprep.mubr.bf16.mxu1 %v616_v57  ;;  %1493 = vmatprep.mubr.bf16.mxu0 %v552_v59  ;;  %v351_v57 = vld [vmem:[%s3956_s17 + $0x200] sm:$0xff]  ;;  %v3378_v59 = vld [vmem:[#allocation5 + $0x1f4] ss:$8 sps:$4 sm:$0xff]   ;;  %v400_v41 = vld [vmem:[%s3956_s17 + $0x388] sm:$0xff] }
  0xa6   : > { %v408_v42 = vld [vmem:[%s3956_s17 + $0x3c8] sm:$0xff] }
  0xa7   : > { %1647 = vmatpush1.bf16.msra.mxu1 %v3334_v55  ;;  %1840 = vmatpush1.bf16.msra.mxu0 %v3337_v56  ;;  %v479_v55 = vld [vmem:[%s3956_s17 + $0x600] sm:$0xff] }
  0xa8   : > { %1648 = vmatprep.subr.bf16.mxu1 %v3342_v61  ;;  %1841 = vmatprep.subr.bf16.mxu0 %v3345_v0  ;;  %v487_v56 = vld [vmem:[%s3956_s17 + $0x640] sm:$0xff]  ;;  %v496_v61 = vld [vmem:[%s3956_s17 + $0x688] sm:$0xff]  ;;  %v575_v0 = vpack.c.bf16 %v359_v58, %v351_v57  ;;  %v290_v57 = vld [vmem:[%s3956_s17 + $0x18] sm:$0xff] }
  0xa9   : > { %v639_v63 = vpack.c.bf16 %v487_v56, %v479_v55  ;;  %v3411_v46 = vld [vmem:[#allocation5 + $0x2a4] ss:$8 sps:$4 sm:$0xff]   ;;  %v3414_v55 = vld [vmem:[#allocation5 + $0x194] ss:$8 sps:$4 sm:$0xff]  }
  0xaa   : > { %1574 = vmatmul.mubr.bf16.gmra.mxu1 %v615_v3  ;;  %1494 = vmatmul.mubr.bf16.gmra.mxu0 %v551_v4  ;;  %v3376_v3 = vld [vmem:[#allocation5 + $0x1f0] ss:$8 sps:$4 sm:$0xff]   ;;  %v3417_v56 = vld [vmem:[#allocation5 + $0x294] ss:$8 sps:$4 sm:$0xff]  }
  0xab   : > { %1649 = vmatpush1.bf16.msra.mxu1 %v3340_v7  ;;  %1842 = vmatpush1.bf16.msra.mxu0 %v3343_v8  ;;  %v3379_v4 = vld [vmem:[#allocation5 + $0x2f0] ss:$8 sps:$4 sm:$0xff]   ;;  %v3382_v7 = vld [vmem:[#allocation5 + $0x1e0] ss:$8 sps:$4 sm:$0xff]  }
  0xac   : > { %1650 = vmatprep.subr.bf16.mxu1 %v3348_v9  ;;  %1843 = vmatprep.subr.bf16.mxu0 %v3351_v10  ;;  %v3385_v8 = vld [vmem:[#allocation5 + $0x2e0] ss:$8 sps:$4 sm:$0xff]   ;;  %v648_v9 = vpack.c.bf16 %v504_v62, %v496_v61  ;;  %v584_v10 = vpack.c.bf16 %v376_v2, %v368_v1  ;;  %v298_v58 = vld [vmem:[%s3956_s17 + $0x58] sm:$0xff]  ;;  %v3420_v1 = vld [vmem:[#allocation5 + $0x184] ss:$8 sps:$4 sm:$0xff]  }
  0xad   : > { %1583 = vmatprep.mubr.bf16.mxu1 %v624_v13  ;;  %1503 = vmatprep.mubr.bf16.mxu0 %v560_v15  ;;  %v367_v13 = vld [vmem:[%s3956_s17 + $0x280] sm:$0xff]  ;;  %v3390_v15 = vld [vmem:[#allocation5 + $0x1d4] ss:$8 sps:$4 sm:$0xff]   ;;  %v292_v61 = vld [vmem:[%s3956_s17 + $0x28] sm:$0xff] }
  0xae   : > { %v300_v62 = vld [vmem:[%s3956_s17 + $0x68] sm:$0xff] }
  0xaf   : > { %1651 = vmatpush1.bf16.msra.mxu1 %v3346_v11  ;;  %1844 = vmatpush1.bf16.msra.mxu0 %v3349_v12  ;;  %v495_v11 = vld [vmem:[%s3956_s17 + $0x680] sm:$0xff] }
  0xb0   : > { %1652 = vmatprep.subr.bf16.mxu1 %v3354_v17  ;;  %1845 = vmatprep.subr.bf16.mxu0 %v3357_v20  ;;  %v503_v12 = vld [vmem:[%s3956_s17 + $0x6c0] sm:$0xff]  ;;  %v512_v17 = vld [vmem:[%s3956_s17 + $0x708] sm:$0xff]  ;;  %v583_v20 = vpack.c.bf16 %v375_v14, %v367_v13  ;;  %v314_v13 = vld [vmem:[%s3956_s17 + $0xd8] sm:$0xff] }
  0xb1   : > { %v647_v19 = vpack.c.bf16 %v503_v12, %v495_v11  ;;  %v3423_v2 = vld [vmem:[#allocation5 + $0x284] ss:$8 sps:$4 sm:$0xff]   ;;  %v3426_v11 = vld [vmem:[#allocation5 + $0x374] ss:$8 sps:$4 sm:$0xff]  }
  0xb2   : > { %1584 = vmatmul.mubr.bf16.gmra.mxu1 %v623_v23  ;;  %1504 = vmatmul.mubr.bf16.gmra.mxu0 %v559_v24  ;;  %v3388_v23 = vld [vmem:[#allocation5 + $0x1d0] ss:$8 sps:$4 sm:$0xff]   ;;  %v308_v14 = vld [vmem:[%s3956_s17 + $0xa8] sm:$0xff] }
  0xb3   : > { %1653 = vmatpush1.bf16.msra.mxu1 %v3352_v27  ;;  %1846 = vmatpush1.bf16.msra.mxu0 %v3355_v28  ;;  %v3391_v24 = vld [vmem:[#allocation5 + $0x2d0] ss:$8 sps:$4 sm:$0xff]   ;;  %v3394_v27 = vld [vmem:[#allocation5 + $0x1c0] ss:$8 sps:$4 sm:$0xff]  }
  0xb4   : > { %1654 = vmatprep.subr.bf16.mxu1 %v3360_v29  ;;  %1847 = vmatprep.subr.bf16.mxu0 %v3363_v30  ;;  %v3397_v28 = vld [vmem:[#allocation5 + $0x2c0] ss:$8 sps:$4 sm:$0xff]   ;;  %v656_v29 = vpack.c.bf16 %v520_v18, %v512_v17  ;;  %v592_v30 = vpack.c.bf16 %v392_v22, %v384_v21  ;;  %v306_v12 = vld [vmem:[%s3956_s17 + $0x98] sm:$0xff]  ;;  %v305_v22 = vld [vmem:[%s3956_s17 + $0x90] sm:$0xff] }
  0xb5   : > { %1593 = vmatprep.mubr.bf16.mxu1 %v632_v33  ;;  %1513 = vmatprep.mubr.bf16.mxu0 %v568_v35  ;;  %v383_v33 = vld [vmem:[%s3956_s17 + $0x300] sm:$0xff]  ;;  %v3402_v35 = vld [vmem:[#allocation5 + $0x1b4] ss:$8 sps:$4 sm:$0xff]   ;;  %v3424_v18 = vld [vmem:[#allocation5 + $0x370] ss:$8 sps:$4 sm:$0xff]  }
  0xb7   : > { %1655 = vmatpush1.bf16.msra.mxu1 %v3358_v31  ;;  %1848 = vmatpush1.bf16.msra.mxu0 %v3361_v32  ;;  %v511_v31 = vld [vmem:[%s3956_s17 + $0x700] sm:$0xff] }
  0xb8   : > { %1656 = vmatprep.subr.bf16.mxu1 %v3366_v37  ;;  %1849 = vmatprep.subr.bf16.mxu0 %v3369_v40  ;;  %v519_v32 = vld [vmem:[%s3956_s17 + $0x740] sm:$0xff]  ;;  %v528_v37 = vld [vmem:[%s3956_s17 + $0x788] sm:$0xff]  ;;  %v591_v40 = vpack.c.bf16 %v391_v34, %v383_v33 }
  0xb9   : > { %v655_v39 = vpack.c.bf16 %v519_v32, %v511_v31  ;;  %v332_v31 = vld [vmem:[%s3956_s17 + $0x168] sm:$0xff] }
  0xba   : > { %1594 = vmatmul.mubr.bf16.gmra.mxu1 %v631_v43  ;;  %1514 = vmatmul.mubr.bf16.gmra.mxu0 %v567_v44  ;;  %v3400_v43 = vld [vmem:[#allocation5 + $0x1b0] ss:$8 sps:$4 sm:$0xff]  }
  0xbb   : > { %1657 = vmatpush1.bf16.msra.mxu1 %v3364_v47  ;;  %1850 = vmatpush1.bf16.msra.mxu0 %v3367_v48  ;;  %v3403_v44 = vld [vmem:[#allocation5 + $0x2b0] ss:$8 sps:$4 sm:$0xff]   ;;  %v3406_v47 = vld [vmem:[#allocation5 + $0x1a0] ss:$8 sps:$4 sm:$0xff]  }
  0xbc   : > { %1658 = vmatprep.subr.bf16.mxu1 %v3372_v49  ;;  %1851 = vmatprep.subr.bf16.mxu0 %v3375_v50  ;;  %v3409_v48 = vld [vmem:[#allocation5 + $0x2a0] ss:$8 sps:$4 sm:$0xff]   ;;  %v664_v49 = vpack.c.bf16 %v536_v38, %v528_v37  ;;  %v600_v50 = vpack.c.bf16 %v408_v42, %v400_v41  ;;  %v321_v37 = vld [vmem:[%s3956_s17 + $0x110] sm:$0xff]  ;;  %v338_v42 = vld [vmem:[%s3956_s17 + $0x198] sm:$0xff] }
  0xbd   : > { %1603 = vmatprep.mubr.bf16.mxu1 %v640_v53  ;;  %1523 = vmatprep.mubr.bf16.mxu0 %v576_v54  ;;  %v399_v53 = vld [vmem:[%s3956_s17 + $0x380] sm:$0xff]  ;;  %v329_v38 = vld [vmem:[%s3956_s17 + $0x150] sm:$0xff] }
  0xbe   : > { %v407_v54 = vld [vmem:[%s3956_s17 + $0x3c0] sm:$0xff] }
  0xbf   : > { %1659 = vmatpush1.bf16.msra.mxu1 %v3370_v51  ;;  %1852 = vmatpush1.bf16.msra.mxu0 %v3373_v52  ;;  %v527_v51 = vld [vmem:[%s3956_s17 + $0x780] sm:$0xff] }
  0xc0   : > { %1660 = vmatprep.subr.bf16.mxu1 %v3378_v59  ;;  %1853 = vmatprep.subr.bf16.mxu0 %v3381_v60  ;;  %v535_v52 = vld [vmem:[%s3956_s17 + $0x7c0] sm:$0xff]  ;;  %v599_v60 = vpack.c.bf16 %v407_v54, %v399_v53  ;;  %v337_v53 = vld [vmem:[%s3956_s17 + $0x190] sm:$0xff] }
  0xc1   : > { %v663_v59 = vpack.c.bf16 %v535_v52, %v527_v51  ;;  %v331_v41 = vld [vmem:[%s3956_s17 + $0x160] sm:$0xff]  ;;  %v3436_v52 = vld [vmem:[#allocation5 + $0x330] ss:$8 sps:$4 sm:$0xff]  }
  0xc2   : > { %1604 = vmatmul.mubr.bf16.gmra.mxu1 %v639_v63  ;;  %1524 = vmatmul.mubr.bf16.gmra.mxu0 %v575_v0  ;;  %v3412_v63 = vld [vmem:[#allocation5 + $0x190] ss:$8 sps:$4 sm:$0xff]  }
  0xc3   : > { %1661 = vmatpush2.bf16.msra.mxu1 %v3376_v3  ;;  %1854 = vmatpush2.bf16.msra.mxu0 %v3379_v4  ;;  %v3415_v0 = vld [vmem:[#allocation5 + $0x290] ss:$8 sps:$4 sm:$0xff]   ;;  %v3418_v3 = vld [vmem:[#allocation5 + $0x180] ss:$8 sps:$4 sm:$0xff]  }
  0xc4   : > { %1662 = vmatprep.subr.bf16.mxu1 %v3384_v5  ;;  %1855 = vmatprep.subr.bf16.mxu0 %v3387_v6  ;;  %v3421_v4 = vld [vmem:[#allocation5 + $0x280] ss:$8 sps:$4 sm:$0xff]   ;;  %v546_v5 = vpack.c.bf16 %v298_v58, %v290_v57  ;;  %v548_v6 = vpack.c.bf16 %v300_v62, %v292_v61  ;;  %v345_v54 = vld [vmem:[%s3956_s17 + $0x1d0] sm:$0xff]  ;;  %v354_v58 = vld [vmem:[%s3956_s17 + $0x218] sm:$0xff] }
  0xc5   : > { %1613 = vmatprep.mubr.bf16.mxu1 %v648_v9  ;;  %1533 = vmatprep.mubr.bf16.mxu0 %v584_v10  ;;  %v291_v9 = vld [vmem:[%s3956_s17 + $0x20] sm:$0xff]  ;;  %v364_v61 = vld [vmem:[%s3956_s17 + $0x268] sm:$0xff] }
  0xc6   : > { %v299_v10 = vld [vmem:[%s3956_s17 + $0x60] sm:$0xff] }
  0xc7   : > { %1663 = vmatpush2.bf16.msra.mxu1 %v3382_v7  ;;  %1856 = vmatpush2.bf16.msra.mxu0 %v3385_v8  ;;  %v289_v7 = vld [vmem:[%s3956_s17 + $0x10] sm:$0xff]  ;;  %v547_v17 = vpack.c.bf16 %v299_v10, %v291_v9  ;;  %v347_v57 = vld [vmem:[%s3956_s17 + $0x1e0] sm:$0xff]  ;;  %v370_v10 = vld [vmem:[%s3956_s17 + $0x298] sm:$0xff] }
  0xc8   : > { %1664 = vmatprep.subr.bf16.mxu1 %v3390_v15  ;;  %1857 = vmatprep.subr.bf16.mxu0 %v3393_v16  ;;  %v297_v8 = vld [vmem:[%s3956_s17 + $0x50] sm:$0xff]  ;;  %v316_v15 = vld [vmem:[%s3956_s17 + $0xe8] sm:$0xff]  ;;  %v363_v9 = vld [vmem:[%s3956_s17 + $0x260] sm:$0xff] }
  0xc9   : > { %v545_v16 = vpack.c.bf16 %v297_v8, %v289_v7  ;;  %v556_v21 = vpack.c.bf16 %v316_v15, %v308_v14  ;;  %v3439_v62 = vld [vmem:[#allocation5 + $0x320] ss:$8 sps:$4 sm:$0xff]   ;;  %v361_v7 = vld [vmem:[%s3956_s17 + $0x250] sm:$0xff] }
  0xca   : > { %1614 = vmatmul.mubr.bf16.gmra.mxu1 %v647_v19  ;;  %1534 = vmatmul.mubr.bf16.gmra.mxu0 %v583_v20  ;;  %v554_v19 = vpack.c.bf16 %v314_v13, %v306_v12  ;;  %v3429_v20 = vld [vmem:[#allocation5 + $0x364] ss:$8 sps:$4 sm:$0xff]   ;;  %v3445_v14 = vld [vmem:[#allocation5 + $0x300] ss:$8 sps:$4 sm:$0xff]   ;;  %v3450_v15 = vld [vmem:[#allocation5 + $0x3f4] ss:$8 sps:$4 sm:$0xff]  }
  0xcb   : > { %1665 = vmatpush2.bf16.msra.mxu1 %v3388_v23  ;;  %1858 = vmatpush2.bf16.msra.mxu0 %v3391_v24  ;;  %v313_v23 = vld [vmem:[%s3956_s17 + $0xd0] sm:$0xff]  ;;  %v3427_v24 = vld [vmem:[#allocation5 + $0x360] ss:$8 sps:$4 sm:$0xff]  }
  0xcc   : > { %1666 = vmatprep.subr.bf16.mxu1 %v3396_v25  ;;  %1859 = vmatprep.subr.bf16.mxu0 %v3399_v26  ;;  %v307_v25 = vld [vmem:[%s3956_s17 + $0xa0] sm:$0xff]  ;;  %v553_v32 = vpack.c.bf16 %v313_v23, %v305_v22  ;;  %v372_v12 = vld [vmem:[%s3956_s17 + $0x2a8] sm:$0xff]  ;;  %v369_v22 = vld [vmem:[%s3956_s17 + $0x290] sm:$0xff] }
  0xcd   : > { %1623 = vmatprep.mubr.bf16.mxu1 %v656_v29  ;;  %1543 = vmatprep.mubr.bf16.mxu0 %v592_v30  ;;  %v315_v26 = vld [vmem:[%s3956_s17 + $0xe0] sm:$0xff]  ;;  %v3432_v29 = vld [vmem:[#allocation5 + $0x354] ss:$8 sps:$4 sm:$0xff]   ;;  %v324_v30 = vld [vmem:[%s3956_s17 + $0x128] sm:$0xff] }
  0xce   : > { %v555_v33 = vpack.c.bf16 %v315_v26, %v307_v25  ;;  %v355_v8 = vld [vmem:[%s3956_s17 + $0x220] sm:$0xff]  ;;  %v380_v13 = vld [vmem:[%s3956_s17 + $0x2e8] sm:$0xff]  ;;  %v377_v23 = vld [vmem:[%s3956_s17 + $0x2d0] sm:$0xff] }
  0xcf   : > { %1667 = vmatpush2.bf16.msra.mxu1 %v3394_v27  ;;  %1860 = vmatpush2.bf16.msra.mxu0 %v3397_v28  ;;  %v322_v27 = vld [vmem:[%s3956_s17 + $0x118] sm:$0xff]  ;;  %v379_v25 = vld [vmem:[%s3956_s17 + $0x2e0] sm:$0xff] }
  0xd0   : > { %1668 = vmatprep.subr.bf16.mxu1 %v3402_v35  ;;  %1861 = vmatprep.subr.bf16.mxu0 %v3405_v36  ;;  %v330_v28 = vld [vmem:[%s3956_s17 + $0x158] sm:$0xff]  ;;  %v564_v35 = vpack.c.bf16 %v332_v31, %v324_v30  ;;  %v3451_v30 = vld [vmem:[#allocation5 + $0x3e0] ss:$8 sps:$4 sm:$0xff]  }
  0xd1   : > { %v562_v34 = vpack.c.bf16 %v330_v28, %v322_v27  ;;  %v3430_v36 = vld [vmem:[#allocation5 + $0x350] ss:$8 sps:$4 sm:$0xff]   ;;  %v388_v28 = vld [vmem:[%s3956_s17 + $0x328] sm:$0xff]  ;;  %v3456_v31 = vld [vmem:[#allocation5 + $0x3d4] ss:$8 sps:$4 sm:$0xff]  }
  0xd2   : > { %1624 = vmatmul.mubr.bf16.gmra.mxu1 %v655_v39  ;;  %1544 = vmatmul.mubr.bf16.gmra.mxu0 %v591_v40  ;;  %v3435_v39 = vld [vmem:[#allocation5 + $0x344] ss:$8 sps:$4 sm:$0xff]   ;;  %v386_v26 = vld [vmem:[%s3956_s17 + $0x318] sm:$0xff] }
  0xd3   : > { %1669 = vmatpush2.bf16.msra.mxu1 %v3400_v43  ;;  %1862 = vmatpush2.bf16.msra.mxu0 %v3403_v44  ;;  %v323_v40 = vld [vmem:[%s3956_s17 + $0x120] sm:$0xff]  ;;  %v346_v43 = vld [vmem:[%s3956_s17 + $0x1d8] sm:$0xff] }
  0xd4   : > { %1670 = vmatprep.subr.bf16.mxu1 %v3408_v45  ;;  %1863 = vmatprep.subr.bf16.mxu0 %v3411_v46  ;;  %v3433_v44 = vld [vmem:[#allocation5 + $0x340] ss:$8 sps:$4 sm:$0xff]   ;;  %v394_v27 = vld [vmem:[%s3956_s17 + $0x358] sm:$0xff] }
  0xd5   : > { %1633 = vmatprep.mubr.bf16.mxu1 %v664_v49  ;;  %1553 = vmatprep.mubr.bf16.mxu0 %v600_v50  ;;  %v340_v45 = vld [vmem:[%s3956_s17 + $0x1a8] sm:$0xff]  ;;  %v563_v49 = vpack.c.bf16 %v331_v41, %v323_v40  ;;  %v570_v50 = vpack.c.bf16 %v346_v43, %v338_v42  ;;  %v387_v40 = vld [vmem:[%s3956_s17 + $0x320] sm:$0xff]  ;;  %v402_v42 = vld [vmem:[%s3956_s17 + $0x398] sm:$0xff] }
  0xd6   : > { %v348_v46 = vld [vmem:[%s3956_s17 + $0x1e8] sm:$0xff]  ;;  %v395_v41 = vld [vmem:[%s3956_s17 + $0x360] sm:$0xff]  ;;  %v410_v43 = vld [vmem:[%s3956_s17 + $0x3d8] sm:$0xff] }
  0xd7   : > { %1671 = vmatpush2.bf16.msra.mxu1 %v3406_v47  ;;  %1864 = vmatpush2.bf16.msra.mxu0 %v3409_v48  ;;  %v3438_v47 = vld [vmem:[#allocation5 + $0x334] ss:$8 sps:$4 sm:$0xff]   ;;  %v561_v48 = vpack.c.bf16 %v329_v38, %v321_v37  ;;  %v572_v51 = vpack.c.bf16 %v348_v46, %v340_v45  ;;  %v3459_v37 = vld [vmem:[#allocation5 + $0x3c4] ss:$8 sps:$4 sm:$0xff]   ;;  %v3457_v46 = vld [vmem:[#allocation5 + $0x3c0] ss:$8 sps:$4 sm:$0xff]  }
  0xd8   : > { %1672 = vmatprep.subr.bf16.mxu1 %v3414_v55  ;;  %1865 = vmatprep.subr.bf16.mxu0 %v3417_v56  ;;  %v3441_v55 = vld [vmem:[#allocation5 + $0x324] ss:$8 sps:$4 sm:$0xff]   ;;  %v385_v38 = vld [vmem:[%s3956_s17 + $0x310] sm:$0xff] }
  0xd9   : > { %v339_v56 = vld [vmem:[%s3956_s17 + $0x1a0] sm:$0xff]  ;;  %v412_v45 = vld [vmem:[%s3956_s17 + $0x3e8] sm:$0xff] }
  0xda   : > { %1634 = vmatmul.mubr.bf16.gmra.mxu1 %v663_v59  ;;  %1554 = vmatmul.mubr.bf16.gmra.mxu0 %v599_v60  ;;  %v362_v59 = vld [vmem:[%s3956_s17 + $0x258] sm:$0xff]  ;;  %v356_v60 = vld [vmem:[%s3956_s17 + $0x228] sm:$0xff] }
  0xdb   : > { %1673 = vmatpush2.bf16.msra.mxu1 %v3412_v63  ;;  %1866 = vmatpush2.bf16.msra.mxu0 %v3415_v0  ;;  %v3444_v63 = vld [vmem:[#allocation5 + $0x314] ss:$8 sps:$4 sm:$0xff]   ;;  %v569_v0 = vpack.c.bf16 %v345_v54, %v337_v53  ;;  %v3465_v53 = vld [vmem:[#allocation5 + $0x3a4] ss:$8 sps:$4 sm:$0xff]  }
  0xdc   : > { %1674 = vmatprep.subr.bf16.mxu1 %v3420_v1  ;;  %1867 = vmatprep.subr.bf16.mxu0 %v3423_v2  ;;  %v571_v1 = vpack.c.bf16 %v347_v57, %v339_v56  ;;  %v578_v2 = vpack.c.bf16 %v362_v59, %v354_v58  ;;  %v401_v54 = vld [vmem:[%s3956_s17 + $0x390] sm:$0xff]  ;;  %v403_v56 = vld [vmem:[%s3956_s17 + $0x3a0] sm:$0xff]  ;;  %v418_v58 = vld [vmem:[%s3956_s17 + $0x418] sm:$0xff] }
  0xdd   : > { %1676 = vmatprep.mubr.bf16.mxu1 %v546_v5  ;;  %1869 = vmatprep.mubr.bf16.mxu0 %v548_v6  ;;  %v3447_v5 = vld [vmem:[#allocation5 + $0x304] ss:$8 sps:$4 sm:$0xff]   ;;  %v353_v6 = vld [vmem:[%s3956_s17 + $0x210] sm:$0xff]  ;;  %v426_v59 = vld [vmem:[%s3956_s17 + $0x458] sm:$0xff] }
  0xde   : > { %v411_v57 = vld [vmem:[%s3956_s17 + $0x3e0] sm:$0xff] }
  0xdf   : > { %1675 = vmatpush2.bf16.msra.mxu1 %v3418_v3  ;;  %1868 = vmatpush2.bf16.msra.mxu0 %v3421_v4  ;;  %v580_v3 = vpack.c.bf16 %v364_v61, %v356_v60  ;;  %v3442_v4 = vld [vmem:[#allocation5 + $0x310] ss:$8 sps:$4 sm:$0xff]   ;;  %v420_v60 = vld [vmem:[%s3956_s17 + $0x428] sm:$0xff] }
  0xe0   : > { %2030 = vmatprep.subr.bf16.mxu1 %v3426_v11  ;;  %v378_v11 = vld [vmem:[%s3956_s17 + $0x2d8] sm:$0xff]  ;;  %v428_v61 = vld [vmem:[%s3956_s17 + $0x468] sm:$0xff] }
  0xe2   : > { %1677 = vmatmul.mubr.bf16.vlgmr.msra.gmra.mxu1 %v545_v16  ;;  %1870 = vmatmul.mubr.bf16.vlgmr.msra.gmra.mxu0 %v547_v17  ;;  %v577_v16 = vpack.c.bf16 %v361_v7, %v353_v6  ;;  %v579_v17 = vpack.c.bf16 %v363_v9, %v355_v8  ;;  %v417_v6 = vld [vmem:[%s3956_s17 + $0x410] sm:$0xff]  ;;  %v419_v8 = vld [vmem:[%s3956_s17 + $0x420] sm:$0xff] }
  0xe3   : > { %2031 = vmatpush1.bf16.msra.mxu1 %v3424_v18  ;;  %1686 = vmatprep.mubr.bf16.mxu1 %v554_v19  ;;  %v586_v18 = vpack.c.bf16 %v378_v11, %v370_v10  ;;  %v588_v19 = vpack.c.bf16 %v380_v13, %v372_v12  ;;  %v425_v7 = vld [vmem:[%s3956_s17 + $0x450] sm:$0xff]  ;;  %v427_v9 = vld [vmem:[%s3956_s17 + $0x460] sm:$0xff]  ;;  %v434_v10 = vld [vmem:[%s3956_s17 + $0x498] sm:$0xff] }
  0xe4   : > { %2032 = vmatprep.subr.bf16.mxu1 %v3429_v20  ;;  %1879 = vmatprep.mubr.bf16.mxu0 %v556_v21  ;;  %v3448_v20 = vld [vmem:[#allocation5 + $0x3f0] ss:$8 sps:$4 sm:$0xff]   ;;  %v3453_v21 = vld [vmem:[#allocation5 + $0x3e4] ss:$8 sps:$4 sm:$0xff]  }
  0xe5   : > { %v442_v11 = vld [vmem:[%s3956_s17 + $0x4d8] sm:$0xff]  ;;  %v436_v12 = vld [vmem:[%s3956_s17 + $0x4a8] sm:$0xff] }
  0xe6   : > { %v444_v13 = vld [vmem:[%s3956_s17 + $0x4e8] sm:$0xff] }
  0xe7   : > { %2033 = vmatpush1.bf16.msra.mxu1 %v3427_v24  ;;  %v371_v24 = vld [vmem:[%s3956_s17 + $0x2a0] sm:$0xff] }
  0xe8   : > { %2034 = vmatprep.subr.bf16.mxu1 %v3432_v29  ;;  %v396_v29 = vld [vmem:[%s3956_s17 + $0x368] sm:$0xff] }
  0xea   : > { %1687 = vmatmul.mubr.bf16.gmra.mxu1 %v553_v32  ;;  %1880 = vmatmul.mubr.bf16.gmra.mxu0 %v555_v33  ;;  %v585_v32 = vpack.c.bf16 %v377_v23, %v369_v22  ;;  %v587_v33 = vpack.c.bf16 %v379_v25, %v371_v24  ;;  %v443_v22 = vld [vmem:[%s3956_s17 + $0x4e0] sm:$0xff]  ;;  %v450_v23 = vld [vmem:[%s3956_s17 + $0x518] sm:$0xff]  ;;  %v452_v25 = vld [vmem:[%s3956_s17 + $0x528] sm:$0xff] }
  0xeb   : > { %1696 = vmatprep.mubr.bf16.mxu1 %v562_v34  ;;  %1889 = vmatprep.mubr.bf16.mxu0 %v564_v35  ;;  %v594_v34 = vpack.c.bf16 %v394_v27, %v386_v26  ;;  %v596_v35 = vpack.c.bf16 %v396_v29, %v388_v28  ;;  %v458_v24 = vld [vmem:[%s3956_s17 + $0x558] sm:$0xff]  ;;  %v460_v26 = vld [vmem:[%s3956_s17 + $0x568] sm:$0xff] }
  0xec   : > { %2035 = vmatpush1.bf16.msra.mxu1 %v3430_v36  ;;  %v3454_v36 = vld [vmem:[#allocation5 + $0x3d0] ss:$8 sps:$4 sm:$0xff]   ;;  %v626_v29 = vpack.c.bf16 %v458_v24, %v450_v23  ;;  %v515_v23 = vld [vmem:[%s3956_s17 + $0x720] sm:$0xff] }
  0xed   : > { %2036 = vmatprep.subr.bf16.mxu1 %v3435_v39  ;;  %v393_v39 = vld [vmem:[%s3956_s17 + $0x350] sm:$0xff]  ;;  %v523_v24 = vld [vmem:[%s3956_s17 + $0x760] sm:$0xff] }
  0xf0   : > { %2037 = vmatpush1.bf16.msra.mxu1 %v3433_v44  ;;  %v404_v44 = vld [vmem:[%s3956_s17 + $0x3a8] sm:$0xff] }
  0xf1   : > { %2038 = vmatprep.subr.bf16.mxu1 %v3438_v47  ;;  %v3462_v47 = vld [vmem:[#allocation5 + $0x3b4] ss:$8 sps:$4 sm:$0xff]  }
  0xf2   : > { %1697 = vmatmul.mubr.bf16.gmra.mxu1 %v561_v48  ;;  %1890 = vmatmul.mubr.bf16.gmra.mxu0 %v563_v49  ;;  %v593_v48 = vpack.c.bf16 %v393_v39, %v385_v38  ;;  %v595_v49 = vpack.c.bf16 %v395_v41, %v387_v40  ;;  %v476_v38 = vld [vmem:[%s3956_s17 + $0x5e8] sm:$0xff] }
  0xf3   : > { %1706 = vmatprep.mubr.bf16.mxu1 %v570_v50  ;;  %1899 = vmatprep.mubr.bf16.mxu0 %v572_v51  ;;  %v602_v50 = vpack.c.bf16 %v410_v43, %v402_v42  ;;  %v604_v51 = vpack.c.bf16 %v412_v45, %v404_v44  ;;  %v465_v43 = vld [vmem:[%s3956_s17 + $0x590] sm:$0xff]  ;;  %v467_v45 = vld [vmem:[%s3956_s17 + $0x5a0] sm:$0xff] }
  0xf4   : > { %2039 = vmatpush1.bf16.msra.mxu1 %v3436_v52  ;;  %v3460_v52 = vld [vmem:[#allocation5 + $0x3b0] ss:$8 sps:$4 sm:$0xff]  }
  0xf5   : > { %2040 = vmatprep.subr.bf16.mxu1 %v3441_v55  ;;  %v409_v55 = vld [vmem:[%s3956_s17 + $0x3d0] sm:$0xff] }
  0xf6   : > { %v473_v44 = vld [vmem:[%s3956_s17 + $0x5d0] sm:$0xff] }
  0xf8   : > { %2041 = vmatpush1.bf16.msra.mxu1 %v3439_v62  ;;  %v3463_v62 = vld [vmem:[#allocation5 + $0x3a0] ss:$8 sps:$4 sm:$0xff]  }
  0xf9   : > { %2042 = vmatprep.subr.bf16.mxu1 %v3444_v63  ;;  %v3468_v63 = vld [vmem:[#allocation5 + $0x394] ss:$8 sps:$4 sm:$0xff]  }
  0xfa   : > { %1707 = vmatmul.mubr.bf16.gmra.mxu1 %v569_v0  ;;  %1900 = vmatmul.mubr.bf16.gmra.mxu0 %v571_v1  ;;  %v601_v0 = vpack.c.bf16 %v409_v55, %v401_v54  ;;  %v603_v1 = vpack.c.bf16 %v411_v57, %v403_v56  ;;  %v2302_v55 = vld [vmem:[%s5213_s3 + $0x78] sm:$0xff]  ;;  %v5218_v56 = vmov 0.0  }
  0xfb   : > { %1716 = vmatprep.mubr.bf16.mxu1 %v578_v2  ;;  %1909 = vmatprep.mubr.bf16.mxu0 %v580_v3  ;;  %v610_v2 = vpack.c.bf16 %v426_v59, %v418_v58  ;;  %v612_v3 = vpack.c.bf16 %v428_v61, %v420_v60  ;;  %v481_v57 = vld [vmem:[%s3956_s17 + $0x610] sm:$0xff]  ;;  %v483_v59 = vld [vmem:[%s3956_s17 + $0x620] sm:$0xff]  ;;  %v498_v61 = vld [vmem:[%s3956_s17 + $0x698] sm:$0xff] }
  0xfc   : > { %2043 = vmatpush1.bf16.msra.mxu1 %v3442_v4  ;;  %v3466_v4 = vld [vmem:[#allocation5 + $0x390] ss:$8 sps:$4 sm:$0xff]   ;;  %2326 = vmatprep.subr.mxu0 %v5218_v56  ;;  %v491_v60 = vld [vmem:[%s3956_s17 + $0x660] sm:$0xff] }
  0xfd   : > { %2044 = vmatprep.subr.bf16.mxu1 %v3447_v5  ;;  %v3471_v5 = vld [vmem:[#allocation5 + $0x384] ss:$8 sps:$4 sm:$0xff]   ;;  %2327 = vmatpush1.msra.mxu0 %v2302_v55  ;;  %v489_v58 = vld [vmem:[%s3956_s17 + $0x650] sm:$0xff] }
  0xfe   : > { %2328 = vmatprep.subr.mxu0 %v5218_v56 }
 0x100   : > { %2045 = vmatpush1.bf16.msra.mxu1 %v3445_v14  ;;  %v3469_v14 = vld [vmem:[#allocation5 + $0x380] ss:$8 sps:$4 sm:$0xff]  }
 0x101   : > { %2046 = vmatprep.subr.bf16.mxu1 %v3450_v15  ;;  %v609_v15 = vpack.c.bf16 %v425_v7, %v417_v6  ;;  %v2300_v6 = vld [vmem:[%s5213_s3 + $0x68] sm:$0xff]  ;;  %v497_v7 = vld [vmem:[%s3956_s17 + $0x690] sm:$0xff] }
 0x102   : > { %1717 = vmatmul.mubr.bf16.gmra.mxu1 %v577_v16  ;;  %1910 = vmatmul.mubr.bf16.gmra.mxu0 %v579_v17  ;;  %v611_v16 = vpack.c.bf16 %v427_v9, %v419_v8  ;;  %v618_v17 = vpack.c.bf16 %v442_v11, %v434_v10  ;;  %v505_v8 = vld [vmem:[%s3956_s17 + $0x6d0] sm:$0xff]  ;;  %v499_v9 = vld [vmem:[%s3956_s17 + $0x6a0] sm:$0xff]  ;;  %v514_v11 = vld [vmem:[%s3956_s17 + $0x718] sm:$0xff] }
 0x103   : > { %1726 = vmatprep.mubr.bf16.mxu1 %v586_v18  ;;  %1919 = vmatprep.mubr.bf16.mxu0 %v588_v19  ;;  %v620_v18 = vpack.c.bf16 %v444_v13, %v436_v12  ;;  %v433_v19 = vld [vmem:[%s3956_s17 + $0x490] sm:$0xff]  ;;  %v507_v10 = vld [vmem:[%s3956_s17 + $0x6e0] sm:$0xff]  ;;  %v522_v13 = vld [vmem:[%s3956_s17 + $0x758] sm:$0xff] }
 0x104   : > { %2047 = vmatpush2.bf16.msra.mxu1 %v3448_v20  ;;  %v441_v20 = vld [vmem:[%s3956_s17 + $0x4d0] sm:$0xff]  ;;  %v2299_v12 = vld [vmem:[%s5213_s3 + $0x60] sm:$0xff] }
 0x105   : > { %2048 = vmatprep.subr.bf16.mxu1 %v3453_v21  ;;  %v435_v21 = vld [vmem:[%s3956_s17 + $0x4a0] sm:$0xff]  ;;  %v617_v27 = vpack.c.bf16 %v441_v20, %v433_v19  ;;  %v2298_v20 = vld [vmem:[%s5213_s3 + $0x58] sm:$0xff] }
 0x106   : > { %v619_v28 = vpack.c.bf16 %v443_v22, %v435_v21  ;;  %v513_v21 = vld [vmem:[%s3956_s17 + $0x710] sm:$0xff] }
 0x107   : > { %v521_v22 = vld [vmem:[%s3956_s17 + $0x750] sm:$0xff] }
 0x108   : > { %2049 = vmatpush2.bf16.msra.mxu1 %v3451_v30  ;;  %v628_v30 = vpack.c.bf16 %v460_v26, %v452_v25  ;;  %v530_v25 = vld [vmem:[%s3956_s17 + $0x798] sm:$0xff]  ;;  %v2297_v26 = vld [vmem:[%s5213_s3 + $0x50] sm:$0xff] }
 0x109   : > { %2050 = vmatprep.subr.bf16.mxu1 %v3456_v31  ;;  %v449_v31 = vld [vmem:[%s3956_s17 + $0x510] sm:$0xff] }
 0x10a   : > { %1727 = vmatmul.mubr.bf16.gmra.mxu1 %v585_v32  ;;  %1920 = vmatmul.mubr.bf16.gmra.mxu0 %v587_v33  ;;  %v457_v32 = vld [vmem:[%s3956_s17 + $0x550] sm:$0xff]  ;;  %v451_v33 = vld [vmem:[%s3956_s17 + $0x520] sm:$0xff] }
 0x10b   : > { %1736 = vmatprep.mubr.bf16.mxu1 %v594_v34  ;;  %1929 = vmatprep.mubr.bf16.mxu0 %v596_v35  ;;  %v459_v34 = vld [vmem:[%s3956_s17 + $0x560] sm:$0xff]  ;;  %v466_v35 = vld [vmem:[%s3956_s17 + $0x598] sm:$0xff]  ;;  %v625_v39 = vpack.c.bf16 %v457_v32, %v449_v31  ;;  %v659_v31 = vpack.c.bf16 %v523_v24, %v515_v23  ;;  %v2289_v23 = vld [vmem:[%s5213_s3 + $0x10] sm:$0xff] }
 0x10c   : > { %2051 = vmatpush2.bf16.msra.mxu1 %v3454_v36  ;;  %v474_v36 = vld [vmem:[%s3956_s17 + $0x5d8] sm:$0xff]  ;;  %v627_v40 = vpack.c.bf16 %v459_v34, %v451_v33  ;;  %v2296_v34 = vld [vmem:[%s5213_s3 + $0x48] sm:$0xff] }
 0x10d   : > { %2052 = vmatprep.subr.bf16.mxu1 %v3459_v37  ;;  %v468_v37 = vld [vmem:[%s3956_s17 + $0x5a8] sm:$0xff]  ;;  %v634_v41 = vpack.c.bf16 %v474_v36, %v466_v35  ;;  %v529_v35 = vld [vmem:[%s3956_s17 + $0x790] sm:$0xff] }
 0x10e   : > { %v636_v42 = vpack.c.bf16 %v476_v38, %v468_v37  ;;  %v537_v36 = vld [vmem:[%s3956_s17 + $0x7d0] sm:$0xff]  ;;  %v531_v37 = vld [vmem:[%s3956_s17 + $0x7a0] sm:$0xff] }
 0x10f   : > { %v539_v38 = vld [vmem:[%s3956_s17 + $0x7e0] sm:$0xff] }
 0x110   : > { %2053 = vmatpush2.bf16.msra.mxu1 %v3457_v46  ;;  %v475_v46 = vld [vmem:[%s3956_s17 + $0x5e0] sm:$0xff] }
 0x111   : > { %2054 = vmatprep.subr.bf16.mxu1 %v3462_v47  ;;  %v482_v47 = vld [vmem:[%s3956_s17 + $0x618] sm:$0xff] }
 0x112   : > { %1737 = vmatmul.mubr.bf16.gmra.mxu1 %v593_v48  ;;  %1930 = vmatmul.mubr.bf16.gmra.mxu0 %v595_v49  ;;  %v490_v48 = vld [vmem:[%s3956_s17 + $0x658] sm:$0xff]  ;;  %v484_v49 = vld [vmem:[%s3956_s17 + $0x628] sm:$0xff] }
 0x113   : > { %1746 = vmatprep.mubr.bf16.mxu1 %v602_v50  ;;  %1939 = vmatprep.mubr.bf16.mxu0 %v604_v51  ;;  %v492_v50 = vld [vmem:[%s3956_s17 + $0x668] sm:$0xff]  ;;  %v633_v51 = vpack.c.bf16 %v473_v44, %v465_v43  ;;  %v665_v43 = vpack.c.bf16 %v537_v36, %v529_v35  ;;  %v667_v44 = vpack.c.bf16 %v539_v38, %v531_v37 }
 0x114   : > { %2055 = vmatpush2.bf16.msra.mxu1 %v3460_v52  ;;  %v635_v52 = vpack.c.bf16 %v475_v46, %v467_v45  ;;  %v644_v54 = vpack.c.bf16 %v492_v50, %v484_v49  ;;  %v293_v49 = vld [vmem:[%s3956_s17 + $0x30] sm:$0xff] }
 0x115   : > { %2056 = vmatprep.subr.bf16.mxu1 %v3465_v53  ;;  %v642_v53 = vpack.c.bf16 %v490_v48, %v482_v47  ;;  %v2294_v47 = vld [vmem:[%s5213_s3 + $0x38] sm:$0xff] }
 0x116   : > { %v301_v50 = vld [vmem:[%s3956_s17 + $0x70] sm:$0xff] }
 0x118   : > { %2057 = vmatpush2.bf16.msra.mxu1 %v3463_v62  ;;  %v2301_v62 = vld [vmem:[%s5213_s3 + $0x70] sm:$0xff] }
 0x119   : > { %2058 = vmatprep.subr.bf16.mxu1 %v3468_v63  ;;  %v506_v63 = vld [vmem:[%s3956_s17 + $0x6d8] sm:$0xff]  ;;  %2329 = vmatpush1.msra.mxu0 %v2301_v62 }
 0x11a   : > { %1747 = vmatmul.mubr.bf16.gmra.mxu1 %v601_v0  ;;  %1940 = vmatmul.mubr.bf16.gmra.mxu0 %v603_v1  ;;  %v500_v0 = vld [vmem:[%s3956_s17 + $0x6a8] sm:$0xff] }
 0x11b   : > { %1756 = vmatprep.mubr.bf16.mxu1 %v610_v2  ;;  %1949 = vmatprep.mubr.bf16.mxu0 %v612_v3  ;;  %v508_v1 = vld [vmem:[%s3956_s17 + $0x6e8] sm:$0xff]  ;;  %v641_v2 = vpack.c.bf16 %v489_v58, %v481_v57  ;;  %v643_v3 = vpack.c.bf16 %v491_v60, %v483_v59  ;;  %v549_v57 = vpack.c.bf16 %v301_v50, %v293_v49 }
 0x11c   : > { %2059 = vmatpush2.bf16.msra.mxu1 %v3466_v4  ;;  %2330 = vmatprep.subr.mxu0 %v5218_v56  ;;  %v650_v4 = vpack.c.bf16 %v506_v63, %v498_v61  ;;  %v2292_v60 = vld [vmem:[%s5213_s3 + $0x28] sm:$0xff] }
 0x11d   : > { %2060 = vmatprep.subr.bf16.mxu1 %v3471_v5  ;;  %v652_v5 = vpack.c.bf16 %v508_v1, %v500_v0  ;;  %2331 = vmatpush1.msra.mxu0 %v2300_v6  ;;  %v309_v1 = vld [vmem:[%s3956_s17 + $0xb0] sm:$0xff]  ;;  %v326_v6 = vld [vmem:[%s3956_s17 + $0x138] sm:$0xff] }
 0x11e   : > { %2332 = vmatprep.subr.mxu0 %v5218_v56 }
 0x11f   : > { %2333 = vmatpush1.msra.mxu0 %v2299_v12 }
 0x120   : > { %2061 = vmatpush2.bf16.msra.mxu1 %v3469_v14  ;;  %v516_v14 = vld [vmem:[%s3956_s17 + $0x728] sm:$0xff]  ;;  %2334 = vmatprep.subr.mxu0 %v5218_v56 }
 0x121   : > { %2335 = vmatpush1.msra.mxu0 %v2298_v20 }
 0x122   : > { %1757 = vmatmul.mubr.bf16.gmra.mxu1 %v609_v15  ;;  %1950 = vmatmul.mubr.bf16.gmra.mxu0 %v611_v16  ;;  %v524_v15 = vld [vmem:[%s3956_s17 + $0x768] sm:$0xff]  ;;  %v649_v16 = vpack.c.bf16 %v505_v8, %v497_v7  ;;  %v334_v7 = vld [vmem:[%s3956_s17 + $0x178] sm:$0xff] }
 0x123   : > { %1766 = vmatprep.mubr.bf16.mxu1 %v618_v17  ;;  %1959 = vmatprep.mubr.bf16.mxu0 %v620_v18  ;;  %v651_v17 = vpack.c.bf16 %v507_v10, %v499_v9  ;;  %v658_v18 = vpack.c.bf16 %v522_v13, %v514_v11  ;;  %v660_v19 = vpack.c.bf16 %v524_v15, %v516_v14  ;;  %v2290_v14 = vld [vmem:[%s5213_s3 + $0x18] sm:$0xff] }
 0x124   : > { %2336 = vmatprep.subr.mxu0 %v5218_v56  ;;  %v566_v13 = vpack.c.bf16 %v334_v7, %v326_v6 }
 0x125   : > { %2337 = vmatpush1.msra.mxu0 %v2297_v26  ;;  %v342_v26 = vld [vmem:[%s3956_s17 + $0x1b8] sm:$0xff] }
 0x126   : > { %2338 = vmatprep.subr.mxu0 %v5218_v56 }
 0x127   : > { %2339 = vmatpush1.msra.mxu0 %v2296_v34  ;;  %v2288_v34 = vld [vmem:[%s5213_s3 + $0x8] sm:$0xff] }
 0x128   : > { %2340 = vmatprep.subr.mxu0 %v5218_v56 }
 0x12a   : > { %1767 = vmatmul.mubr.bf16.gmra.mxu1 %v617_v27  ;;  %1960 = vmatmul.mubr.bf16.gmra.mxu0 %v619_v28  ;;  %v538_v27 = vld [vmem:[%s3956_s17 + $0x7d8] sm:$0xff]  ;;  %v532_v28 = vld [vmem:[%s3956_s17 + $0x7a8] sm:$0xff] }
 0x12b   : > { %1776 = vmatprep.mubr.bf16.mxu1 %v626_v29  ;;  %1969 = vmatprep.mubr.bf16.mxu0 %v628_v30  ;;  %v540_v29 = vld [vmem:[%s3956_s17 + $0x7e8] sm:$0xff]  ;;  %v657_v30 = vpack.c.bf16 %v521_v22, %v513_v21  ;;  %v666_v32 = vpack.c.bf16 %v538_v27, %v530_v25  ;;  %v325_v21 = vld [vmem:[%s3956_s17 + $0x130] sm:$0xff]  ;;  %v350_v27 = vld [vmem:[%s3956_s17 + $0x1f8] sm:$0xff] }
 0x12c   : > { %v668_v33 = vpack.c.bf16 %v540_v29, %v532_v28  ;;  %v333_v22 = vld [vmem:[%s3956_s17 + $0x170] sm:$0xff] }
 0x132   : > { %1777 = vmatmul.mubr.bf16.gmra.mxu1 %v625_v39  ;;  %1970 = vmatmul.mubr.bf16.gmra.mxu0 %v627_v40  ;;  %v801_v39 = vlaneseq  ;;  %v2295_v40 = vld [vmem:[%s5213_s3 + $0x40] sm:$0xff] }
 0x133   : > { %1786 = vmatprep.mubr.bf16.mxu1 %v634_v41  ;;  %1979 = vmatprep.mubr.bf16.mxu0 %v636_v42  ;;  %v294_v41 = vld [vmem:[%s3956_s17 + $0x38] sm:$0xff] }
 0x134   : > { %v302_v42 = vld [vmem:[%s3956_s17 + $0x78] sm:$0xff]  ;;  %2341 = vmatpush1.msra.mxu0 %v2295_v40  ;;  %v802_v46 = vshrl.u32 %v801_v39, 7 }
 0x135   : > { %2342 = vmatprep.subr.mxu0 %v5218_v56  ;;  %v550_v45 = vpack.c.bf16 %v302_v42, %v294_v41  ;;  %v341_v41 = vld [vmem:[%s3956_s17 + $0x1b0] sm:$0xff] }
 0x136   : > { %2343 = vmatpush1.msra.mxu0 %v2294_v47  ;;  %v803_v48 = vsub.s32 0, %v802_v46  ;;  %v807_v55 = vsub.s32 1, %v802_v46  ;;  %v349_v42 = vld [vmem:[%s3956_s17 + $0x1f0] sm:$0xff]  ;;  %v358_v46 = vld [vmem:[%s3956_s17 + $0x238] sm:$0xff] }
 0x137   : > { %2344 = vmatprep.subr.mxu0 %v5218_v56  ;;  %v366_v47 = vld [vmem:[%s3956_s17 + $0x278] sm:$0xff] }
 0x13a   : > { %1787 = vmatmul.mubr.bf16.gmra.mxu1 %v633_v51  ;;  %1980 = vmatmul.mubr.bf16.gmra.mxu0 %v635_v52  ;;  %v2293_v51 = vld [vmem:[%s5213_s3 + $0x30] sm:$0xff]  ;;  %v799_v52 = vld [vmem:[#allocation7] sm:$0x3] }
 0x13b   : > { %1796 = vmatprep.mubr.bf16.mxu1 %v642_v53  ;;  %1989 = vmatprep.mubr.bf16.mxu0 %v644_v54  ;;  %v310_v53 = vld [vmem:[%s3956_s17 + $0xb8] sm:$0xff]  ;;  %v4205_v58 = vrot.slane %v799_v52, %v803_v48  ;;  %v4210_v61 = vrot.slane %v799_v52, %v807_v55 }
 0x13c   : > { %v318_v54 = vld [vmem:[%s3956_s17 + $0xf8] sm:$0xff]  ;;  %2345 = vmatpush1.msra.mxu0 %v2293_v51  ;;  %v573_v51 = vpack.c.bf16 %v349_v42, %v341_v41 }
 0x13d   : > { %2346 = vmatprep.subr.mxu0 %v5218_v56  ;;  %v558_v59 = vpack.c.bf16 %v318_v54, %v310_v53  ;;  %v582_v53 = vpack.c.bf16 %v366_v47, %v358_v46  ;;  %v2318_v54 = vld [vmem:[%s5213_s3 + $0xf8] sm:$0xff] }
 0x13e   : > { %2347 = vmatpush1.msra.mxu0 %v2292_v60 }
 0x13f   : > { %2348 = vmatprep.subr.mxu0 %v5218_v56 }
 0x142   : > { %1797 = vmatmul.mubr.bf16.gmra.mxu1 %v641_v2  ;;  %1990 = vmatmul.mubr.bf16.gmra.mxu0 %v643_v3  ;;  %v317_v2 = vld [vmem:[%s3956_s17 + $0xf0] sm:$0xff]  ;;  %v2291_v3 = vld [vmem:[%s5213_s3 + $0x20] sm:$0xff] }
 0x143   : > { %1806 = vmatprep.mubr.bf16.mxu1 %v650_v4  ;;  %1999 = vmatprep.mubr.bf16.mxu0 %v652_v5  ;;  %v557_v11 = vpack.c.bf16 %v317_v2, %v309_v1  ;;  %v357_v2 = vld [vmem:[%s3956_s17 + $0x230] sm:$0xff] }
 0x144   : > { %2349 = vmatpush1.msra.mxu0 %v2291_v3  ;;  %v365_v3 = vld [vmem:[%s3956_s17 + $0x270] sm:$0xff] }
 0x145   : > { %2350 = vmatprep.subr.mxu0 %v5218_v56 }
 0x146   : > { %2351 = vmatpush1.msra.mxu0 %v2290_v14 }
 0x147   : > { %2352 = vmatprep.subr.mxu0 %v5218_v56 }
 0x148   : > { %2353 = vmatpush1.msra.mxu0 %v2289_v23  ;;  %v2316_v23 = vld [vmem:[%s5213_s3 + $0xe8] sm:$0xff] }
 0x149   : > { %2354 = vmatprep.subr.mxu0 %v5218_v56 }
 0x14a   : > { %1807 = vmatmul.mubr.bf16.gmra.mxu1 %v649_v16  ;;  %2000 = vmatmul.mubr.bf16.gmra.mxu0 %v651_v17 }
 0x14b   : > { %1816 = vmatprep.mubr.bf16.mxu1 %v658_v18  ;;  %2009 = vmatprep.mubr.bf16.mxu0 %v660_v19 }
 0x14c   : > { %2355 = vmatpush1.msra.mxu0 %v2288_v34  ;;  %v373_v34 = vld [vmem:[%s3956_s17 + $0x2b0] sm:$0xff] }
 0x14d   : > { %2356 = vmatprep.subr.mxu0 %v5218_v56 }
 0x152   : > { %1817 = vmatmul.mubr.bf16.gmra.mxu1 %v657_v30  ;;  %2010 = vmatmul.mubr.bf16.gmra.mxu0 %v659_v31  ;;  %v565_v31 = vpack.c.bf16 %v333_v22, %v325_v21 }
 0x153   : > { %1826 = vmatprep.mubr.bf16.mxu1 %v666_v32  ;;  %2019 = vmatprep.mubr.bf16.mxu0 %v668_v33  ;;  %v574_v33 = vpack.c.bf16 %v350_v27, %v342_v26 }
 0x15a   : > { %1827 = vmatmul.mubr.bf16.gmra.mxu1 %v665_v43  ;;  %2020 = vmatmul.mubr.bf16.gmra.mxu0 %v667_v44  ;;  %v2287_v43 = vld [vmem:[%s5213_s3] sm:$0xff] }
 0x15b   : > { %2062 = vmatprep.mubr.bf16.mxu1 %v550_v45  ;;  %2357 = vmatpush1.msra.mxu0 %v2287_v43  ;;  %v390_v43 = vld [vmem:[%s3956_s17 + $0x338] sm:$0xff] }
 0x15c   : > { %2358 = vmatprep.subr.mxu0 %v5218_v56 }
 0x15d   : > { %2359 = vmatpush2.msra.mxu0 %v2318_v54 }
 0x15e   : > { %2360 = vmatprep.subr.mxu0 %v5218_v56 }
 0x162   : > { %v1565_v62 = vpop.f32.mrf.mxu1  ;;  %2063 = vmatmul.mubr.bf16.vlgmr.msra.gmra.mxu1 %v549_v57  ;;  %v4213_v63 = vpop.f32.mrf.mxu0 }
 0x163   : > { %v4216_v0 = vadd.f32 %v1565_v62, %v4205_v58  ;;  %2072 = vmatprep.mubr.bf16.mxu1 %v558_v59 }
 0x164   : > { %v1567_v4 = vpop.f32.mrf.mxu1  ;;  %v4223_v5 = vpop.f32.mrf.mxu0 }
 0x165   : > { %v4228_v8 = vadd.f32 %v1567_v4, %v4210_v61  ;;  %v2317_v4 = vld [vmem:[%s5213_s3 + $0xf0] sm:$0xff] }
 0x166   : > { %v1569_v9 = vpop.f32.mrf.mxu1  ;;  %v4231_v10 = vpop.f32.mrf.mxu0  ;;  %2361 = vmatpush2.msra.mxu0 %v2317_v4 }
 0x167   : > { %v4234_v12 = vadd.f32 %v1569_v9, %v4205_v58  ;;  %v374_v9 = vld [vmem:[%s3956_s17 + $0x2b8] sm:$0xff]  ;;  %2362 = vmatprep.subr.mxu0 %v5218_v56 }
 0x168   : > { %v1571_v15 = vpop.f32.mrf.mxu1  ;;  %v4239_v16 = vpop.f32.mrf.mxu0  ;;  %2363 = vmatpush2.msra.mxu0 %v2316_v23 }
 0x169   : > { %v4242_v17 = vadd.f32 %v1571_v15, %v4210_v61  ;;  %2364 = vmatprep.subr.mxu0 %v5218_v56 }
 0x16a   : > { %v1575_v18 = vpop.f32.mrf.mxu1  ;;  %2073 = vmatmul.mubr.bf16.gmra.mxu1 %v557_v11  ;;  %v4245_v19 = vpop.f32.mrf.mxu0  ;;  %v382_v11 = vld [vmem:[%s3956_s17 + $0x2f8] sm:$0xff] }
 0x16b   : > { %v4248_v20 = vadd.f32 %v1575_v18, %v4205_v58  ;;  %2082 = vmatprep.mubr.bf16.mxu1 %v566_v13  ;;  %v581_v18 = vpack.c.bf16 %v365_v3, %v357_v2  ;;  %v590_v22 = vpack.c.bf16 %v382_v11, %v374_v9  ;;  %v389_v11 = vld [vmem:[%s3956_s17 + $0x330] sm:$0xff] }
 0x16c   : > { %v1577_v24 = vpop.f32.mrf.mxu1  ;;  %v4255_v25 = vpop.f32.mrf.mxu0 }
 0x16d   : > { %v4260_v28 = vadd.f32 %v1577_v24, %v4210_v61 }
 0x16e   : > { %v1579_v29 = vpop.f32.mrf.mxu1  ;;  %v4263_v30 = vpop.f32.mrf.mxu0 }
 0x16f   : > { %v4266_v32 = vadd.f32 %v1579_v29, %v4205_v58 }
 0x170   : > { %v1581_v35 = vpop.f32.mrf.mxu1  ;;  %v4271_v36 = vpop.f32.mrf.mxu0 }
 0x171   : > { %5228 = vst [vmem:[#allocation11_spill] sm:$0xff] %v4271_v36  ;;  %v4274_v37 = vadd.f32 %v1581_v35, %v4210_v61  ;;  %v381_v35 = vld [vmem:[%s3956_s17 + $0x2f0] sm:$0xff]  ;;  %v534_v36 = vld [vmem:[%s3956_s17 + $0x7b8] sm:$0xff] }
 0x172   : > { %v1585_v38 = vpop.f32.mrf.mxu1  ;;  %2083 = vmatmul.mubr.bf16.gmra.mxu1 %v565_v31  ;;  %v4277_v39 = vpop.f32.mrf.mxu0 }
 0x173   : > { %5229 = vst [vmem:[#allocation12_spill] sm:$0xff] %v4277_v39  ;;  %v4280_v40 = vadd.f32 %v1585_v38, %v4205_v58  ;;  %2092 = vmatprep.mubr.bf16.mxu1 %v574_v33  ;;  %v2315_v38 = vld [vmem:[%s5213_s3 + $0xe0] sm:$0xff]  ;;  %v2304_v39 = vld [vmem:[%s5213_s3 + $0x88] sm:$0xff] }
 0x174   : > { %v1587_v44 = vpop.f32.mrf.mxu1  ;;  %v4287_v45 = vpop.f32.mrf.mxu0  ;;  %2365 = vmatpush2.msra.mxu0 %v2315_v38 }
 0x175   : > { %5230 = vst [vmem:[#allocation13_spill] sm:$0xff] %v4287_v45  ;;  %v4292_v48 = vadd.f32 %v1587_v44, %v4210_v61  ;;  %v398_v44 = vld [vmem:[%s3956_s17 + $0x378] sm:$0xff]  ;;  %2366 = vmatprep.subr.mxu0 %v5218_v56 }
 0x176   : > { %v1589_v49 = vpop.f32.mrf.mxu1  ;;  %v4295_v50 = vpop.f32.mrf.mxu0  ;;  %v598_v54 = vpack.c.bf16 %v398_v44, %v390_v43 }
 0x177   : > { %5231 = vst [vmem:[#allocation14_spill] sm:$0xff] %v4295_v50  ;;  %v4298_v52 = vadd.f32 %v1589_v49, %v4205_v58 }
 0x178   : > { %v1591_v55 = vpop.f32.mrf.mxu1  ;;  %v4303_v57 = vpop.f32.mrf.mxu0 }
 0x179   : > { %5232 = vst [vmem:[#allocation15_spill] sm:$0xff] %v4303_v57  ;;  %v4306_v59 = vadd.f32 %v1591_v55, %v4210_v61  ;;  %v2314_v55 = vld [vmem:[%s5213_s3 + $0xd8] sm:$0xff]  ;;  %v2305_v57 = vld [vmem:[%s5213_s3 + $0x90] sm:$0xff] }
 0x17a   : > { %v1595_v60 = vpop.f32.mrf.mxu1  ;;  %2093 = vmatmul.mubr.bf16.gmra.mxu1 %v573_v51  ;;  %v4309_v62 = vpop.f32.mrf.mxu0  ;;  %v589_v51 = vpack.c.bf16 %v381_v35, %v373_v34  ;;  %2367 = vmatpush2.msra.mxu0 %v2314_v55 }
 0x17b   : > { %5233 = vst [vmem:[#allocation16_spill] sm:$0xff] %v4309_v62  ;;  %v4312_v1 = vadd.f32 %v1595_v60, %v4205_v58  ;;  %2102 = vmatprep.mubr.bf16.mxu1 %v582_v53  ;;  %2368 = vmatprep.subr.mxu0 %v5218_v56  ;;  %v478_v62 = vld [vmem:[%s3956_s17 + $0x5f8] sm:$0xff] }
 0x17c   : > { %v1597_v6 = vpop.f32.mrf.mxu1  ;;  %v4319_v7 = vpop.f32.mrf.mxu0 }
 0x17d   : > { %5234 = vst [vmem:[#allocation17_spill] sm:$0xff] %v4319_v7  ;;  %v4324_v13 = vadd.f32 %v1597_v6, %v4210_v61 }
 0x17e   : > { %v1599_v14 = vpop.f32.mrf.mxu1  ;;  %v4327_v15 = vpop.f32.mrf.mxu0 }
 0x17f   : > { %5235 = vst [vmem:[#allocation18_spill] sm:$0xff] %v4327_v15  ;;  %v4330_v21 = vadd.f32 %v1599_v14, %v4205_v58  ;;  %v397_v14 = vld [vmem:[%s3956_s17 + $0x370] sm:$0xff] }
 0x180   : > { %v1601_v24 = vpop.f32.mrf.mxu1  ;;  %v4335_v26 = vpop.f32.mrf.mxu0  ;;  %v2306_v15 = vld [vmem:[%s5213_s3 + $0x98] sm:$0xff] }
 0x181   : > { %5236 = vst [vmem:[#allocation19_spill] sm:$0xff] %v4335_v26  ;;  %v4338_v27 = vadd.f32 %v1601_v24, %v4210_v61  ;;  %v406_v24 = vld [vmem:[%s3956_s17 + $0x3b8] sm:$0xff] }
 0x182   : > { %v1605_v29 = vpop.f32.mrf.mxu1  ;;  %2103 = vmatmul.mubr.bf16.gmra.mxu1 %v581_v18  ;;  %v4341_v31 = vpop.f32.mrf.mxu0  ;;  %v2313_v18 = vld [vmem:[%s5213_s3 + $0xd0] sm:$0xff] }
 0x183   : > { %5237 = vst [vmem:[#allocation20_spill] sm:$0xff] %v4341_v31  ;;  %v4344_v33 = vadd.f32 %v1605_v29, %v4205_v58  ;;  %2112 = vmatprep.mubr.bf16.mxu1 %v590_v22  ;;  %v414_v29 = vld [vmem:[%s3956_s17 + $0x3f8] sm:$0xff]  ;;  %2369 = vmatpush2.msra.mxu0 %v2313_v18  ;;  %v413_v18 = vld [vmem:[%s3956_s17 + $0x3f0] sm:$0xff] }
 0x184   : > { %v1607_v41 = vpop.f32.mrf.mxu1  ;;  %v4351_v42 = vpop.f32.mrf.mxu0  ;;  %2370 = vmatprep.subr.mxu0 %v5218_v56  ;;  %v606_v44 = vpack.c.bf16 %v414_v29, %v406_v24 }
 0x185   : > { %5238 = vst [vmem:[#allocation21_spill] sm:$0xff] %v4351_v42  ;;  %v4356_v46 = vadd.f32 %v1607_v41, %v4210_v61  ;;  %v597_v41 = vpack.c.bf16 %v397_v14, %v389_v11  ;;  %v405_v14 = vld [vmem:[%s3956_s17 + $0x3b0] sm:$0xff] }
 0x186   : > { %v1609_v47 = vpop.f32.mrf.mxu1  ;;  %v4359_v49 = vpop.f32.mrf.mxu0 }
 0x187   : > { %5239 = vst [vmem:[#allocation22_spill] sm:$0xff] %v4359_v49  ;;  %v4362_v53 = vadd.f32 %v1609_v47, %v4205_v58  ;;  %v2312_v47 = vld [vmem:[%s5213_s3 + $0xc8] sm:$0xff] }
 0x188   : > { %v1611_v60 = vpop.f32.mrf.mxu1  ;;  %v4367_v2 = vpop.f32.mrf.mxu0  ;;  %2371 = vmatpush2.msra.mxu0 %v2312_v47  ;;  %v430_v47 = vld [vmem:[%s3956_s17 + $0x478] sm:$0xff] }
 0x189   : > { %5240 = vst [vmem:[#allocation23_spill] sm:$0xff] %v4367_v2  ;;  %v4370_v3 = vadd.f32 %v1611_v60, %v4210_v61  ;;  %2372 = vmatprep.subr.mxu0 %v5218_v56 }
 0x18a   : > { %v1615_v4 = vpop.f32.mrf.mxu1  ;;  %2113 = vmatmul.mubr.bf16.gmra.mxu1 %v589_v51  ;;  %v4373_v6 = vpop.f32.mrf.mxu0 }
 0x18b   : > { %5241 = vst [vmem:[#allocation24_spill] sm:$0xff] %v4373_v6  ;;  %v4376_v9 = vadd.f32 %v1615_v4, %v4205_v58  ;;  %2122 = vmatprep.mubr.bf16.mxu1 %v598_v54 }
 0x18c   : > { %v1617_v22 = vpop.f32.mrf.mxu1  ;;  %v4383_v23 = vpop.f32.mrf.mxu0 }
 0x18d   : > { %5242 = vst [vmem:[#allocation25_spill] sm:$0xff] %v4383_v23  ;;  %v4388_v34 = vadd.f32 %v1617_v22, %v4210_v61  ;;  %v2311_v22 = vld [vmem:[%s5213_s3 + $0xc0] sm:$0xff] }
 0x18e   : > { %v1619_v35 = vpop.f32.mrf.mxu1  ;;  %v4391_v38 = vpop.f32.mrf.mxu0  ;;  %2373 = vmatpush2.msra.mxu0 %v2311_v22  ;;  %v446_v23 = vld [vmem:[%s3956_s17 + $0x4f8] sm:$0xff] }
 0x18f   : > { %5243 = vst [vmem:[#allocation26_spill] sm:$0xff] %v4391_v38  ;;  %v4394_v43 = vadd.f32 %v1619_v35, %v4205_v58  ;;  %v422_v35 = vld [vmem:[%s3956_s17 + $0x438] sm:$0xff]  ;;  %2374 = vmatprep.subr.mxu0 %v5218_v56 }
 0x190   : > { %v1621_v51 = vpop.f32.mrf.mxu1  ;;  %v4399_v54 = vpop.f32.mrf.mxu0 }
 0x191   : > { %5244 = vst [vmem:[#allocation27_spill] sm:$0xff] %v4399_v54  ;;  %v4402_v55 = vadd.f32 %v1621_v51, %v4210_v61  ;;  %v614_v54 = vpack.c.bf16 %v430_v47, %v422_v35  ;;  %v421_v47 = vld [vmem:[%s3956_s17 + $0x430] sm:$0xff] }
 0x192   : > { %v1625_v60 = vpop.f32.mrf.mxu1  ;;  %2123 = vmatmul.mubr.bf16.gmra.mxu1 %v597_v41  ;;  %v4405_v4 = vpop.f32.mrf.mxu0 }
 0x193   : > { %5245 = vst [vmem:[#allocation28_spill] sm:$0xff] %v4405_v4  ;;  %v4408_v11 = vadd.f32 %v1625_v60, %v4205_v58  ;;  %2132 = vmatprep.mubr.bf16.mxu1 %v606_v44  ;;  %v605_v60 = vpack.c.bf16 %v413_v18, %v405_v14 }
 0x194   : > { %v1627_v24 = vpop.f32.mrf.mxu1  ;;  %v4415_v29 = vpop.f32.mrf.mxu0 }
 0x195   : > { %5246 = vst [vmem:[#allocation29_spill] sm:$0xff] %v4415_v29  ;;  %v4420_v41 = vadd.f32 %v1627_v24, %v4210_v61  ;;  %v2310_v29 = vld [vmem:[%s5213_s3 + $0xb8] sm:$0xff] }
 0x196   : > { %v1629_v51 = vpop.f32.mrf.mxu1  ;;  %v4423_v44 = vpop.f32.mrf.mxu0  ;;  %2375 = vmatpush2.msra.mxu0 %v2310_v29 }
 0x197   : > { %5247 = vst [vmem:[#allocation30_spill] sm:$0xff] %v4423_v44  ;;  %v4426_v4 = vadd.f32 %v1629_v51, %v4205_v58  ;;  %v5249_v44 = vmov 0.0   ;;  %v429_v51 = vld [vmem:[%s3956_s17 + $0x470] sm:$0xff] }
 0x198   : > { %v1631_v22 = vpop.f32.mrf.mxu1  ;;  %v4431_v24 = vpop.f32.mrf.mxu0  ;;  %2376 = vmatprep.subr.mxu0 %v5249_v44 }
 0x199   : > { %5248 = vst [vmem:[#allocation31_spill] sm:$0xff] %v4431_v24  ;;  %v4434_v56 = vadd.f32 %v1631_v22, %v4210_v61  ;;  %v2309_v24 = vld [vmem:[%s5213_s3 + $0xb0] sm:$0xff]  ;;  %v438_v22 = vld [vmem:[%s3956_s17 + $0x4b8] sm:$0xff] }
 0x19a   : > { %v1635_v14 = vpop.f32.mrf.mxu1  ;;  %2133 = vmatmul.mubr.bf16.gmra.mxu1 %v605_v60  ;;  %v4437_v18 = vpop.f32.mrf.mxu0  ;;  %2377 = vmatpush2.msra.mxu0 %v2309_v24  ;;  %v622_v2 = vpack.c.bf16 %v446_v23, %v438_v22  ;;  %v2308_v24 = vld [vmem:[%s5213_s3 + $0xa8] sm:$0xff]  ;;  %v437_v23 = vld [vmem:[%s3956_s17 + $0x4b0] sm:$0xff] }
 0x19b   : > { %5250 = vst [vmem:[#allocation32_spill] sm:$0xff] %v4437_v18  ;;  %v4440_v35 = vadd.f32 %v1635_v14, %v4205_v58  ;;  %2142 = vmatprep.mubr.bf16.mxu1 %v614_v54  ;;  %2378 = vmatprep.subr.mxu0 %v5249_v44  ;;  %v613_v18 = vpack.c.bf16 %v429_v51, %v421_v47  ;;  %v445_v22 = vld [vmem:[%s3956_s17 + $0x4f0] sm:$0xff] }
 0x19c   : > { %v1637_v29 = vpop.f32.mrf.mxu1  ;;  %v4447_v38 = vpop.f32.mrf.mxu0  ;;  %2379 = vmatpush2.msra.mxu0 %v2308_v24  ;;  %v462_v24 = vld [vmem:[%s3956_s17 + $0x578] sm:$0xff] }
 0x19d   : > { %5251 = vst [vmem:[#allocation33_spill] sm:$0xff] %v4447_v38  ;;  %v4452_v60 = vadd.f32 %v1637_v29, %v4210_v61  ;;  %2380 = vmatprep.subr.mxu0 %v5249_v44 }
 0x19e   : > { %v1639_v14 = vpop.f32.mrf.mxu1  ;;  %v4455_v54 = vpop.f32.mrf.mxu0 }
 0x19f   : > { %5252 = vst [vmem:[#allocation34_spill] sm:$0xff] %v4455_v54  ;;  %v4458_v6 = vadd.f32 %v1639_v14, %v4205_v58 }
 0x1a0   : > { %v1641_v29 = vpop.f32.mrf.mxu1  ;;  %v4463_v38 = vpop.f32.mrf.mxu0 }
 0x1a1   : > { %5253 = vst [vmem:[#allocation35_spill] sm:$0xff] %v4463_v38  ;;  %v4466_v49 = vadd.f32 %v1641_v29, %v4210_v61  ;;  %v454_v38 = vld [vmem:[%s3956_s17 + $0x538] sm:$0xff] }
 0x1a2   : > { %v4469_v47 = vpop.f32.mrf.mxu1  ;;  %2143 = vmatmul.mubr.bf16.gmra.mxu1 %v613_v18  ;;  %v4471_v51 = vpop.f32.mrf.mxu0  ;;  %v2307_v29 = vld [vmem:[%s5213_s3 + $0xa0] sm:$0xff]  ;;  %v621_v18 = vpack.c.bf16 %v445_v22, %v437_v23  ;;  %v453_v23 = vld [vmem:[%s3956_s17 + $0x530] sm:$0xff] }
 0x1a3   : > { %2152 = vmatprep.mubr.bf16.mxu1 %v622_v2  ;;  %2381 = vmatpush2.msra.mxu0 %v2307_v29  ;;  %v630_v2 = vpack.c.bf16 %v462_v24, %v454_v38  ;;  %v461_v22 = vld [vmem:[%s3956_s17 + $0x570] sm:$0xff]  ;;  %v470_v29 = vld [vmem:[%s3956_s17 + $0x5b8] sm:$0xff] }
 0x1a4   : > { %v4475_v14 = vpop.f32.mrf.mxu1  ;;  %v4477_v54 = vpop.f32.mrf.mxu0  ;;  %2382 = vmatprep.subr.mxu0 %v5249_v44 }
 0x1a5   : > { %2383 = vmatpush2.msra.mxu0 %v2306_v15  ;;  %v629_v15 = vpack.c.bf16 %v461_v22, %v453_v23  ;;  %v469_v23 = vld [vmem:[%s3956_s17 + $0x5b0] sm:$0xff] }
 0x1a6   : > { %v4484_v42 = vpop.f32.mrf.mxu1  ;;  %v4489_v26 = vpop.f32.mrf.mxu0  ;;  %2384 = vmatprep.subr.mxu0 %v5249_v44  ;;  %v477_v22 = vld [vmem:[%s3956_s17 + $0x5f0] sm:$0xff] }
 0x1a7   : > { %2385 = vmatpush2.msra.mxu0 %v2305_v57 }
 0x1a8   : > { %v4487_v31 = vpop.f32.mrf.mxu1  ;;  %v4499_v38 = vpop.f32.mrf.mxu0  ;;  %2386 = vmatprep.subr.mxu0 %v5249_v44 }
 0x1a9   : > { %5255 = vst [vmem:[#allocation37_spill] sm:$0xff] %v4499_v38  ;;  %2387 = vmatpush2.msra.mxu0 %v2304_v39 }
 0x1aa   : > { %v4494_v7 = vpop.f32.mrf.mxu1  ;;  %2153 = vmatmul.mubr.bf16.gmra.mxu1 %v621_v18  ;;  %v638_v18 = vpack.c.bf16 %v478_v62, %v470_v29  ;;  %2388 = vmatprep.subr.mxu0 %v5249_v44  ;;  %v486_v29 = vld [vmem:[%s3956_s17 + $0x638] sm:$0xff] }
 0x1ab   : > { %5254 = vst [vmem:[#allocation36_spill] sm:$0xff] %v4494_v7  ;;  %2162 = vmatprep.mubr.bf16.mxu1 %v630_v2  ;;  %v4511_v2 = vpop.f32.mrf.mxu0 }
 0x1ac   : > { %v4501_v24 = vpop.f32.mrf.mxu1  ;;  %5258 = vst [vmem:[#allocation40_spill] sm:$0xff] %v4511_v2  ;;  %v493_v2 = vld [vmem:[%s3956_s17 + $0x670] sm:$0xff] }
 0x1ad   : > { %5256 = vst [vmem:[#allocation38_spill] sm:$0xff] %v4501_v24  ;;  %v4523_v57 = vpop.f32.mrf.mxu0 }
 0x1ae   : > { %v4508_v50 = vpop.f32.mrf.mxu1  ;;  %5261 = vst [vmem:[#allocation43_spill] sm:$0xff] %v4523_v57 }
 0x1af   : > { %5257 = vst [vmem:[#allocation39_spill] sm:$0xff] %v4508_v50  ;;  %v4534_v50 = vpop.f32.mrf.mxu0 }
 0x1b0   : > { %v4513_v45 = vpop.f32.mrf.mxu1  ;;  %5264 = vst [vmem:[#allocation46_spill] sm:$0xff] %v4534_v50 }
 0x1b1   : > { %5259 = vst [vmem:[#allocation41_spill] sm:$0xff] %v4513_v45  ;;  %v494_v45 = vld [vmem:[%s3956_s17 + $0x678] sm:$0xff]  ;;  %v4542_v38 = vpop.f32.mrf.mxu0 }
 0x1b2   : > { %v4518_v24 = vpop.f32.mrf.mxu1  ;;  %2163 = vmatmul.mubr.bf16.gmra.mxu1 %v629_v15  ;;  %v2303_v15 = vld [vmem:[%s5213_s3 + $0x80] sm:$0xff]  ;;  %5267 = vst [vmem:[#allocation49_spill] sm:$0xff] %v4542_v38  ;;  %v509_v38 = vld [vmem:[%s3956_s17 + $0x6f0] sm:$0xff] }
 0x1b3   : > { %5260 = vst [vmem:[#allocation42_spill] sm:$0xff] %v4518_v24  ;;  %2172 = vmatprep.mubr.bf16.mxu1 %v638_v18  ;;  %2389 = vmatpush2.msra.mxu0 %v2303_v15  ;;  %v637_v18 = vpack.c.bf16 %v477_v22, %v469_v23  ;;  %v646_v24 = vpack.c.bf16 %v494_v45, %v486_v29  ;;  %v502_v23 = vld [vmem:[%s3956_s17 + $0x6b8] sm:$0xff] }
 0x1b4   : > { %v4525_v62 = vpop.f32.mrf.mxu1  ;;  %v510_v45 = vld [vmem:[%s3956_s17 + $0x6f8] sm:$0xff] }
 0x1b5   : > { %5262 = vst [vmem:[#allocation44_spill] sm:$0xff] %v4525_v62  ;;  %v485_v62 = vld [vmem:[%s3956_s17 + $0x630] sm:$0xff] }
 0x1b6   : > { %v4532_v39 = vpop.f32.mrf.mxu1  ;;  %v645_v29 = vpack.c.bf16 %v493_v2, %v485_v62  ;;  %v518_v2 = vld [vmem:[%s3956_s17 + $0x738] sm:$0xff] }
 0x1b7   : > { %5263 = vst [vmem:[#allocation45_spill] sm:$0xff] %v4532_v39  ;;  %v4550_v39 = vpop.f32.mrf.mxu0  ;;  %v526_v62 = vld [vmem:[%s3956_s17 + $0x778] sm:$0xff] }
 0x1b8   : > { %v4536_v44 = vpop.f32.mrf.mxu1  ;;  %5270 = vst [vmem:[#allocation52_spill] sm:$0xff] %v4550_v39 }
 0x1b9   : > { %5265 = vst [vmem:[#allocation47_spill] sm:$0xff] %v4536_v44  ;;  %v654_v44 = vpack.c.bf16 %v510_v45, %v502_v23 }
 0x1ba   : > { %v4538_v57 = vpop.f32.mrf.mxu1  ;;  %2173 = vmatmul.mubr.bf16.gmra.mxu1 %v637_v18 }
 0x1bb   : > { %5266 = vst [vmem:[#allocation48_spill] sm:$0xff] %v4538_v57  ;;  %2182 = vmatprep.mubr.bf16.mxu1 %v646_v24  ;;  %v501_v57 = vld [vmem:[%s3956_s17 + $0x6b0] sm:$0xff] }
 0x1bc   : > { %v4544_v15 = vpop.f32.mrf.mxu1  ;;  %v653_v45 = vpack.c.bf16 %v509_v38, %v501_v57 }
 0x1bd   : > { %5268 = vst [vmem:[#allocation50_spill] sm:$0xff] %v4544_v15  ;;  %v4558_v15 = vpop.f32.mrf.mxu0 }
 0x1be   : > { %v4548_v22 = vpop.f32.mrf.mxu1  ;;  %5273 = vst [vmem:[#allocation55_spill] sm:$0xff] %v4558_v15  ;;  %v525_v15 = vld [vmem:[%s3956_s17 + $0x770] sm:$0xff] }
 0x1bf   : > { %5269 = vst [vmem:[#allocation51_spill] sm:$0xff] %v4548_v22  ;;  %v4566_v22 = vpop.f32.mrf.mxu0 }
 0x1c0   : > { %v4552_v18 = vpop.f32.mrf.mxu1  ;;  %5276 = vst [vmem:[#allocation58_spill] sm:$0xff] %v4566_v22 }
 0x1c1   : > { %5271 = vst [vmem:[#allocation53_spill] sm:$0xff] %v4552_v18  ;;  %v662_v18 = vpack.c.bf16 %v526_v62, %v518_v2 }
 0x1c2   : > { %v4554_v24 = vpop.f32.mrf.mxu1  ;;  %2183 = vmatmul.mubr.bf16.gmra.mxu1 %v645_v29 }
 0x1c3   : > { %5272 = vst [vmem:[#allocation54_spill] sm:$0xff] %v4554_v24  ;;  %2192 = vmatprep.mubr.bf16.mxu1 %v654_v44  ;;  %v517_v24 = vld [vmem:[%s3956_s17 + $0x730] sm:$0xff] }
 0x1c4   : > { %v4560_v50 = vpop.f32.mrf.mxu1  ;;  %v661_v57 = vpack.c.bf16 %v525_v15, %v517_v24 }
 0x1c5   : > { %5274 = vst [vmem:[#allocation56_spill] sm:$0xff] %v4560_v50  ;;  %v4574_v50 = vpop.f32.mrf.mxu0 }
 0x1c6   : > { %v4564_v23 = vpop.f32.mrf.mxu1  ;;  %5279 = vst [vmem:[#allocation61_spill] sm:$0xff] %v4574_v50 }
 0x1c7   : > { %5275 = vst [vmem:[#allocation57_spill] sm:$0xff] %v4564_v23  ;;  %v542_v23 = vld [vmem:[%s3956_s17 + $0x7f8] sm:$0xff]  ;;  %v4582_v62 = vpop.f32.mrf.mxu0 }
 0x1c8   : > { %v4568_v29 = vpop.f32.mrf.mxu1  ;;  %v670_v2 = vpack.c.bf16 %v542_v23, %v534_v36 }
 0x1c9   : > { %5277 = vst [vmem:[#allocation59_spill] sm:$0xff] %v4568_v29  ;;  %v4590_v22 = vpop.f32.mrf.mxu0 }
 0x1ca   : > { %v4570_v44 = vpop.f32.mrf.mxu1  ;;  %2193 = vmatmul.mubr.bf16.gmra.mxu1 %v653_v45 }
 0x1cb   : > { %5278 = vst [vmem:[#allocation60_spill] sm:$0xff] %v4570_v44  ;;  %2202 = vmatprep.mubr.bf16.mxu1 %v662_v18  ;;  %v533_v18 = vld [vmem:[%s3956_s17 + $0x7b0] sm:$0xff] }
 0x1cc   : > { %v4576_v39 = vpop.f32.mrf.mxu1  ;;  %v541_v44 = vld [vmem:[%s3956_s17 + $0x7f0] sm:$0xff]  ;;  %s2972_s17 = sshll.u32 %s3952_s12, 8  ;;  %s3103_s12 = sshll.u32 (%p5393_p0), %s3842_s4, 5 }
 0x1cd   : > { %5280 = vst [vmem:[#allocation62_spill] sm:$0xff] %v4576_v39  ;;  %v669_v7 = vpack.c.bf16 %v541_v44, %v533_v18  ;;  %s4971_s25 = scalar_lea.vmem [#allocation8], %s2972_s17   ;;  %s2592_s7 = ssub.s32 (%p5393_p0), 38, %s3103_s12 }
 0x1ce   : > { %v4580_v38 = vpop.f32.mrf.mxu1  ;;  %p2593_p9 = scmp.lt.s32.totalorder (%p5393_p0), %s2592_s7, 32 }
 0x1cf   : > { %5281 = vst [vmem:[#allocation63_spill] sm:$0xff] %v4580_v38  ;;  %v4596_v38 = vpop.f32.mrf.mxu0 }
 0x1d0   : > { %v4584_v29 = vpop.f32.mrf.mxu1 }
 0x1d1   : > { %5282 = vst [vmem:[#allocation64_spill] sm:$0xff] %v4584_v29  ;;  %v4602_v24 = vpop.f32.mrf.mxu0 }
 0x1d2   : > { %v4586_v45 = vpop.f32.mrf.mxu1  ;;  %2203 = vmatmul.mubr.bf16.gmra.mxu1 %v661_v57 }
 0x1d3   : > { %5283 = vst [vmem:[#allocation65_spill] sm:$0xff] %v4586_v45  ;;  %2212 = vmatprep.mubr.bf16.mxu1 %v670_v2  ;;  %v4608_v2 = vpop.f32.mrf.mxu0 }
 0x1d4   : > { %v4592_v50 = vpop.f32.mrf.mxu1 }
 0x1d5   : > { %5284 = vst [vmem:[#allocation66_spill] sm:$0xff] %v4592_v50  ;;  %v4615_v18 = vpop.f32.mrf.mxu0 }
 0x1d6   : > { %v4594_v39 = vpop.f32.mrf.mxu1 }
 0x1d7   : > { %5285 = vst [vmem:[#allocation67_spill] sm:$0xff] %v4594_v39 }
 0x1d8   : > { %v4598_v36 = vpop.f32.mrf.mxu1 }
 0x1d9   : > { %5286 = vst [vmem:[#allocation68_spill] sm:$0xff] %v4598_v36 }
 0x1da   : > { %v4600_v15 = vpop.f32.mrf.mxu1  ;;  %2213 = vmatmul.mubr.bf16.gmra.mxu1 %v669_v7 }
 0x1db   : > { %5287 = vst [vmem:[#allocation69_spill] sm:$0xff] %v4600_v15 }
 0x1dc   : > { %v4604_v23 = vpop.f32.mrf.mxu1 }
 0x1dd   : > { %5288 = vst [vmem:[#allocation70_spill] sm:$0xff] %v4604_v23  ;;  %v4623_v23 = vpop.f32.mrf.mxu0 }
 0x1de   : > { %v4606_v57 = vpop.f32.mrf.mxu1 }
 0x1df   : > { %5289 = vst [vmem:[#allocation71_spill] sm:$0xff] %v4606_v57 }
 0x1e0   : > { %v4610_v45 = vpop.f32.mrf.mxu1 }
 0x1e1   : > { %5290 = vst [vmem:[#allocation72_spill] sm:$0xff] %v4610_v45 }
 0x1e2   : > { %v1758_v50 = vpop.f32.mrf.mxu1 }
 0x1e3   : > { %v4613_v44 = vadd.f32 %v1758_v50, %v4216_v0  ;;  %v4631_v50 = vpop.f32.mrf.mxu0 }
 0x1e4   : > { %v1760_v36 = vpop.f32.mrf.mxu1 }
 0x1e5   : > { %5291 = vst [vmem:[#allocation73_spill] sm:$0xff] %v4613_v44  ;;  %v4618_v15 = vadd.f32 %v1760_v36, %v4228_v8 }
 0x1e6   : > { %v1762_v7 = vpop.f32.mrf.mxu1 }
 0x1e7   : > { %v4621_v39 = vadd.f32 %v1762_v7, %v4234_v12  ;;  %v4639_v7 = vpop.f32.mrf.mxu0 }
 0x1e8   : > { %v1764_v57 = vpop.f32.mrf.mxu1 }
 0x1e9   : > { %5292 = vst [vmem:[#allocation74_spill] sm:$0xff] %v4621_v39  ;;  %v4626_v29 = vadd.f32 %v1764_v57, %v4242_v17 }
 0x1ea   : > { %v1768_v45 = vpop.f32.mrf.mxu1 }
 0x1eb   : > { %v4629_v0 = vadd.f32 %v1768_v45, %v4248_v20  ;;  %v4647_v45 = vpop.f32.mrf.mxu0 }
 0x1ec   : > { %v1770_v44 = vpop.f32.mrf.mxu1 }
 0x1ed   : > { %5293 = vst [vmem:[#allocation75_spill] sm:$0xff] %v4629_v0  ;;  %v4634_v8 = vadd.f32 %v1770_v44, %v4260_v28 }
 0x1ee   : > { %v1772_v36 = vpop.f32.mrf.mxu1 }
 0x1ef   : > { %v4637_v12 = vadd.f32 %v1772_v36, %v4266_v32  ;;  %v4655_v36 = vpop.f32.mrf.mxu0 }
 0x1f0   : > { %v1774_v39 = vpop.f32.mrf.mxu1 }
 0x1f1   : > { %5294 = vst [vmem:[#allocation76_spill] sm:$0xff] %v4637_v12  ;;  %v4642_v17 = vadd.f32 %v1774_v39, %v4274_v37 }
 0x1f2   : > { %v1778_v57 = vpop.f32.mrf.mxu1 }
 0x1f3   : > { %v4645_v20 = vadd.f32 %v1778_v57, %v4280_v40  ;;  %v4663_v57 = vpop.f32.mrf.mxu0 }
 0x1f4   : > { %v1780_v0 = vpop.f32.mrf.mxu1 }
 0x1f5   : > { %5295 = vst [vmem:[#allocation77_spill] sm:$0xff] %v4645_v20  ;;  %v4650_v28 = vadd.f32 %v1780_v0, %v4292_v48 }
 0x1f6   : > { %v1782_v44 = vpop.f32.mrf.mxu1 }
 0x1f7   : > { %v4653_v32 = vadd.f32 %v1782_v44, %v4298_v52  ;;  %v4671_v44 = vpop.f32.mrf.mxu0 }
 0x1f8   : > { %v1784_v12 = vpop.f32.mrf.mxu1 }
 0x1f9   : > { %5296 = vst [vmem:[#allocation78_spill] sm:$0xff] %v4653_v32  ;;  %v4658_v37 = vadd.f32 %v1784_v12, %v4306_v59 }
 0x1fa   : > { %v1788_v39 = vpop.f32.mrf.mxu1 }
 0x1fb   : > { %v4661_v40 = vadd.f32 %v1788_v39, %v4312_v1  ;;  %v4679_v39 = vpop.f32.mrf.mxu0 }
 0x1fc   : > { %v1790_v20 = vpop.f32.mrf.mxu1 }
 0x1fd   : > { %5297 = vst [vmem:[#allocation79_spill] sm:$0xff] %v4661_v40  ;;  %v4666_v48 = vadd.f32 %v1790_v20, %v4324_v13 }
 0x1fe   : > { %v1792_v0 = vpop.f32.mrf.mxu1 }
 0x1ff   : > { %v4669_v52 = vadd.f32 %v1792_v0, %v4330_v21  ;;  %v4687_v0 = vpop.f32.mrf.mxu0 }
 0x200   : > { %v1794_v32 = vpop.f32.mrf.mxu1 }
 0x201   : > { %5298 = vst [vmem:[#allocation80_spill] sm:$0xff] %v4669_v52  ;;  %v4674_v59 = vadd.f32 %v1794_v32, %v4338_v27 }
 0x202   : > { %v1798_v12 = vpop.f32.mrf.mxu1 }
 0x203   : > { %v4677_v1 = vadd.f32 %v1798_v12, %v4344_v33  ;;  %v4695_v12 = vpop.f32.mrf.mxu0 }
 0x204   : > { %v1800_v40 = vpop.f32.mrf.mxu1 }
 0x205   : > { %5299 = vst [vmem:[#allocation81_spill] sm:$0xff] %v4677_v1  ;;  %v4682_v13 = vadd.f32 %v1800_v40, %v4356_v46 }
 0x206   : > { %v1802_v20 = vpop.f32.mrf.mxu1 }
 0x207   : > { %v4685_v21 = vadd.f32 %v1802_v20, %v4362_v53  ;;  %v4703_v20 = vpop.f32.mrf.mxu0 }
 0x208   : > { %v1804_v52 = vpop.f32.mrf.mxu1 }
 0x209   : > { %5300 = vst [vmem:[#allocation82_spill] sm:$0xff] %v4685_v21  ;;  %v4690_v27 = vadd.f32 %v1804_v52, %v4370_v3 }
 0x20a   : > { %v1808_v32 = vpop.f32.mrf.mxu1 }
 0x20b   : > { %v4693_v33 = vadd.f32 %v1808_v32, %v4376_v9  ;;  %v4711_v32 = vpop.f32.mrf.mxu0 }
 0x20c   : > { %v1810_v1 = vpop.f32.mrf.mxu1 }
 0x20d   : > { %5301 = vst [vmem:[#allocation83_spill] sm:$0xff] %v4693_v33  ;;  %v4698_v46 = vadd.f32 %v1810_v1, %v4388_v34 }
 0x20e   : > { %v1812_v40 = vpop.f32.mrf.mxu1 }
 0x20f   : > { %v4701_v53 = vadd.f32 %v1812_v40, %v4394_v43  ;;  %v4719_v40 = vpop.f32.mrf.mxu0 }
 0x210   : > { %v1814_v21 = vpop.f32.mrf.mxu1 }
 0x211   : > { %5302 = vst [vmem:[#allocation84_spill] sm:$0xff] %v4701_v53  ;;  %v4706_v3 = vadd.f32 %v1814_v21, %v4402_v55 }
 0x212   : > { %v1818_v52 = vpop.f32.mrf.mxu1 }
 0x213   : > { %v4709_v9 = vadd.f32 %v1818_v52, %v4408_v11  ;;  %v1486_v11 = vadd.f32 %v4213_v63, %v4205_v58  ;;  %v1488_v52 = vadd.f32 %v4223_v5, %v4210_v61  ;;  %v1492_v63 = vadd.f32 %v4239_v16, %v4210_v61 }
 0x214   : > { %v1820_v33 = vpop.f32.mrf.mxu1  ;;  %v1498_v16 = vadd.f32 %v4255_v25, %v4210_v61 }
 0x215   : > { %5303 = vst [vmem:[#allocation85_spill] sm:$0xff] %v4709_v9  ;;  %v4714_v34 = vadd.f32 %v1820_v33, %v4420_v41  ;;  %v4731_v33 = vpop.f32.mrf.mxu0  ;;  %v1681_v5 = vadd.f32 %v4475_v14, %v1488_v52  ;;  %v1685_v14 = vadd.f32 %v4487_v31, %v1492_v63 }
 0x216   : > { %v1822_v1 = vpop.f32.mrf.mxu1 }
 0x217   : > { %5304 = vst [vmem:[#allocation86_spill] sm:$0xff] %v4714_v34  ;;  %v4717_v43 = vadd.f32 %v1822_v1, %v4426_v4 }
 0x218   : > { %v1824_v53 = vpop.f32.mrf.mxu1 }
 0x219   : > { %5305 = vst [vmem:[#allocation87_spill] sm:$0xff] %v4717_v43  ;;  %v4722_v55 = vadd.f32 %v1824_v53, %v4434_v56  ;;  %v1490_v56 = vadd.f32 %v4231_v10, %v4205_v58  ;;  %v1679_v53 = vadd.f32 %v4469_v47, %v1486_v11  ;;  %v1496_v10 = vadd.f32 %v4245_v19, %v4205_v58 }
 0x21a   : > { %v1828_v21 = vpop.f32.mrf.mxu1  ;;  %v1500_v19 = vadd.f32 %v4263_v30, %v4205_v58  ;;  %v5315_v30 = vld [vmem:[#allocation12_spill] sm:$0xff] }
 0x21b   : > { %5306 = vst [vmem:[#allocation88_spill] sm:$0xff] %v4722_v55  ;;  %v4729_v41 = vadd.f32 %v1828_v21, %v4440_v35  ;;  %v4745_v21 = vpop.f32.mrf.mxu0  ;;  %v1872_v47 = vadd.f32 %v4471_v51, %v1679_v53  ;;  %v1683_v11 = vadd.f32 %v4484_v42, %v1490_v56  ;;  %v5311_v53 = vld [vmem:[#allocation36_spill] sm:$0xff] }
 0x21c   : > { %v1830_v4 = vpop.f32.mrf.mxu1  ;;  %v1689_v42 = vadd.f32 %v5311_v53, %v1496_v10 }
 0x21d   : > { %5307 = vst [vmem:[#allocation89_spill] sm:$0xff] %v4729_v41  ;;  %v4734_v1 = vadd.f32 %v1830_v4, %v4452_v60  ;;  %v1876_v51 = vadd.f32 %v4489_v26, %v1683_v11  ;;  %v1506_v26 = vadd.f32 %v5315_v30, %v4205_v58  ;;  %v5316_v11 = vld [vmem:[#allocation40_spill] sm:$0xff]  ;;  %v5322_v30 = vld [vmem:[#allocation46_spill] sm:$0xff] }
 0x21e   : > { %v1832_v55 = vpop.f32.mrf.mxu1  ;;  %v1882_v10 = vadd.f32 %v5316_v11, %v1689_v42  ;;  %v5323_v11 = vld [vmem:[#allocation42_spill] sm:$0xff] }
 0x21f   : > { %5308 = vst [vmem:[#allocation90_spill] sm:$0xff] %v4734_v1  ;;  %v4743_v35 = vadd.f32 %v1832_v55, %v4458_v6  ;;  %v1874_v6 = vadd.f32 %v4477_v54, %v1681_v5  ;;  %v4758_v55 = vpop.f32.mrf.mxu0  ;;  %v5314_v5 = vld [vmem:[#allocation38_spill] sm:$0xff] }
 0x220   : > { %v1834_v41 = vpop.f32.mrf.mxu1  ;;  %v1691_v31 = vadd.f32 %v5314_v5, %v1498_v16 }
 0x221   : > { %5309 = vst [vmem:[#allocation91_spill] sm:$0xff] %v4743_v35  ;;  %v4748_v60 = vadd.f32 %v1834_v41, %v4466_v49  ;;  %v5313_v35 = vld [vmem:[#allocation37_spill] sm:$0xff]  ;;  %v4768_v63 = vpop.f32.mrf.mxu0 }
 0x222   : > { %v2064_v4 = vpop.f32.mrf.mxu1  ;;  %v1878_v54 = vadd.f32 %v5313_v35, %v1685_v14  ;;  %v5319_v14 = vld [vmem:[#allocation43_spill] sm:$0xff] }
 0x223   : > { %5310 = vst [vmem:[#allocation92_spill] sm:$0xff] %v4748_v60  ;;  %v2065_v52 = vadd.f32 %v2064_v4, %v1872_v47  ;;  %v5312_v60 = vld [vmem:[#allocation11_spill] sm:$0xff]  ;;  %v1884_v16 = vadd.f32 %v5319_v14, %v1691_v31  ;;  %v5325_v14 = vld [vmem:[#allocation49_spill] sm:$0xff] }
 0x224   : > { %v2066_v49 = vpop.f32.mrf.mxu1  ;;  %v1502_v25 = vadd.f32 %v5312_v60, %v4210_v61  ;;  %v5318_v60 = vld [vmem:[#allocation13_spill] sm:$0xff] }
 0x225   : > { %v2067_v41 = vadd.f32 %v2066_v49, %v1874_v6  ;;  %v5317_v49 = vld [vmem:[#allocation39_spill] sm:$0xff]  ;;  %v1508_v35 = vadd.f32 %v5318_v60, %v4210_v61 }
 0x226   : > { %v2068_v56 = vpop.f32.mrf.mxu1  ;;  %v1693_v53 = vadd.f32 %v5317_v49, %v1500_v19  ;;  %v1699_v49 = vadd.f32 %v5323_v11, %v1506_v26  ;;  %v5324_v60 = vld [vmem:[#allocation15_spill] sm:$0xff] }
 0x227   : > { %3472 = vtanh.f32 %v2067_v41  ;;  %v2069_v47 = vadd.f32 %v2068_v56, %v1876_v51  ;;  %v5320_v41 = vld [vmem:[#allocation41_spill] sm:$0xff]  ;;  %v1512_v31 = vadd.f32 %v5324_v60, %v4210_v61 }
 0x228   : > { %3474 = vtanh.f32 %v2065_v52  ;;  %v2070_v4 = vpop.f32.mrf.mxu1  ;;  %v1695_v5 = vadd.f32 %v5320_v41, %v1502_v25  ;;  %v4778_v52 = vpop.f32.mrf.mxu0  ;;  %v1886_v19 = vadd.f32 %v5322_v30, %v1693_v53  ;;  %v5329_v30 = vld [vmem:[#allocation45_spill] sm:$0xff] }
 0x229   : > { %v2071_v6 = vadd.f32 %v2070_v4, %v1878_v54  ;;  %v5321_v4 = vld [vmem:[#allocation14_spill] sm:$0xff]  ;;  %v5330_v60 = vld [vmem:[#allocation17_spill] sm:$0xff] }
 0x22a   : > { %v2074_v1 = vpop.f32.mrf.mxu1  ;;  %v1510_v42 = vadd.f32 %v5321_v4, %v4205_v58  ;;  %v1888_v25 = vadd.f32 %v5325_v14, %v1695_v5  ;;  %v5328_v4 = vld [vmem:[#allocation52_spill] sm:$0xff]  ;;  %v1518_v5 = vadd.f32 %v5330_v60, %v4210_v61  ;;  %v5331_v14 = vld [vmem:[#allocation55_spill] sm:$0xff] }
 0x22b   : > { %3476 = vtanh.f32 %v2071_v6  ;;  %v2075_v51 = vadd.f32 %v2074_v1, %v1882_v10  ;;  %v5326_v6 = vld [vmem:[#allocation44_spill] sm:$0xff]  ;;  %v1892_v26 = vadd.f32 %v5328_v4, %v1699_v49  ;;  %v5334_v4 = vld [vmem:[#allocation58_spill] sm:$0xff] }
 0x22c   : > { %3478 = vtanh.f32 %v2069_v47  ;;  %v2076_v56 = vpop.f32.mrf.mxu1  ;;  %v1701_v41 = vadd.f32 %v5326_v6, %v1508_v35  ;;  %v4788_v47 = vpop.f32.mrf.mxu0  ;;  %v1703_v11 = vadd.f32 %v5329_v30, %v1510_v42  ;;  %v5333_v42 = vld [vmem:[#allocation18_spill] sm:$0xff]  ;;  %v5335_v60 = vld [vmem:[#allocation48_spill] sm:$0xff] }
 0x22d   : > { %v2077_v54 = vadd.f32 %v2076_v56, %v1884_v16  ;;  %v5327_v56 = vld [vmem:[#allocation16_spill] sm:$0xff]  ;;  %v1520_v49 = vadd.f32 %v5333_v42, %v4205_v58 }
 0x22e   : > { %v2078_v43 = vpop.f32.mrf.mxu1  ;;  %v1516_v53 = vadd.f32 %v5327_v56, %v4205_v58  ;;  %v1894_v35 = vadd.f32 %v5331_v14, %v1701_v41  ;;  %v1896_v30 = vadd.f32 %v5334_v4, %v1703_v11  ;;  %v5337_v14 = vld [vmem:[#allocation61_spill] sm:$0xff] }
 0x22f   : > { %3480 = vtanh.f32 %v2077_v54  ;;  %v2079_v1 = vadd.f32 %v2078_v43, %v1886_v19  ;;  %v5332_v54 = vld [vmem:[#allocation47_spill] sm:$0xff]  ;;  %v4798_v43 = vpop.f32.mrf.mxu0 }
 0x230   : > { %3482 = vtanh.f32 %v2075_v51  ;;  %v2080_v10 = vpop.f32.mrf.mxu1  ;;  %v1705_v6 = vadd.f32 %v5332_v54, %v1512_v31  ;;  %v1709_v9 = vadd.f32 %v5335_v60, %v1516_v53  ;;  %v5336_v31 = vld [vmem:[#allocation19_spill] sm:$0xff]  ;;  %v5339_v53 = vld [vmem:[#allocation20_spill] sm:$0xff] }
 0x231   : > { %v2081_v16 = vadd.f32 %v2080_v10, %v1888_v25  ;;  %v5340_v60 = vld [vmem:[#allocation51_spill] sm:$0xff] }
 0x232   : > { %v2084_v34 = vpop.f32.mrf.mxu1  ;;  %v1898_v54 = vadd.f32 %v5337_v14, %v1705_v6  ;;  %v1902_v4 = vadd.f32 %v4582_v62, %v1709_v9  ;;  %v5343_v9 = vld [vmem:[#allocation22_spill] sm:$0xff] }
 0x233   : > { %3484 = vtanh.f32 %v2081_v16  ;;  %v2085_v19 = vadd.f32 %v2084_v34, %v1892_v26  ;;  %v1522_v16 = vadd.f32 %v5336_v31, %v4210_v61  ;;  %v1713_v31 = vadd.f32 %v5340_v60, %v1520_v49 }
 0x234   : > { %v3473_v51 = vpop.eup %3472  ;;  %3486 = vtanh.f32 %v2079_v1  ;;  %v2086_v25 = vpop.f32.mrf.mxu1  ;;  %v5338_v1 = vld [vmem:[#allocation50_spill] sm:$0xff]  ;;  %v1530_v49 = vadd.f32 %v5343_v9, %v4205_v58 }
 0x235   : > { %v3475_v10 = vpop.eup %3474  ;;  %v2087_v56 = vadd.f32 %v2086_v25, %v1894_v35  ;;  %2390 = vmatprep.mubr.f32.mxu0 %v3473_v51  ;;  %v1711_v34 = vadd.f32 %v5338_v1, %v1518_v5  ;;  %v4808_v35 = vpop.f32.mrf.mxu0  ;;  %v5341_v5 = vld [vmem:[#allocation21_spill] sm:$0xff] }
 0x236   : > { %v2088_v41 = vpop.f32.mrf.mxu1  ;;  %2391 = vmatmul.mubr.f32.vlgmr.msra.gmra.mxu0 %v3475_v10  ;;  %v1526_v10 = vadd.f32 %v5339_v53, %v4205_v58  ;;  %v5344_v53 = vld [vmem:[#allocation54_spill] sm:$0xff] }
 0x237   : > { %3488 = vtanh.f32 %v2087_v56  ;;  %v2089_v51 = vadd.f32 %v2088_v41, %v1896_v30  ;;  %v1528_v56 = vadd.f32 %v5341_v5, %v4210_v61  ;;  %v1904_v14 = vadd.f32 %v4590_v22, %v1711_v34 }
 0x238   : > { %v3477_v26 = vpop.eup %3476  ;;  %3490 = vtanh.f32 %v2085_v19  ;;  %v2090_v25 = vpop.f32.mrf.mxu1  ;;  %v5342_v19 = vld [vmem:[#allocation53_spill] sm:$0xff]  ;;  %v1719_v60 = vadd.f32 %v5344_v53, %v1526_v10  ;;  %v5347_v10 = vld [vmem:[#allocation24_spill] sm:$0xff] }
 0x239   : > { %v3479_v42 = vpop.eup %3478  ;;  %v2091_v11 = vadd.f32 %v2090_v25, %v1898_v54  ;;  %2395 = vmatprep.mubr.f32.mxu0 %v3477_v26  ;;  %v1715_v30 = vadd.f32 %v5342_v19, %v1522_v16  ;;  %v4818_v54 = vpop.f32.mrf.mxu0  ;;  %v5345_v16 = vld [vmem:[#allocation23_spill] sm:$0xff] }
 0x23a   : > { %v2094_v6 = vpop.f32.mrf.mxu1  ;;  %2396 = vmatmul.mubr.f32.gmra.mxu0 %v3479_v42  ;;  %v1906_v42 = vadd.f32 %v4596_v38, %v1713_v31  ;;  %v1532_v34 = vadd.f32 %v5345_v16, %v4210_v61  ;;  %v1536_v31 = vadd.f32 %v5347_v10, %v4205_v58 }
 0x23b   : > { %3492 = vtanh.f32 %v2091_v11  ;;  %v2095_v1 = vadd.f32 %v2094_v6, %v1902_v4  ;;  %v1908_v11 = vadd.f32 %v4602_v24, %v1715_v30  ;;  %v4828_v5 = vpop.f32.mrf.mxu0 }
 0x23c   : > { %v3481_v41 = vpop.eup %3480  ;;  %3494 = vtanh.f32 %v2089_v51  ;;  %v2096_v26 = vpop.f32.mrf.mxu1  ;;  %v5346_v51 = vld [vmem:[#allocation56_spill] sm:$0xff] }
 0x23d   : > { %v3483_v25 = vpop.eup %3482  ;;  %v2097_v62 = vadd.f32 %v2096_v26, %v1904_v14  ;;  %2400 = vmatprep.mubr.f32.mxu0 %v3481_v41  ;;  %v1721_v4 = vadd.f32 %v5346_v51, %v1528_v56  ;;  %v1912_v26 = vadd.f32 %v4608_v2, %v1719_v60  ;;  %v5349_v56 = vld [vmem:[#allocation25_spill] sm:$0xff] }
 0x23e   : > { %v2098_v22 = vpop.f32.mrf.mxu1  ;;  %2401 = vmatmul.mubr.f32.gmra.mxu0 %v3483_v25  ;;  %v5348_v25 = vld [vmem:[#allocation57_spill] sm:$0xff]  ;;  %v1538_v30 = vadd.f32 %v5349_v56, %v4210_v61 }
 0x23f   : > { %3496 = vtanh.f32 %v2097_v62  ;;  %v2099_v14 = vadd.f32 %v2098_v22, %v1906_v42  ;;  %v1723_v9 = vadd.f32 %v5348_v25, %v1530_v49  ;;  %v1914_v62 = vadd.f32 %v4615_v18, %v1721_v4  ;;  %v4838_v22 = vpop.f32.mrf.mxu0  ;;  %v5351_v49 = vld [vmem:[#allocation26_spill] sm:$0xff] }
 0x240   : > { %v3485_v6 = vpop.eup %3484  ;;  %3498 = vtanh.f32 %v2095_v1  ;;  %v2100_v19 = vpop.f32.mrf.mxu1  ;;  %v5350_v1 = vld [vmem:[#allocation59_spill] sm:$0xff]  ;;  %v1540_v60 = vadd.f32 %v5351_v49, %v4205_v58 }
 0x241   : > { %v3487_v41 = vpop.eup %3486  ;;  %v2101_v38 = vadd.f32 %v2100_v19, %v1908_v11  ;;  %2405 = vmatprep.mubr.f32.mxu0 %v3485_v6  ;;  %v1725_v42 = vadd.f32 %v5350_v1, %v1532_v34  ;;  %v1916_v6 = vadd.f32 %v4623_v23, %v1723_v9  ;;  %v5352_v19 = vld [vmem:[#allocation60_spill] sm:$0xff]  ;;  %v5353_v34 = vld [vmem:[#allocation27_spill] sm:$0xff]  ;;  %v4848_v25 = vpop.f32.mrf.mxu0 }
 0x242   : > { %v2104_v24 = vpop.f32.mrf.mxu1  ;;  %2406 = vmatmul.mubr.f32.gmra.mxu0 %v3487_v41  ;;  %v1729_v41 = vadd.f32 %v5352_v19, %v1536_v31  ;;  %v1542_v4 = vadd.f32 %v5353_v34, %v4210_v61  ;;  %v5355_v31 = vld [vmem:[#allocation28_spill] sm:$0xff] }
 0x243   : > { %3500 = vtanh.f32 %v2101_v38  ;;  %v2105_v16 = vadd.f32 %v2104_v24, %v1912_v26  ;;  %v1918_v38 = vadd.f32 %v4631_v50, %v1725_v42  ;;  %v1546_v9 = vadd.f32 %v5355_v31, %v4205_v58 }
 0x244   : > { %v3489_v53 = vpop.eup %3488  ;;  %3502 = vtanh.f32 %v2099_v14  ;;  %v2106_v11 = vpop.f32.mrf.mxu1  ;;  %v5354_v14 = vld [vmem:[#allocation62_spill] sm:$0xff]  ;;  %v1922_v1 = vadd.f32 %v4639_v7, %v1729_v41 }
 0x245   : > { %v3491_v51 = vpop.eup %3490  ;;  %v2107_v2 = vadd.f32 %v2106_v11, %v1914_v62  ;;  %2410 = vmatprep.mubr.f32.mxu0 %v3489_v53  ;;  %v1731_v10 = vadd.f32 %v5354_v14, %v1538_v30  ;;  %v5356_v53 = vld [vmem:[#allocation63_spill] sm:$0xff]  ;;  %v5357_v30 = vld [vmem:[#allocation29_spill] sm:$0xff] }
 0x246   : > { %v2108_v18 = vpop.f32.mrf.mxu1  ;;  %2411 = vmatmul.mubr.f32.gmra.mxu0 %v3491_v51  ;;  %v1733_v11 = vadd.f32 %v5356_v53, %v1540_v60  ;;  %v1548_v42 = vadd.f32 %v5357_v30, %v4210_v61  ;;  %v5359_v60 = vld [vmem:[#allocation30_spill] sm:$0xff]  ;;  %v5360_v14 = vld [vmem:[#allocation65_spill] sm:$0xff] }
 0x247   : > { %3504 = vtanh.f32 %v2107_v2  ;;  %v2109_v24 = vadd.f32 %v2108_v18, %v1916_v6  ;;  %v1924_v51 = vadd.f32 %v4647_v45, %v1731_v10  ;;  %v4858_v6 = vpop.f32.mrf.mxu0  ;;  %v1550_v41 = vadd.f32 %v5359_v60, %v4205_v58 }
 0x248   : > { %v3493_v26 = vpop.eup %3492  ;;  %3506 = vtanh.f32 %v2105_v16  ;;  %v2110_v56 = vpop.f32.mrf.mxu1  ;;  %v5358_v16 = vld [vmem:[#allocation64_spill] sm:$0xff] }
 0x249   : > { %v3495_v62 = vpop.eup %3494  ;;  %v2111_v23 = vadd.f32 %v2110_v56, %v1918_v38  ;;  %2415 = vmatprep.mubr.f32.mxu0 %v3493_v26  ;;  %v1735_v2 = vadd.f32 %v5358_v16, %v1542_v4  ;;  %v1926_v38 = vadd.f32 %v4655_v36, %v1733_v11  ;;  %v1739_v26 = vadd.f32 %v5360_v14, %v1546_v9  ;;  %v5361_v4 = vld [vmem:[#allocation31_spill] sm:$0xff]  ;;  %v4868_v31 = vpop.f32.mrf.mxu0  ;;  %v5363_v9 = vld [vmem:[#allocation32_spill] sm:$0xff] }
 0x24a   : > { %v2114_v50 = vpop.f32.mrf.mxu1  ;;  %2416 = vmatmul.mubr.f32.gmra.mxu0 %v3495_v62  ;;  %v1552_v10 = vadd.f32 %v5361_v4, %v4210_v61  ;;  %v1556_v11 = vadd.f32 %v5363_v9, %v4205_v58  ;;  %v5368_v4 = vld [vmem:[#allocation69_spill] sm:$0xff] }
 0x24b   : > { %3508 = vtanh.f32 %v2111_v23  ;;  %v2115_v19 = vadd.f32 %v2114_v50, %v1922_v1  ;;  %v1928_v56 = vadd.f32 %v4663_v57, %v1735_v2  ;;  %v1932_v30 = vadd.f32 %v4671_v44, %v1739_v26 }
 0x24c   : > { %v3497_v49 = vpop.eup %3496  ;;  %3510 = vtanh.f32 %v2109_v24  ;;  %v2116_v18 = vpop.f32.mrf.mxu1  ;;  %v5362_v24 = vld [vmem:[#allocation66_spill] sm:$0xff] }
 0x24d   : > { %v3499_v34 = vpop.eup %3498  ;;  %v2117_v7 = vadd.f32 %v2116_v18, %v1924_v51  ;;  %2420 = vmatprep.mubr.f32.mxu0 %v3497_v49  ;;  %v1741_v62 = vadd.f32 %v5362_v24, %v1548_v42  ;;  %v5364_v51 = vld [vmem:[#allocation67_spill] sm:$0xff]  ;;  %v5365_v42 = vld [vmem:[#allocation33_spill] sm:$0xff] }
 0x24e   : > { %v2118_v45 = vpop.f32.mrf.mxu1  ;;  %2421 = vmatmul.mubr.f32.gmra.mxu0 %v3499_v34  ;;  %v1743_v16 = vadd.f32 %v5364_v51, %v1550_v41  ;;  %v1558_v2 = vadd.f32 %v5365_v42, %v4210_v61  ;;  %v5367_v41 = vld [vmem:[#allocation34_spill] sm:$0xff] }
 0x24f   : > { %3512 = vtanh.f32 %v2117_v7  ;;  %v2119_v1 = vadd.f32 %v2118_v45, %v1926_v38  ;;  %v1934_v49 = vadd.f32 %v4679_v39, %v1741_v62  ;;  %v4878_v7 = vpop.f32.mrf.mxu0  ;;  %v1560_v26 = vadd.f32 %v5367_v41, %v4205_v58 }
 0x250   : > { %v3501_v23 = vpop.eup %3500  ;;  %3514 = vtanh.f32 %v2115_v19  ;;  %v2120_v53 = vpop.f32.mrf.mxu1  ;;  %v5366_v19 = vld [vmem:[#allocation68_spill] sm:$0xff]  ;;  %v1936_v45 = vadd.f32 %v4687_v0, %v1743_v16 }
 0x251   : > { %v3503_v50 = vpop.eup %3502  ;;  %v2121_v36 = vadd.f32 %v2120_v53, %v1928_v56  ;;  %2425 = vmatprep.mubr.f32.mxu0 %v3501_v23  ;;  %v1745_v18 = vadd.f32 %v5366_v19, %v1552_v10  ;;  %v1749_v56 = vadd.f32 %v5368_v4, %v1556_v11  ;;  %v5369_v10 = vld [vmem:[#allocation35_spill] sm:$0xff]  ;;  %v5370_v23 = vld [vmem:[#allocation70_spill] sm:$0xff]  ;;  %v5373_v4 = vld [vmem:[#allocation73_spill] sm:$0xff] }
 0x252   : > { %v2124_v57 = vpop.f32.mrf.mxu1  ;;  %2426 = vmatmul.mubr.f32.gmra.mxu0 %v3503_v50  ;;  %v1562_v24 = vadd.f32 %v5369_v10, %v4210_v61  ;;  %v4888_v50 = vpop.f32.mrf.mxu0 }
 0x253   : > { %3516 = vtanh.f32 %v2121_v36  ;;  %v2125_v60 = vadd.f32 %v2124_v57, %v1932_v30  ;;  %v1938_v62 = vadd.f32 %v4695_v12, %v1745_v18  ;;  %v1942_v11 = vadd.f32 %v4703_v20, %v1749_v56  ;;  %v5371_v30 = vld [vmem:[#allocation71_spill] sm:$0xff]  ;;  %v5372_v12 = vld [vmem:[#allocation72_spill] sm:$0xff] }
 0x254   : > { %v3505_v34 = vpop.eup %3504  ;;  %3518 = vtanh.f32 %v2119_v1  ;;  %v2126_v38 = vpop.f32.mrf.mxu1  ;;  %v1751_v1 = vadd.f32 %v5370_v23, %v1558_v2  ;;  %v1753_v51 = vadd.f32 %v5371_v30, %v1560_v26  ;;  %v1755_v57 = vadd.f32 %v5372_v12, %v1562_v24 }
 0x255   : > { %v3507_v14 = vpop.eup %3506  ;;  %v2127_v44 = vadd.f32 %v2126_v38, %v1934_v49  ;;  %2430 = vmatprep.mubr.f32.mxu0 %v3505_v34  ;;  %v4894_v2 = vpop.f32.mrf.mxu0  ;;  %v1952_v56 = vadd.f32 %v4745_v21, %v5373_v4  ;;  %v1958_v21 = vadd.f32 %v4778_v52, %v4626_v29 }
 0x256   : > { %v2128_v39 = vpop.f32.mrf.mxu1  ;;  %2431 = vmatmul.mubr.f32.gmra.mxu0 %v3507_v14  ;;  %v1944_v61 = vadd.f32 %v4711_v32, %v1751_v1  ;;  %v1946_v20 = vadd.f32 %v4719_v40, %v1753_v51  ;;  %v1948_v38 = vadd.f32 %v4731_v33, %v1755_v57  ;;  %v1954_v40 = vadd.f32 %v4758_v55, %v4618_v15  ;;  %v5375_v51 = vld [vmem:[#allocation75_spill] sm:$0xff] }
 0x257   : > { %3520 = vtanh.f32 %v2127_v44  ;;  %v2129_v36 = vadd.f32 %v2128_v39, %v1936_v45  ;;  %v4898_v14 = vpop.f32.mrf.mxu0 }
 0x258   : > { %v3509_v53 = vpop.eup %3508  ;;  %3522 = vtanh.f32 %v2125_v60  ;;  %v2130_v58 = vpop.f32.mrf.mxu1 }
 0x259   : > { %v3511_v9 = vpop.eup %3510  ;;  %v2131_v0 = vadd.f32 %v2130_v58, %v1938_v62  ;;  %2435 = vmatprep.mubr.f32.mxu0 %v3509_v53  ;;  %v4904_v10 = vpop.f32.mrf.mxu0  ;;  %v5374_v53 = vld [vmem:[#allocation74_spill] sm:$0xff] }
 0x25a   : > { %v2134_v16 = vpop.f32.mrf.mxu1  ;;  %2436 = vmatmul.mubr.f32.gmra.mxu0 %v3511_v9 }
 0x25b   : > { %3524 = vtanh.f32 %v2131_v0  ;;  %v2135_v49 = vadd.f32 %v2134_v16, %v1942_v11  ;;  %v4910_v55 = vpop.f32.mrf.mxu0  ;;  %v1962_v16 = vadd.f32 %v4788_v47, %v5375_v51  ;;  %v1968_v47 = vadd.f32 %v4818_v54, %v4642_v17 }
 0x25c   : > { %v3513_v42 = vpop.eup %3512  ;;  %3526 = vtanh.f32 %v2129_v36  ;;  %v2136_v19 = vpop.f32.mrf.mxu1  ;;  %v1956_v36 = vadd.f32 %v4768_v63, %v5374_v53  ;;  %v1964_v63 = vadd.f32 %v4798_v43, %v4634_v8 }
 0x25d   : > { %v3515_v18 = vpop.eup %3514  ;;  %v2137_v34 = vadd.f32 %v2136_v19, %v1944_v61  ;;  %2440 = vmatprep.mubr.f32.mxu0 %v3513_v42  ;;  %v4916_v52 = vpop.f32.mrf.mxu0  ;;  %v5376_v19 = vld [vmem:[#allocation76_spill] sm:$0xff] }
 0x25e   : > { %v2138_v60 = vpop.f32.mrf.mxu1  ;;  %2441 = vmatmul.mubr.f32.gmra.mxu0 %v3515_v18  ;;  %v1966_v18 = vadd.f32 %v4808_v35, %v5376_v19  ;;  %v1974_v35 = vadd.f32 %v4838_v22, %v4650_v28 }
 0x25f   : > { %3528 = vtanh.f32 %v2137_v34  ;;  %v2139_v44 = vadd.f32 %v2138_v60, %v1946_v20  ;;  %v4922_v43 = vpop.f32.mrf.mxu0 }
 0x260   : > { %v3517_v32 = vpop.eup %3516  ;;  %3530 = vtanh.f32 %v2135_v49  ;;  %v2140_v41 = vpop.f32.mrf.mxu1 }
 0x261   : > { %v3519_v26 = vpop.eup %3518  ;;  %v2141_v45 = vadd.f32 %v2140_v41, %v1948_v38  ;;  %2445 = vmatprep.mubr.f32.mxu0 %v3517_v32  ;;  %v4928_v54 = vpop.f32.mrf.mxu0 }
 0x262   : > { %v2144_v39 = vpop.f32.mrf.mxu1  ;;  %2446 = vmatmul.mubr.f32.gmra.mxu0 %v3519_v26 }
 0x263   : > { %3532 = vtanh.f32 %v2141_v45  ;;  %v2145_v24 = vadd.f32 %v2144_v39, %v1952_v56  ;;  %v4934_v22 = vpop.f32.mrf.mxu0 }
 0x264   : > { %v3521_v33 = vpop.eup %3520  ;;  %3534 = vtanh.f32 %v2139_v44  ;;  %v2146_v62 = vpop.f32.mrf.mxu1  ;;  %v5377_v44 = vld [vmem:[#allocation77_spill] sm:$0xff] }
 0x265   : > { %v3523_v23 = vpop.eup %3522  ;;  %v2147_v1 = vadd.f32 %v2146_v62, %v1954_v40  ;;  %2450 = vmatprep.mubr.f32.mxu0 %v3521_v33  ;;  %v1972_v41 = vadd.f32 %v4828_v5, %v5377_v44  ;;  %v5378_v40 = vld [vmem:[#allocation78_spill] sm:$0xff]  ;;  %v1978_v5 = vadd.f32 %v4858_v6, %v4658_v37  ;;  %v2007_v6 = vpop.f32.mrf.mxu0 }
 0x266   : > { %v2148_v58 = vpop.f32.mrf.mxu1  ;;  %2451 = vmatmul.mubr.f32.gmra.mxu0 %v3523_v23  ;;  %v1976_v33 = vadd.f32 %v4848_v25, %v5378_v40  ;;  %v1984_v25 = vadd.f32 %v4878_v7, %v4666_v48  ;;  %v5384_v40 = vld [vmem:[#allocation84_spill] sm:$0xff] }
 0x267   : > { %3536 = vtanh.f32 %v2147_v1  ;;  %v2149_v9 = vadd.f32 %v2148_v58, %v1956_v36  ;;  %v5379_v36 = vld [vmem:[#allocation79_spill] sm:$0xff]  ;;  %v2011_v48 = vpop.f32.mrf.mxu0 }
 0x268   : > { %v3525_v15 = vpop.eup %3524  ;;  %3538 = vtanh.f32 %v2145_v24  ;;  %v2150_v0 = vpop.f32.mrf.mxu1  ;;  %v1982_v58 = vadd.f32 %v4868_v31, %v5379_v36  ;;  %v1988_v31 = vadd.f32 %v4894_v2, %v4674_v59 }
 0x269   : > { %v3527_v11 = vpop.eup %3526  ;;  %v2151_v30 = vadd.f32 %v2150_v0, %v1958_v21  ;;  %2455 = vmatprep.mubr.f32.mxu0 %v3525_v15  ;;  %v2013_v59 = vpop.f32.mrf.mxu0 }
 0x26a   : > { %v2154_v61 = vpop.f32.mrf.mxu1  ;;  %2456 = vmatmul.mubr.f32.gmra.mxu0 %v3527_v11 }
 0x26b   : > { %3540 = vtanh.f32 %v2151_v30  ;;  %v2155_v12 = vadd.f32 %v2154_v61, %v1962_v16  ;;  %v5380_v30 = vld [vmem:[#allocation80_spill] sm:$0xff] }
 0x26c   : > { %v3529_v29 = vpop.eup %3528  ;;  %3542 = vtanh.f32 %v2149_v9  ;;  %v2156_v57 = vpop.f32.mrf.mxu1  ;;  %v1986_v51 = vadd.f32 %v4888_v50, %v5380_v30  ;;  %v1994_v50 = vadd.f32 %v4904_v10, %v4682_v13  ;;  %v5388_v30 = vld [vmem:[#allocation88_spill] sm:$0xff] }
 0x26d   : > { %v3531_v42 = vpop.eup %3530  ;;  %v2157_v49 = vadd.f32 %v2156_v57, %v1964_v63  ;;  %2460 = vmatprep.mubr.f32.mxu0 %v3529_v29  ;;  %v5381_v57 = vld [vmem:[#allocation81_spill] sm:$0xff]  ;;  %v2015_v13 = vpop.f32.mrf.mxu0 }
 0x26e   : > { %v2158_v34 = vpop.f32.mrf.mxu1  ;;  %2461 = vmatmul.mubr.f32.gmra.mxu0 %v3531_v42  ;;  %v1992_v42 = vadd.f32 %v4898_v14, %v5381_v57  ;;  %v1998_v14 = vadd.f32 %v4916_v52, %v4690_v27 }
 0x26f   : > { %3544 = vtanh.f32 %v2157_v49  ;;  %v2159_v20 = vadd.f32 %v2158_v34, %v1966_v18  ;;  %v2017_v27 = vpop.f32.mrf.mxu0 }
 0x270   : > { %v3533_v8 = vpop.eup %3532  ;;  %3546 = vtanh.f32 %v2155_v12  ;;  %v2160_v60 = vpop.f32.mrf.mxu1 }
 0x271   : > { %v3535_v38 = vpop.eup %3534  ;;  %v2161_v32 = vadd.f32 %v2160_v60, %v1968_v47  ;;  %2465 = vmatprep.mubr.f32.mxu0 %v3533_v8  ;;  %v5382_v8 = vld [vmem:[#allocation82_spill] sm:$0xff] }
 0x272   : > { %v2164_v26 = vpop.f32.mrf.mxu1  ;;  %2466 = vmatmul.mubr.f32.gmra.mxu0 %v3535_v38 }
 0x273   : > { %3548 = vtanh.f32 %v2161_v32  ;;  %v2165_v45 = vadd.f32 %v2164_v26, %v1972_v41  ;;  %v5383_v26 = vld [vmem:[#allocation83_spill] sm:$0xff] }
 0x274   : > { %v3537_v17 = vpop.eup %3536  ;;  %3550 = vtanh.f32 %v2159_v20  ;;  %v2166_v4 = vpop.f32.mrf.mxu1  ;;  %v1996_v20 = vadd.f32 %v4910_v55, %v5382_v8  ;;  %v2004_v55 = vadd.f32 %v4928_v54, %v4698_v46 }
 0x275   : > { %v3539_v56 = vpop.eup %3538  ;;  %v2167_v39 = vadd.f32 %v2166_v4, %v1974_v35  ;;  %2470 = vmatprep.mubr.f32.mxu0 %v3537_v17  ;;  %v2002_v35 = vadd.f32 %v4922_v43, %v5383_v26  ;;  %v2008_v43 = vadd.f32 %v2007_v6, %v4706_v3 }
 0x276   : > { %v2168_v24 = vpop.f32.mrf.mxu1  ;;  %2471 = vmatmul.mubr.f32.gmra.mxu0 %v3539_v56 }
 0x277   : > { %3552 = vtanh.f32 %v2167_v39  ;;  %v2169_v62 = vadd.f32 %v2168_v24, %v1976_v33  ;;  %v2006_v33 = vadd.f32 %v4934_v22, %v5384_v40 }
 0x278   : > { %v3541_v28 = vpop.eup %3540  ;;  %3554 = vtanh.f32 %v2165_v45  ;;  %v2170_v23 = vpop.f32.mrf.mxu1 }
 0x279   : > { %v3543_v1 = vpop.eup %3542  ;;  %v2171_v53 = vadd.f32 %v2170_v23, %v1978_v5  ;;  %2475 = vmatprep.mubr.f32.mxu0 %v3541_v28  ;;  %v2021_v28 = vpop.f32.mrf.mxu0 }
 0x27a   : > { %v2174_v21 = vpop.f32.mrf.mxu1  ;;  %2476 = vmatmul.mubr.f32.gmra.mxu0 %v3543_v1  ;;  %v5385_v1 = vld [vmem:[#allocation85_spill] sm:$0xff] }
 0x27b   : > { %3556 = vtanh.f32 %v2171_v53  ;;  %v2175_v15 = vadd.f32 %v2174_v21, %v1982_v58  ;;  %v2012_v53 = vadd.f32 %v2011_v48, %v5385_v1  ;;  %v5386_v58 = vld [vmem:[#allocation86_spill] sm:$0xff] }
 0x27c   : > { %v3545_v37 = vpop.eup %3544  ;;  %3558 = vtanh.f32 %v2169_v62  ;;  %v2176_v9 = vpop.f32.mrf.mxu1  ;;  %v2014_v21 = vadd.f32 %v2013_v59, %v5386_v58 }
 0x27d   : > { %v3547_v0 = vpop.eup %3546  ;;  %v2177_v11 = vadd.f32 %v2176_v9, %v1984_v25  ;;  %2480 = vmatprep.mubr.f32.mxu0 %v3545_v37  ;;  %v2023_v25 = vpop.f32.mrf.mxu0  ;;  %v5387_v9 = vld [vmem:[#allocation87_spill] sm:$0xff] }
 0x27e   : > { %v2178_v16 = vpop.f32.mrf.mxu1  ;;  %2481 = vmatmul.mubr.f32.gmra.mxu0 %v3547_v0  ;;  %v2016_v0 = vadd.f32 %v2015_v13, %v5387_v9 }
 0x27f   : > { %3560 = vtanh.f32 %v2177_v11  ;;  %v2179_v7 = vadd.f32 %v2178_v16, %v1986_v51  ;;  %v2018_v51 = vadd.f32 %v2017_v27, %v5388_v30 }
 0x280   : > { %v3549_v61 = vpop.eup %3548  ;;  %3562 = vtanh.f32 %v2175_v15  ;;  %v2180_v63 = vpop.f32.mrf.mxu1 }
 0x281   : > { %v3551_v29 = vpop.eup %3550  ;;  %v2181_v12 = vadd.f32 %v2180_v63, %v1988_v31  ;;  %2485 = vmatprep.mubr.f32.mxu0 %v3549_v61  ;;  %v2025_v31 = vpop.f32.mrf.mxu0 }
 0x282   : > { %v2184_v49 = vpop.f32.mrf.mxu1  ;;  %2486 = vmatmul.mubr.f32.gmra.mxu0 %v3551_v29  ;;  %v5389_v29 = vld [vmem:[#allocation89_spill] sm:$0xff] }
 0x283   : > { %3564 = vtanh.f32 %v2181_v12  ;;  %v2185_v2 = vadd.f32 %v2184_v49, %v1992_v42  ;;  %v2022_v12 = vadd.f32 %v2021_v28, %v5389_v29  ;;  %v5390_v42 = vld [vmem:[#allocation90_spill] sm:$0xff] }
 0x284   : > { %v3553_v19 = vpop.eup %3552  ;;  %3566 = vtanh.f32 %v2179_v7  ;;  %v2186_v18 = vpop.f32.mrf.mxu1  ;;  %v2024_v49 = vadd.f32 %v2023_v25, %v5390_v42 }
 0x285   : > { %v3555_v34 = vpop.eup %3554  ;;  %v2187_v47 = vadd.f32 %v2186_v18, %v1994_v50  ;;  %2490 = vmatprep.mubr.f32.mxu0 %v3553_v19  ;;  %v2027_v19 = vpop.f32.mrf.mxu0 }
 0x286   : > { %v2188_v60 = vpop.f32.mrf.mxu1  ;;  %2491 = vmatmul.mubr.f32.gmra.mxu0 %v3555_v34 }
 0x287   : > { %3568 = vtanh.f32 %v2187_v47  ;;  %v2189_v10 = vadd.f32 %v2188_v60, %v1996_v20  ;;  %v5391_v47 = vld [vmem:[#allocation91_spill] sm:$0xff]  ;;  %v5392_v60 = vld [vmem:[#allocation92_spill] sm:$0xff] }
 0x288   : > { %v3557_v38 = vpop.eup %3556  ;;  %3570 = vtanh.f32 %v2185_v2  ;;  %v2190_v32 = vpop.f32.mrf.mxu1  ;;  %v2026_v8 = vadd.f32 %v2025_v31, %v5391_v47 }
 0x289   : > { %v3559_v44 = vpop.eup %3558  ;;  %v2191_v41 = vadd.f32 %v2190_v32, %v1998_v14  ;;  %2495 = vmatprep.mubr.f32.mxu0 %v3557_v38  ;;  %v2028_v14 = vadd.f32 %v2027_v19, %v5392_v60 }
 0x28a   : > { %v2194_v17 = vpop.f32.mrf.mxu1  ;;  %2496 = vmatmul.mubr.f32.gmra.mxu0 %v3559_v44 }
 0x28b   : > { %3572 = vtanh.f32 %v2191_v41  ;;  %v2195_v52 = vadd.f32 %v2194_v17, %v2002_v35 }
 0x28c   : > { %v3561_v45 = vpop.eup %3560  ;;  %3574 = vtanh.f32 %v2189_v10  ;;  %v2196_v4 = vpop.f32.mrf.mxu1 }
 0x28d   : > { %v3563_v56 = vpop.eup %3562  ;;  %v2197_v39 = vadd.f32 %v2196_v4, %v2004_v55  ;;  %2500 = vmatprep.mubr.f32.mxu0 %v3561_v45  ;;  %v4968_v4 = vld [vmem:[#allocation2] ss:$0 sm:$0xff] }
 0x28e   : > { %v2198_v24 = vpop.f32.mrf.mxu1  ;;  %2501 = vmatmul.mubr.f32.gmra.mxu0 %v3563_v56 }
 0x28f   : > { %3576 = vtanh.f32 %v2197_v39  ;;  %v2199_v46 = vadd.f32 %v2198_v24, %v2006_v33 }
 0x290   : > { %v3565_v5 = vpop.eup %3564  ;;  %3578 = vtanh.f32 %v2195_v52  ;;  %v2200_v54 = vpop.f32.mrf.mxu1 }
 0x291   : > { %v3567_v62 = vpop.eup %3566  ;;  %v2201_v23 = vadd.f32 %v2200_v54, %v2008_v43  ;;  %2505 = vmatprep.mubr.f32.mxu0 %v3565_v5 }
 0x292   : > { %v2204_v36 = vpop.f32.mrf.mxu1  ;;  %2506 = vmatmul.mubr.f32.gmra.mxu0 %v3567_v62 }
 0x293   : > { %3580 = vtanh.f32 %v2201_v23  ;;  %v2205_v3 = vadd.f32 %v2204_v36, %v2012_v53 }
 0x294   : > { %v3569_v22 = vpop.eup %3568  ;;  %3582 = vtanh.f32 %v2199_v46  ;;  %v2206_v37 = vpop.f32.mrf.mxu1 }
 0x295   : > { %v3571_v6 = vpop.eup %3570  ;;  %v2207_v15 = vadd.f32 %v2206_v37, %v2014_v21  ;;  %2510 = vmatprep.mubr.f32.mxu0 %v3569_v22 }
 0x296   : > { %v2208_v11 = vpop.f32.mrf.mxu1  ;;  %2511 = vmatmul.mubr.f32.gmra.mxu0 %v3571_v6 }
 0x297   : > { %3584 = vtanh.f32 %v2207_v15  ;;  %v2209_v61 = vadd.f32 %v2208_v11, %v2016_v0 }
 0x298   : > { %v3573_v16 = vpop.eup %3572  ;;  %3586 = vtanh.f32 %v2205_v3  ;;  %v2210_v48 = vpop.f32.mrf.mxu1 }
 0x299   : > { %v3575_v7 = vpop.eup %3574  ;;  %v2211_v63 = vadd.f32 %v2210_v48, %v2018_v51  ;;  %2515 = vmatprep.mubr.f32.mxu0 %v3573_v16 }
 0x29a   : > { %v2214_v57 = vpop.f32.mrf.mxu1  ;;  %2516 = vmatmul.mubr.f32.gmra.mxu0 %v3575_v7 }
 0x29b   : > { %3588 = vtanh.f32 %v2211_v63  ;;  %v2215_v59 = vadd.f32 %v2214_v57, %v2022_v12 }
 0x29c   : > { %v3577_v50 = vpop.eup %3576  ;;  %3590 = vtanh.f32 %v2209_v61  ;;  %v2216_v2 = vpop.f32.mrf.mxu1 }
 0x29d   : > { %v3579_v18 = vpop.eup %3578  ;;  %v2217_v34 = vadd.f32 %v2216_v2, %v2024_v49  ;;  %2520 = vmatprep.mubr.f32.mxu0 %v3577_v50 }
 0x29e   : > { %v2218_v20 = vpop.f32.mrf.mxu1  ;;  %2521 = vmatmul.mubr.f32.gmra.mxu0 %v3579_v18 }
 0x29f   : > { %3592 = vtanh.f32 %v2217_v34  ;;  %v2219_v13 = vadd.f32 %v2218_v20, %v2026_v8 }
 0x2a0   : > { %v3581_v38 = vpop.eup %3580  ;;  %3594 = vtanh.f32 %v2215_v59  ;;  %v2220_v10 = vpop.f32.mrf.mxu1 }
 0x2a1   : > { %v3583_v32 = vpop.eup %3582  ;;  %v2221_v44 = vadd.f32 %v2220_v10, %v2028_v14  ;;  %2525 = vmatprep.mubr.f32.mxu0 %v3581_v38 }
 0x2a2   : > { %2526 = vmatmul.mubr.f32.gmra.mxu0 %v3583_v32 }
 0x2a3   : > { %3596 = vtanh.f32 %v2221_v44 }
 0x2a4   : > { %v3585_v41 = vpop.eup %3584  ;;  %3598 = vtanh.f32 %v2219_v13 }
 0x2a5   : > { %v3587_v26 = vpop.eup %3586  ;;  %2530 = vmatprep.mubr.f32.mxu0 %v3585_v41 }
 0x2a6   : > { %2531 = vmatmul.mubr.f32.gmra.mxu0 %v3587_v26 }
 0x2a8   : > { %v3589_v35 = vpop.eup %3588 }
 0x2a9   : > { %v3591_v17 = vpop.eup %3590  ;;  %2535 = vmatprep.mubr.f32.mxu0 %v3589_v35 }
 0x2aa   : > { %2536 = vmatmul.mubr.f32.gmra.mxu0 %v3591_v17 }
 0x2ac   : > { %v3593_v55 = vpop.eup %3592 }
 0x2ad   : > { %v3595_v45 = vpop.eup %3594  ;;  %2540 = vmatprep.mubr.f32.mxu0 %v3593_v55 }
 0x2ae   : > { %2541 = vmatmul.mubr.f32.gmra.mxu0 %v3595_v45 }
 0x2b0   : > { %v3597_v27 = vpop.eup %3596 }
 0x2b1   : > { %v3599_v52 = vpop.eup %3598  ;;  %2545 = vmatprep.mubr.f32.mxu0 %v3597_v27 }
 0x2b2   : > { %2546 = vmatmul.mubr.f32.gmra.mxu0 %v3599_v52 }
 0x2f6   : > { %v2392_v56 = vpop.f32.mrf.mxu0 }
 0x2f7   : > { %v2393_v39 = vadd.f32 %v4968_v4, %v2392_v56 }
 0x2f8   : > { %v2394_v40 = vpop.f32.mrf.mxu0 }
 0x2f9   : > { %2552 = vst.msk [vmem:[%s4971_s25] sm:$0xff] %vm2551_vm0, %v2393_v39 }
 0x2fa   : > { %v2397_v33 = vpop.f32.mrf.mxu0 }
 0x2fb   : > { %v2398_v24 = vadd.f32 %v4968_v4, %v2397_v33 }
 0x2fc   : > { %v2399_v43 = vpop.f32.mrf.mxu0 }
 0x2fd   : > { %2553 = vst.msk [vmem:[%s4971_s25 + $0x8] sm:$0xff] %vm2551_vm0, %v2398_v24 }
 0x2fe   : > { %v2402_v5 = vpop.f32.mrf.mxu0 }
 0x2ff   : > { %v2403_v28 = vadd.f32 %v4968_v4, %v2402_v5 }
 0x300   : > { %v2404_v46 = vpop.f32.mrf.mxu0 }
 0x301   : > { %2554 = vst.msk [vmem:[%s4971_s25 + $0x10] sm:$0xff] %vm2551_vm0, %v2403_v28 }
 0x302   : > { %v2407_v54 = vpop.f32.mrf.mxu0 }
 0x303   : > { %v2408_v62 = vadd.f32 %v4968_v4, %v2407_v54 }
 0x304   : > { %v2409_v23 = vpop.f32.mrf.mxu0 }
 0x305   : > { %2555 = vst.msk [vmem:[%s4971_s25 + $0x18] sm:$0xff] %vm2551_vm0, %v2408_v62 }
 0x306   : > { %v2412_v1 = vpop.f32.mrf.mxu0 }
 0x307   : > { %v2413_v53 = vadd.f32 %v4968_v4, %v2412_v1 }
 0x308   : > { %v2414_v36 = vpop.f32.mrf.mxu0 }
 0x309   : > { %2556 = vst.msk [vmem:[%s4971_s25 + $0x20] sm:$0xff] %vm2551_vm0, %v2413_v53 }
 0x30a   : > { %v2417_v58 = vpop.f32.mrf.mxu0 }
 0x30b   : > { %v2418_v21 = vadd.f32 %v4968_v4, %v2417_v58 }
 0x30c   : > { %v2419_v22 = vpop.f32.mrf.mxu0 }
 0x30d   : > { %2557 = vst.msk [vmem:[%s4971_s25 + $0x28] sm:$0xff] %vm2551_vm0, %v2418_v21 }
 0x30e   : > { %v2422_v25 = vpop.f32.mrf.mxu0 }
 0x30f   : > { %v2423_v3 = vadd.f32 %v4968_v4, %v2422_v25 }
 0x310   : > { %v2424_v37 = vpop.f32.mrf.mxu0 }
 0x311   : > { %2558 = vst.msk [vmem:[%s4971_s25 + $0x30] sm:$0xff] %vm2551_vm0, %v2423_v3 }
 0x312   : > { %v2427_v6 = vpop.f32.mrf.mxu0 }
 0x313   : > { %v2428_v15 = vadd.f32 %v4968_v4, %v2427_v6 }
 0x314   : > { %v2429_v9 = vpop.f32.mrf.mxu0 }
 0x315   : > { %2559 = vst.msk [vmem:[%s4971_s25 + $0x38] sm:$0xff] %vm2551_vm0, %v2428_v15 }
 0x316   : > { %v2432_v0 = vpop.f32.mrf.mxu0 }
 0x317   : > { %v2433_v11 = vadd.f32 %v4968_v4, %v2432_v0 }
 0x318   : > { %v2434_v30 = vpop.f32.mrf.mxu0 }
 0x319   : > { %2560 = vst.msk [vmem:[%s4971_s25 + $0x40] sm:$0xff] %vm2551_vm0, %v2433_v11 }
 0x31a   : > { %v2437_v51 = vpop.f32.mrf.mxu0 }
 0x31b   : > { %v2438_v16 = vadd.f32 %v4968_v4, %v2437_v51 }
 0x31c   : > { %v2439_v31 = vpop.f32.mrf.mxu0 }
 0x31d   : > { %2561 = vst.msk [vmem:[%s4971_s25 + $0x48] sm:$0xff] %vm2551_vm0, %v2438_v16 }
 0x31e   : > { %v2442_v61 = vpop.f32.mrf.mxu0 }
 0x31f   : > { %v2443_v48 = vadd.f32 %v4968_v4, %v2442_v61 }
 0x320   : > { %v2444_v7 = vpop.f32.mrf.mxu0 }
 0x321   : > { %2562 = vst.msk [vmem:[%s4971_s25 + $0x50] sm:$0xff] %vm2551_vm0, %v2443_v48 }
 0x322   : > { %v2447_v63 = vpop.f32.mrf.mxu0 }
 0x323   : > { %v2448_v29 = vadd.f32 %v4968_v4, %v2447_v63 }
 0x324   : > { %v2449_v12 = vpop.f32.mrf.mxu0 }
 0x325   : > { %2563 = vst.msk [vmem:[%s4971_s25 + $0x58] sm:$0xff] %vm2551_vm0, %v2448_v29 }
 0x326   : > { %v2452_v57 = vpop.f32.mrf.mxu0 }
 0x327   : > { %v2453_v42 = vadd.f32 %v4968_v4, %v2452_v57 }
 0x328   : > { %v2454_v49 = vpop.f32.mrf.mxu0 }
 0x329   : > { %2564 = vst.msk [vmem:[%s4971_s25 + $0x60] sm:$0xff] %vm2551_vm0, %v2453_v42 }
 0x32a   : > { %v2457_v50 = vpop.f32.mrf.mxu0 }
 0x32b   : > { %v2458_v19 = vadd.f32 %v4968_v4, %v2457_v50 }
 0x32c   : > { %v2459_v59 = vpop.f32.mrf.mxu0 }
 0x32d   : > { %2565 = vst.msk [vmem:[%s4971_s25 + $0x68] sm:$0xff] %vm2551_vm0, %v2458_v19 }
 0x32e   : > { %v2462_v2 = vpop.f32.mrf.mxu0 }
 0x32f   : > { %v2463_v18 = vadd.f32 %v4968_v4, %v2462_v2 }
 0x330   : > { %v2464_v34 = vpop.f32.mrf.mxu0 }
 0x331   : > { %2566 = vst.msk [vmem:[%s4971_s25 + $0x70] sm:$0xff] %vm2551_vm0, %v2463_v18 }
 0x332   : > { %v2467_v47 = vpop.f32.mrf.mxu0 }
 0x333   : > { %v2468_v8 = vadd.f32 %v4968_v4, %v2467_v47 }
 0x334   : > { %v2469_v20 = vpop.f32.mrf.mxu0 }
 0x335   : > { %2567 = vst.msk [vmem:[%s4971_s25 + $0x78] sm:$0xff] %vm2551_vm0, %v2468_v8 }
 0x336   : > { %v2472_v60 = vpop.f32.mrf.mxu0 }
 0x337   : > { %v2473_v14 = vadd.f32 %v4968_v4, %v2472_v60 }
 0x338   : > { %v2474_v38 = vpop.f32.mrf.mxu0 }
 0x339   : > { %2568 = vst.msk [vmem:[%s4971_s25 + $0x80] sm:$0xff] %vm2551_vm0, %v2473_v14 }
 0x33a   : > { %v2477_v13 = vpop.f32.mrf.mxu0 }
 0x33b   : > { %v2478_v10 = vadd.f32 %v4968_v4, %v2477_v13 }
 0x33c   : > { %v2479_v32 = vpop.f32.mrf.mxu0 }
 0x33d   : > { %2569 = vst.msk [vmem:[%s4971_s25 + $0x88] sm:$0xff] %vm2551_vm0, %v2478_v10 }
 0x33e   : > { %v2482_v44 = vpop.f32.mrf.mxu0 }
 0x33f   : > { %v2483_v41 = vadd.f32 %v4968_v4, %v2482_v44 }
 0x340   : > { %v2484_v26 = vpop.f32.mrf.mxu0 }
 0x341   : > { %2570 = vst.msk [vmem:[%s4971_s25 + $0x90] sm:$0xff] %vm2551_vm0, %v2483_v41 }
 0x342   : > { %v2487_v35 = vpop.f32.mrf.mxu0 }
 0x343   : > { %v2488_v17 = vadd.f32 %v4968_v4, %v2487_v35 }
 0x344   : > { %v2489_v55 = vpop.f32.mrf.mxu0 }
 0x345   : > { %2571 = vst.msk [vmem:[%s4971_s25 + $0x98] sm:$0xff] %vm2551_vm0, %v2488_v17 }
 0x346   : > { %v2492_v45 = vpop.f32.mrf.mxu0 }
 0x347   : > { %v2493_v27 = vadd.f32 %v4968_v4, %v2492_v45 }
 0x348   : > { %v2494_v52 = vpop.f32.mrf.mxu0 }
 0x349   : > { %2572 = vst.msk [vmem:[%s4971_s25 + $0xa0] sm:$0xff] %vm2551_vm0, %v2493_v27 }
 0x34a   : > { %v2497_v56 = vpop.f32.mrf.mxu0 }
 0x34b   : > { %v2498_v39 = vadd.f32 %v4968_v4, %v2497_v56 }
 0x34c   : > { %v2499_v40 = vpop.f32.mrf.mxu0 }
 0x34d   : > { %2573 = vst.msk [vmem:[%s4971_s25 + $0xa8] sm:$0xff] %vm2551_vm0, %v2498_v39 }
 0x34e   : > { %v2502_v33 = vpop.f32.mrf.mxu0 }
 0x34f   : > { %v2503_v24 = vadd.f32 %v4968_v4, %v2502_v33 }
 0x350   : > { %v2504_v43 = vpop.f32.mrf.mxu0 }
 0x351   : > { %2574 = vst.msk [vmem:[%s4971_s25 + $0xb0] sm:$0xff] %vm2551_vm0, %v2503_v24 }
 0x352   : > { %v2507_v5 = vpop.f32.mrf.mxu0 }
 0x353   : > { %v2508_v28 = vadd.f32 %v4968_v4, %v2507_v5 }
 0x354   : > { %v2509_v46 = vpop.f32.mrf.mxu0 }
 0x355   : > { %2575 = vst.msk [vmem:[%s4971_s25 + $0xb8] sm:$0xff] %vm2551_vm0, %v2508_v28 }
 0x356   : > { %v2512_v54 = vpop.f32.mrf.mxu0 }
 0x357   : > { %v2513_v62 = vadd.f32 %v4968_v4, %v2512_v54 }
 0x358   : > { %v2514_v23 = vpop.f32.mrf.mxu0 }
 0x359   : > { %2576 = vst.msk [vmem:[%s4971_s25 + $0xc0] sm:$0xff] %vm2551_vm0, %v2513_v62 }
 0x35a   : > { %v2517_v1 = vpop.f32.mrf.mxu0 }
 0x35b   : > { %v2518_v53 = vadd.f32 %v4968_v4, %v2517_v1 }
 0x35c   : > { %v2519_v36 = vpop.f32.mrf.mxu0 }
 0x35d   : > { %2577 = vst.msk [vmem:[%s4971_s25 + $0xc8] sm:$0xff] %vm2551_vm0, %v2518_v53 }
 0x35e   : > { %v2522_v58 = vpop.f32.mrf.mxu0 }
 0x35f   : > { %v2523_v21 = vadd.f32 %v4968_v4, %v2522_v58 }
 0x360   : > { %v2524_v22 = vpop.f32.mrf.mxu0 }
 0x361   : > { %2578 = vst.msk [vmem:[%s4971_s25 + $0xd0] sm:$0xff] %vm2551_vm0, %v2523_v21 }
 0x362   : > { %v2527_v25 = vpop.f32.mrf.mxu0 }
 0x363   : > { %v2528_v3 = vadd.f32 %v4968_v4, %v2527_v25 }
 0x364   : > { %v2529_v37 = vpop.f32.mrf.mxu0 }
 0x365   : > { %2579 = vst.msk [vmem:[%s4971_s25 + $0xd8] sm:$0xff] %vm2551_vm0, %v2528_v3 }
 0x366   : > { %v2532_v6 = vpop.f32.mrf.mxu0 }
 0x367   : > { %v2533_v15 = vadd.f32 %v4968_v4, %v2532_v6 }
 0x368   : > { %v2534_v9 = vpop.f32.mrf.mxu0 }
 0x369   : > { %2580 = vst.msk [vmem:[%s4971_s25 + $0xe0] sm:$0xff] %vm2551_vm0, %v2533_v15 }
 0x36a   : > { %v2537_v0 = vpop.f32.mrf.mxu0 }
 0x36b   : > { %v2538_v11 = vadd.f32 %v4968_v4, %v2537_v0 }
 0x36c   : > { %v2539_v30 = vpop.f32.mrf.mxu0 }
 0x36d   : > { %2581 = vst.msk [vmem:[%s4971_s25 + $0xe8] sm:$0xff] %vm2551_vm0, %v2538_v11 }
 0x36e   : > { %v2542_v51 = vpop.f32.mrf.mxu0 }
 0x36f   : > { %v2543_v16 = vadd.f32 %v4968_v4, %v2542_v51 }
 0x370   : > { %v2544_v31 = vpop.f32.mrf.mxu0 }
 0x371   : > { %2582 = vst.msk [vmem:[%s4971_s25 + $0xf0] sm:$0xff] %vm2551_vm0, %v2543_v16  ;;  %2590 = sbr.rel (!%p5393_p0) target bundleno = 934 (0x3a6), region = 56 }
 0x372   : > { %v2547_v61 = vpop.f32.mrf.mxu0 }
 0x373   : > { %v2548_v48 = vadd.f32 %v4968_v4, %v2547_v61 }
 0x374   : > { %v2549_v7 = vpop.f32.mrf.mxu0 }
 0x375   : > { %2583 = vst.msk [vmem:[%s4971_s25 + $0xf8] sm:$0xff] %vm2551_vm0, %v2548_v48 }
 0x376   : > { %s5406_s7 = smov (!%p2593_p9, %s2592_s7), 32 }
 0x377   : > { %s3104_s13 = sshll.u32 %s5406_s7, 7 }
 0x378   : > { %p3107_p12 = scmp.eq.s32.totalorder %s3104_s13, 0 }
 0x379   : > { %s5081_s30 = sshrl.u32 (!%p3107_p12), %s5406_s7, 5 }
 0x37a   : > { %2601 = sbr.rel (%p3107_p12) target bundleno = 934 (0x3a6), region = 60  ;;  %p3108_p1 = scmp.le.s32.totalorder (!%p3107_p12), %s5081_s30, 0 }
 0x37f   : > { %2889 = sbr.rel (%p3108_p1) target bundleno = 917 (0x395), region = 142  ;;  %s5394_s4 = smov (!%p3108_p1), %s5075_s28 }
 0x380   : > { %s5395_s16 = smov (!%p3108_p1), %s4971_s25  ;;  %s5090_s29 = smov (!%p3108_p1), 0  }
 0x381   : > { %s5092_s6 = smov (!%p3108_p1), 0  }
 0x384 LB: >> { %v2726_v4 = vld [vmem:[%s3756_s16] sm:$0xff]  ;;  %v2728_v63 = vld [vmem:[%s3756_s16 + $0x8] sm:$0xff]  ;;  %v2730_v29 = vld [vmem:[%s3756_s16 + $0x10] sm:$0xff]  ;;  %s2790_s8 = sadd.s32 1, %s3760_s29  ;;  %s2720_s6 = sadd.s32 1, %s3764_s6   ;;  %s3764_s6 = sphi %s5092_s6, %s2720_s6   ;;  %s3760_s29 = sphi %s5090_s29, %s5398_s29   ;;  %s3756_s16 = sphi %s5395_s16, %s5397_s16   ;;  %s3752_s4 = sphi %s5394_s4, %s5396_s4  }
 0x385   : >> { %2727 = vst [vmem:[%s3752_s4] sm:$0xff] %v2726_v4  ;;  %2729 = vst [vmem:[%s3752_s4 + $0x8] sm:$0xff] %v2728_v63  ;;  %v2732_v12 = vld [vmem:[%s3756_s16 + $0x18] sm:$0xff]  ;;  %v2734_v57 = vld [vmem:[%s3756_s16 + $0x20] sm:$0xff]  ;;  %p2791_p2 = scmp.ge.s32.totalorder %s2790_s8, %s5081_s30  ;;  %p2719_p6 = scmp.ge.s32.totalorder %s2720_s6, %s5081_s30 }
 0x386   : >> { %2731 = vst [vmem:[%s3752_s4 + $0x10] sm:$0xff] %v2730_v29  ;;  %v2736_v42 = vld [vmem:[%s3756_s16 + $0x28] sm:$0xff]  ;;  %2733 = vst [vmem:[%s3752_s4 + $0x18] sm:$0xff] %v2732_v12  ;;  %v2738_v49 = vld [vmem:[%s3756_s16 + $0x30] sm:$0xff] }
 0x387   : >> { %2735 = vst [vmem:[%s3752_s4 + $0x20] sm:$0xff] %v2734_v57  ;;  %2737 = vst [vmem:[%s3752_s4 + $0x28] sm:$0xff] %v2736_v42  ;;  %v2740_v50 = vld [vmem:[%s3756_s16 + $0x38] sm:$0xff]  ;;  %v2742_v19 = vld [vmem:[%s3756_s16 + $0x40] sm:$0xff]  ;;  %s5408_s8 = smov (%p2791_p2, %s2790_s8), 0 }
 0x388   : >> { %2739 = vst [vmem:[%s3752_s4 + $0x30] sm:$0xff] %v2738_v49  ;;  %2741 = vst [vmem:[%s3752_s4 + $0x38] sm:$0xff] %v2740_v50  ;;  %v2744_v59 = vld [vmem:[%s3756_s16 + $0x48] sm:$0xff]  ;;  %v2746_v2 = vld [vmem:[%s3756_s16 + $0x50] sm:$0xff]  ;;  %s3109_s10 = sshll.u32 %s5408_s8, 8  ;;  %s5398_s29 = smov %s5408_s8 }
 0x389   : >> { %2743 = vst [vmem:[%s3752_s4 + $0x40] sm:$0xff] %v2742_v19  ;;  %v2748_v18 = vld [vmem:[%s3756_s16 + $0x58] sm:$0xff]  ;;  %2745 = vst [vmem:[%s3752_s4 + $0x48] sm:$0xff] %v2744_v59  ;;  %v2750_v34 = vld [vmem:[%s3756_s16 + $0x60] sm:$0xff]  ;;  %s5148_s14 = scalar_lea.vmem %s4971_s25, %s3109_s10 [#allocation8]   ;;  %s2796_s15 = scalar_lea.vmem %s5075_s28, %s3109_s10  }
 0x38a   : >> { %2747 = vst [vmem:[%s3752_s4 + $0x50] sm:$0xff] %v2746_v2  ;;  %2749 = vst [vmem:[%s3752_s4 + $0x58] sm:$0xff] %v2748_v18  ;;  %v2752_v47 = vld [vmem:[%s3756_s16 + $0x68] sm:$0xff]  ;;  %v2754_v8 = vld [vmem:[%s3756_s16 + $0x70] sm:$0xff] }
 0x38b   : >> { %2751 = vst [vmem:[%s3752_s4 + $0x60] sm:$0xff] %v2750_v34  ;;  %2753 = vst [vmem:[%s3752_s4 + $0x68] sm:$0xff] %v2752_v47  ;;  %v2756_v20 = vld [vmem:[%s3756_s16 + $0x78] sm:$0xff]  ;;  %v2758_v60 = vld [vmem:[%s3756_s16 + $0x80] sm:$0xff] }
 0x38c   : >> { %2755 = vst [vmem:[%s3752_s4 + $0x70] sm:$0xff] %v2754_v8  ;;  %v2760_v14 = vld [vmem:[%s3756_s16 + $0x88] sm:$0xff]  ;;  %2757 = vst [vmem:[%s3752_s4 + $0x78] sm:$0xff] %v2756_v20  ;;  %v2762_v38 = vld [vmem:[%s3756_s16 + $0x90] sm:$0xff] }
 0x38d   : >> { %2759 = vst [vmem:[%s3752_s4 + $0x80] sm:$0xff] %v2758_v60  ;;  %2761 = vst [vmem:[%s3752_s4 + $0x88] sm:$0xff] %v2760_v14  ;;  %v2764_v13 = vld [vmem:[%s3756_s16 + $0x98] sm:$0xff]  ;;  %v2766_v10 = vld [vmem:[%s3756_s16 + $0xa0] sm:$0xff] }
 0x38e   : >> { %2763 = vst [vmem:[%s3752_s4 + $0x90] sm:$0xff] %v2762_v38  ;;  %2765 = vst [vmem:[%s3752_s4 + $0x98] sm:$0xff] %v2764_v13  ;;  %v2768_v32 = vld [vmem:[%s3756_s16 + $0xa8] sm:$0xff]  ;;  %v2770_v44 = vld [vmem:[%s3756_s16 + $0xb0] sm:$0xff] }
 0x38f   : >> { %2767 = vst [vmem:[%s3752_s4 + $0xa0] sm:$0xff] %v2766_v10  ;;  %v2772_v41 = vld [vmem:[%s3756_s16 + $0xb8] sm:$0xff]  ;;  %2769 = vst [vmem:[%s3752_s4 + $0xa8] sm:$0xff] %v2768_v32  ;;  %v2774_v26 = vld [vmem:[%s3756_s16 + $0xc0] sm:$0xff] }
 0x390   : >> { %2771 = vst [vmem:[%s3752_s4 + $0xb0] sm:$0xff] %v2770_v44  ;;  %2773 = vst [vmem:[%s3752_s4 + $0xb8] sm:$0xff] %v2772_v41  ;;  %v2776_v35 = vld [vmem:[%s3756_s16 + $0xc8] sm:$0xff]  ;;  %v2778_v17 = vld [vmem:[%s3756_s16 + $0xd0] sm:$0xff]  ;;  %2722 = sbr.rel (!%p2719_p6) target bundleno = 900 (0x384), region = 148 }
 0x391   : >> { %2775 = vst [vmem:[%s3752_s4 + $0xc0] sm:$0xff] %v2774_v26  ;;  %2777 = vst [vmem:[%s3752_s4 + $0xc8] sm:$0xff] %v2776_v35  ;;  %v2780_v55 = vld [vmem:[%s3756_s16 + $0xd8] sm:$0xff]  ;;  %v2782_v45 = vld [vmem:[%s3756_s16 + $0xe0] sm:$0xff] }
 0x392   : >> { %2779 = vst [vmem:[%s3752_s4 + $0xd0] sm:$0xff] %v2778_v17  ;;  %v2784_v27 = vld [vmem:[%s3756_s16 + $0xe8] sm:$0xff]  ;;  %2781 = vst [vmem:[%s3752_s4 + $0xd8] sm:$0xff] %v2780_v55  ;;  %v2786_v52 = vld [vmem:[%s3756_s16 + $0xf0] sm:$0xff] }
 0x393   : >> { %2783 = vst [vmem:[%s3752_s4 + $0xe0] sm:$0xff] %v2782_v45  ;;  %2785 = vst [vmem:[%s3752_s4 + $0xe8] sm:$0xff] %v2784_v27  ;;  %v2788_v56 = vld [vmem:[%s3756_s16 + $0xf8] sm:$0xff]  ;;  %s5397_s16 = smov %s5148_s14 }
 0x394   : >> { %2787 = vst [vmem:[%s3752_s4 + $0xf0] sm:$0xff] %v2786_v52  ;;  %2789 = vst [vmem:[%s3752_s4 + $0xf8] sm:$0xff] %v2788_v56  ;;  %s5396_s4 = smov %s2796_s15 }
 0x395 PF: > { %s5189_s18 = sand.u32 31, %s5406_s7   ;;  %s3123_s23 = sshll.u32 %s5081_s30, 8 }
 0x396   : > { %s2801_s19 = scalar_lea.vmem %s4971_s25, %s3123_s23 [#allocation8]   ;;  %s2803_s20 = scalar_lea.vmem %s5075_s28, %s3123_s23  }
 0x397   : > { %p3114_p3 = scmp.le.s32.totalorder %s5189_s18, 0 }
 0x398   : > { %s3766_s17 = smov (!%p3114_p3), %s2803_s20   ;;  %s3770_s12 = smov (!%p3114_p3), %s2801_s19  }
 0x399   : > { %2903 = sbr.rel (%p3114_p3) target bundleno = 934 (0x3a6), region = 153  ;;  %s3774_s26 = smov (!%p3114_p3), 0  }
 0x39a   : > { %s3778_s9 = smov (!%p3114_p3), 0  }
 0x39e LB: >> { %v2813_v39 = vld [vmem:[%s3772_s12] sm:$0xff]  ;;  %s2815_s7 = sadd.s32 1, %s3776_s26  ;;  %s2807_s9 = sadd.s32 1, %s3780_s9   ;;  %s3780_s9 = sphi %s3778_s9, %s2807_s9   ;;  %s3776_s26 = sphi %s3774_s26, %s3775_s26   ;;  %s3772_s12 = sphi %s3770_s12, %s2820_s12   ;;  %s3768_s17 = sphi %s3766_s17, %s2821_s17  }
 0x39f   : >> { %2814 = vst [vmem:[%s3768_s17] sm:$0xff] %v2813_v39  ;;  %p2816_p7 = scmp.ge.s32.totalorder %s2815_s7, %s5189_s18  ;;  %p2806_p5 = scmp.ge.s32.totalorder %s2807_s9, %s5189_s18 }
 0x3a1   : >> { %s5410_s7 = smov (%p2816_p7, %s2815_s7), 0  ;;  %2809 = sbr.rel (!%p2806_p5) target bundleno = 926 (0x39e), region = 159 }
 0x3a2   : >> { %s3115_s25 = sshll.u32 %s5410_s7, 3  ;;  %s3775_s26 = smov %s5410_s7  }
 0x3a3   : >> { %s2820_s12 = scalar_lea.vmem %s2801_s19, %s3115_s25 [#allocation8]   ;;  %s2821_s17 = scalar_lea.vmem %s2803_s20, %s3115_s25  }
 0x3a6 PF: > { %p18_p8 = scmp.ge.s32.totalorder %s3845_s24, 4   ;;  %s5399_s20 = smov %s3740_s21 }
 0x3a7   : > { %s5400_s21 = smov %s3744_s22  ;;  %s5401_s22 = smov %s3855_s27 }
 0x3a8   : > { %s5402_s23 = smov %s3845_s24  ;;  %20 = sbr.rel (!%p18_p8) target bundleno = 7 (0x7), region = 170 }
 0x3ad   :  { %2837 = vsyncpa [#allocation4], 1 }
 0x3ae   :  { %2839 = vsyncpa [#allocation4 + $0x1], 1 }
 0x3af   :  { %2840 = vsyncpa [#allocation6], 1 }

</bundles_post_ra>
